<compile_context>
chip_gen: v6e
topology: v6e:2x2x1
jax: 0.10.0
libtpu: 0.0.40
codegen_flags: <defaults>
</compile_context>

<pallas_src>
import math

import jax
import jax.numpy as jnp
from jax import lax
from jax.experimental import pallas as pl
from jax.experimental.pallas import tpu as pltpu


# ----------------------------------------------------------------------------
# Pallas kernel: RPN head  (3x3 conv + ReLU, fused 1x1 cls/bbox head)
# ----------------------------------------------------------------------------
def _rpn_head_kernel(x_ref, wconv_ref, bconv_ref, whead_ref, bhead_ref,
                     out_ref, xp_ref):
    # x_ref    : (1, H, W, C)       bf16 input tile (one image, unpadded)
    # wconv    : (9*C, C)           bf16 im2col 3x3 conv weight
    # bconv    : (1, C)             f32 conv bias
    # whead    : (C, COUT_PAD)      bf16 fused [cls | box | 0-pad] 1x1 weight
    # bhead    : (1, COUT_PAD)      f32 fused head bias
    # out_ref  : (1, H*W, COUT_PAD) f32 lane-dense output slab
    # xp_ref   : (H+2, W+2, C)      bf16 VMEM scratch for the halo-padded tile
    H = x_ref.shape[1]
    W = x_ref.shape[2]
    C = x_ref.shape[3]

    # 1-pixel zero halo built in VMEM (no HBM pad copy in the wrapper).
    # Re-zero every iteration: cheap (~KBs) and keeps correctness if the grid
    # is split across megacore TensorCores (each core owns its own scratch).
    xp_ref[...] = jnp.zeros_like(xp_ref)
    xp_ref[1:H + 1, 1:W + 1, :] = x_ref[0]

    # im2col: fold all 9 taps into the contraction dim -> one deep-K matmul.
    # Tap order (kh, kw, Cin) matches the im2col weight layout built in the
    # wrapper: transpose (Cout,Cin,kh,kw)->(kh,kw,Cin,Cout), reshape (9C, Cout).
    taps = []
    for kh in range(3):
        for kw in range(3):
            taps.append(xp_ref[kh:kh + H, kw:kw + W, :].reshape(H * W, C))
    patch = jnp.concatenate(taps, axis=-1)                      # (H*W, 9C) bf16

    conv = jnp.dot(patch, wconv_ref[...],
                   preferred_element_type=jnp.float32)          # (H*W, C) f32
    hidden = jnp.maximum(conv + bconv_ref[...], 0.0)            # bias+ReLU (f32)

    # Fused cls+box head: one 128-lane-padded matmul, unmasked lane-dense store.
    head = jnp.dot(hidden.astype(whead_ref.dtype), whead_ref[...],
                   preferred_element_type=jnp.float32) + bhead_ref[...]
    out_ref[0] = head                                           # (H*W, COUT_PAD)


def _vmem_budget(H, W, C, cout_p):
    bf2, f4 = 2, 4
    est = (2 * H * W * C * bf2                       # input block (double buf)
           + (H + 2) * (W + 2) * C * bf2             # padded scratch
           + 9 * C * C * bf2 + C * cout_p * bf2      # weights
           + C * f4 + cout_p * f4                    # biases
           + 2 * H * W * cout_p * f4                 # output block (double buf)
           + H * W * 9 * C * bf2                     # im2col patch
           + H * W * C * f4 + H * W * cout_p * f4)   # temporaries
    return int(min(max(16 * 1024 * 1024, 2 * est), 100 * 1024 * 1024))


def rpn_head_pallas(x_nhwc_bf16, w_im2col, b_conv, w_head, b_head):
    """x: (N, H, W, C) bf16.  Returns (N, H*W, COUT_PAD) f32 slab."""
    N, H, W, C = x_nhwc_bf16.shape
    cout_p = w_head.shape[1]

    grid_spec = pltpu.PrefetchScalarGridSpec(
        num_scalar_prefetch=0,
        grid=(N,),
        in_specs=[
            pl.BlockSpec((1, H, W, C), lambda n: (n, 0, 0, 0)),
            pl.BlockSpec((9 * C, C), lambda n: (0, 0)),
            pl.BlockSpec((1, C), lambda n: (0, 0)),
            pl.BlockSpec((C, cout_p), lambda n: (0, 0)),
            pl.BlockSpec((1, cout_p), lambda n: (0, 0)),
        ],
        out_specs=pl.BlockSpec((1, H * W, cout_p), lambda n: (n, 0, 0)),
        scratch_shapes=[pltpu.VMEM((H + 2, W + 2, C), x_nhwc_bf16.dtype)],
    )
    return pl.pallas_call(
        _rpn_head_kernel,
        out_shape=jax.ShapeDtypeStruct((N, H * W, cout_p), jnp.float32),
        grid_spec=grid_spec,
        compiler_params=pltpu.CompilerParams(
            dimension_semantics=("parallel",),
            vmem_limit_bytes=_vmem_budget(H, W, C, cout_p)),
    )(x_nhwc_bf16, w_im2col, b_conv, w_head, b_head)


# ----------------------------------------------------------------------------
# Plain-JAX glue: anchors, box coder, process_box, NMS, create_proposal
# ----------------------------------------------------------------------------
def generate_anchors(feat_hw, image_shape, sizes=(32.0, 64.0, 128.0),
                     ratios=(1.0,)):
    H, W = feat_hw
    img_h, img_w = image_shape
    sizes = jnp.asarray(sizes, jnp.float32)
    ratios = jnp.asarray(ratios, jnp.float32)
    h_ratios = jnp.sqrt(ratios)
    w_ratios = 1.0 / h_ratios
    ws = (w_ratios[:, None] * sizes[None, :]).reshape(-1)
    hs = (h_ratios[:, None] * sizes[None, :]).reshape(-1)
    cell = jnp.stack([-ws, -hs, ws, hs], axis=1) / 2.0        # (A, 4)

    stride_y = img_h / H
    stride_x = img_w / W
    shift_x = (jnp.arange(W, dtype=jnp.float32) + 0.5) * stride_x
    shift_y = (jnp.arange(H, dtype=jnp.float32) + 0.5) * stride_y
    sx, sy = jnp.meshgrid(shift_x, shift_y, indexing="xy")    # (H, W)
    shifts = jnp.stack([sx.reshape(-1), sy.reshape(-1),
                        sx.reshape(-1), sy.reshape(-1)], axis=1)
    anchors = (shifts[:, None, :] + cell[None, :, :]).reshape(-1, 4)
    return anchors                                            # (H*W*A, 4)


def box_decode(delta, box, weights=(1.0, 1.0, 1.0, 1.0)):
    wx, wy, ww, wh = weights
    dx = delta[:, 0] / wx
    dy = delta[:, 1] / wy
    dw = jnp.minimum(delta[:, 2] / ww, math.log(1000.0 / 16.0))
    dh = jnp.minimum(delta[:, 3] / wh, math.log(1000.0 / 16.0))
    width = box[:, 2] - box[:, 0]
    height = box[:, 3] - box[:, 1]
    ctr_x = box[:, 0] + 0.5 * width
    ctr_y = box[:, 1] + 0.5 * height
    pred_ctr_x = dx * width + ctr_x
    pred_ctr_y = dy * height + ctr_y
    pred_w = jnp.exp(dw) * width
    pred_h = jnp.exp(dh) * height
    return jnp.stack([pred_ctr_x - 0.5 * pred_w,
                      pred_ctr_y - 0.5 * pred_h,
                      pred_ctr_x + 0.5 * pred_w,
                      pred_ctr_y + 0.5 * pred_h], axis=1)


def process_box(box, score, image_shape, min_size):
    img_h, img_w = image_shape
    x1 = jnp.clip(box[:, 0], 0.0, img_w)
    y1 = jnp.clip(box[:, 1], 0.0, img_h)
    x2 = jnp.clip(box[:, 2], 0.0, img_w)
    y2 = jnp.clip(box[:, 3], 0.0, img_h)
    box = jnp.stack([x1, y1, x2, y2], axis=1)
    valid = ((x2 - x1) >= min_size) & ((y2 - y1) >= min_size)
    return box, score, valid


def nms_mask(boxes, valid, iou_threshold):
    """Greedy NMS on boxes already sorted by descending score. Returns keep mask."""
    K = boxes.shape[0]
    x1, y1, x2, y2 = boxes[:, 0], boxes[:, 1], boxes[:, 2], boxes[:, 3]
    areas = (x2 - x1) * (y2 - y1)
    idx = jnp.arange(K)

    def body(i, keep):
        xx1 = jnp.maximum(x1[i], x1)
        yy1 = jnp.maximum(y1[i], y1)
        xx2 = jnp.minimum(x2[i], x2)
        yy2 = jnp.minimum(y2[i], y2)
        inter = jnp.maximum(xx2 - xx1, 0.0) * jnp.maximum(yy2 - yy1, 0.0)
        iou = inter / (areas[i] + areas - inter + 1e-9)
        suppressed = jnp.any((idx < i) & keep & (iou > iou_threshold))
        keep_i = valid[i] & jnp.logical_not(suppressed)
        return keep.at[i].set(keep_i)

    return lax.fori_loop(0, K, body, jnp.zeros((K,), jnp.bool_))


def create_proposal(cls_logits, regression, anchors, image_shape,
                    pre_nms_top_n, post_nms_top_n, nms_thresh, min_size):
    # Matches the spec module: one top-k / NMS over the flattened logits
    # (the reference RPN flattens across the batch before create_proposal).
    pre_nms_top_n = min(cls_logits.shape[0], pre_nms_top_n)
    score, topk_index = lax.top_k(cls_logits, pre_nms_top_n)
    pred_box = box_decode(regression[topk_index], anchors[topk_index])
    pred_box, score, valid = process_box(pred_box, score, image_shape, min_size)
    keep = nms_mask(pred_box, valid, nms_thresh)
    # Static-shape emulation of `boxes[nms_keep][:post_nms_top_n]`:
    order = jnp.where(keep, jnp.arange(pre_nms_top_n), pre_nms_top_n)
    order = jnp.argsort(order)[:post_nms_top_n]
    proposal = pred_box[order]
    n_keep = jnp.minimum(keep.sum(), post_nms_top_n)
    proposal = jnp.where(jnp.arange(post_nms_top_n)[:, None] < n_keep,
                         proposal, 0.0)
    return proposal, n_keep


# ----------------------------------------------------------------------------
# RPN forward (eval mode)
# ----------------------------------------------------------------------------
def rpn_forward(features_nchw, image_shape, params, *, num_anchors,
                pre_nms_top_n, post_nms_top_n, nms_thresh, min_size=1.0,
                anchor_sizes=(32.0, 64.0, 128.0), anchor_ratios=(1.0,)):
    N, C, H, W = features_nchw.shape
    A = num_anchors
    # NCHW -> NHWC and bf16 cast for the MXU (accumulation stays f32 in-kernel).
    x_nhwc = jnp.transpose(features_nchw, (0, 2, 3, 1)).astype(jnp.bfloat16)

    slab = rpn_head_pallas(x_nhwc, params["w_im2col"], params["b_conv"],
                           params["w_head"], params["b_head"])  # (N, H*W, 128p)

    # PyTorch: cls.permute(0,2,3,1).flatten() / reg.permute(0,2,3,1).reshape(-1,4)
    cls_logits = slab[:, :, :A].reshape(-1)                  # (N*H*W*A,)
    regression = slab[:, :, A:5 * A].reshape(-1, 4)          # (N*H*W*A, 4)

    anchors = generate_anchors((H, W), image_shape, anchor_sizes, anchor_ratios)
    anchors = jnp.tile(anchors, (N, 1))                      # match flat logits

    proposal, n_keep = create_proposal(
        lax.stop_gradient(cls_logits), lax.stop_gradient(regression),
        anchors, image_shape, pre_nms_top_n, post_nms_top_n, nms_thresh,
        min_size)
    return proposal, n_keep


def init_params(key, in_channels, num_anchors):
    """Deterministic synthetic init matching the PyTorch RPN head shapes.

    PyTorch layouts:  conv (C, C, 3, 3), cls (A, C, 1, 1), bbox (4A, C, 1, 1).
    Kernel layouts:   im2col conv (9C, C) bf16, fused head (C, pad128(5A)) bf16."""
    k1, k2, k3 = jax.random.split(key, 3)
    C, A = in_channels, num_anchors
    cout_p = ((5 * A + 127) // 128) * 128

    w_conv_pt = 0.01 * jax.random.normal(k1, (C, C, 3, 3), jnp.float32)
    w_cls_pt = 0.01 * jax.random.normal(k2, (A, C, 1, 1), jnp.float32)
    w_box_pt = 0.01 * jax.random.normal(k3, (4 * A, C, 1, 1), jnp.float32)

    # (Cout, Cin, 3, 3) -> (kh, kw, Cin, Cout) -> (9*Cin, Cout)  [im2col order]
    w_im2col = jnp.transpose(w_conv_pt, (2, 3, 1, 0)).reshape(9 * C, C)
    # Fused 1x1 head weight: [cls | box | zero-pad] -> (C, cout_p)
    w_head = jnp.concatenate([w_cls_pt[:, :, 0, 0].T,
                              w_box_pt[:, :, 0, 0].T], axis=1)     # (C, 5A)
    w_head = jnp.pad(w_head, ((0, 0), (0, cout_p - 5 * A)))

    return {
        "w_im2col": w_im2col.astype(jnp.bfloat16),
        "b_conv": jnp.zeros((1, C), jnp.float32),
        "w_head": w_head.astype(jnp.bfloat16),
        "b_head": jnp.zeros((1, cout_p), jnp.float32),
    }


if __name__ == "__main__":
    key = jax.random.PRNGKey(0)
    k_feat, k_param = jax.random.split(key)

    # Small, module-consistent shapes.
    N, C, H, W = 2, 16, 16, 16                 # features: NCHW like PyTorch
    A = 3                                      # 3 anchor sizes x 1 ratio
    image_shape = (128.0, 128.0)               # (H_img, W_img)

    features = jax.random.normal(k_feat, (N, C, H, W), jnp.float32)
    params = init_params(k_param, C, A)

    proposal, n_keep = rpn_forward(
        features, image_shape, params,
        num_anchors=A,
        pre_nms_top_n=200,                     # pre_nms_top_n['testing']
        post_nms_top_n=50,                     # post_nms_top_n['testing']
        nms_thresh=0.7,
        min_size=1.0)

    proposal = jax.block_until_ready(proposal)
    n_keep = jax.block_until_ready(n_keep)
    assert proposal.shape == (50, 4)
    assert bool(jnp.all(jnp.isfinite(proposal)))
    print("KERNEL_OK")
</pallas_src>

<mosaic_0001>
module attributes {stable_mosaic.version = 11 : i64} {
  func.func @_rpn_head_kernel(%arg0: i32, %arg1: memref<1x16x16x16xbf16, #tpu.memory_space<vmem>>, %arg2: memref<144x16xbf16, #tpu.memory_space<vmem>>, %arg3: memref<1x16xf32, #tpu.memory_space<vmem>>, %arg4: memref<16x128xbf16, #tpu.memory_space<vmem>>, %arg5: memref<1x128xf32, #tpu.memory_space<vmem>>, %arg6: memref<1x256x128xf32, #tpu.memory_space<vmem>>, %arg7: memref<18x18x16xbf16, #tpu.memory_space<vmem>>) attributes {dimension_semantics = [#tpu.dimension_semantics<parallel>], iteration_bounds = array<i64: 2>, scalar_prefetch = 0 : i64, scratch_operands = 1 : i64, tpu.core_type = #tpu.core_type<tc>, window_params = [{transform_indices = @transform_0, window_bounds = array<i64: 1, 16, 16, 16>}, {pipeline_mode = #tpu.pipeline_mode<synchronous>, transform_indices = @transform_1, window_bounds = array<i64: 144, 16>}, {pipeline_mode = #tpu.pipeline_mode<synchronous>, transform_indices = @transform_2, window_bounds = array<i64: 1, 16>}, {pipeline_mode = #tpu.pipeline_mode<synchronous>, transform_indices = @transform_3, window_bounds = array<i64: 16, 128>}, {pipeline_mode = #tpu.pipeline_mode<synchronous>, transform_indices = @transform_4, window_bounds = array<i64: 1, 128>}, {transform_indices = @transform_5, window_bounds = array<i64: 1, 256, 128>}]} {
    %cst = arith.constant 0.000000e+00 : bf16
    %0 = vector.broadcast %cst : bf16 to vector<18x18x16xbf16>
    %c0 = arith.constant 0 : index
    %c0_0 = arith.constant 0 : index
    %c0_1 = arith.constant 0 : index
    %1 = vector.load %arg7[%c0, %c0_0, %c0_1] : memref<18x18x16xbf16, #tpu.memory_space<vmem>>, vector<18x18x16xbf16>
    tpu.vector_store %arg7[%c0, %c0_0, %c0_1], %0 {strides = array<i32>} : memref<18x18x16xbf16, #tpu.memory_space<vmem>>, vector<18x18x16xbf16>,
    %c0_2 = arith.constant 0 : index
    %c0_3 = arith.constant 0 : index
    %c0_4 = arith.constant 0 : index
    %c0_5 = arith.constant 0 : index
    %2 = vector.load %arg1[%c0_2, %c0_3, %c0_4, %c0_5] : memref<1x16x16x16xbf16, #tpu.memory_space<vmem>>, vector<1x16x16x16xbf16>
    %3 = vector.shape_cast %2 : vector<1x16x16x16xbf16> to vector<16x16x16xbf16>
    %c1 = arith.constant 1 : index
    %c1_6 = arith.constant 1 : index
    %c0_7 = arith.constant 0 : index
    %4 = vector.load %arg7[%c1, %c1_6, %c0_7] : memref<18x18x16xbf16, #tpu.memory_space<vmem>>, vector<16x16x16xbf16>
    tpu.vector_store %arg7[%c1, %c1_6, %c0_7], %3 {strides = array<i32>} : memref<18x18x16xbf16, #tpu.memory_space<vmem>>, vector<16x16x16xbf16>,
    %c0_8 = arith.constant 0 : index
    %c0_9 = arith.constant 0 : index
    %c0_10 = arith.constant 0 : index
    %5 = vector.load %arg7[%c0_8, %c0_9, %c0_10] : memref<18x18x16xbf16, #tpu.memory_space<vmem>>, vector<16x16x16xbf16>
    %6 = vector.shape_cast %5 : vector<16x16x16xbf16> to vector<256x16xbf16>
    %c0_11 = arith.constant 0 : index
    %c1_12 = arith.constant 1 : index
    %c0_13 = arith.constant 0 : index
    %7 = vector.load %arg7[%c0_11, %c1_12, %c0_13] : memref<18x18x16xbf16, #tpu.memory_space<vmem>>, vector<16x16x16xbf16>
    %8 = vector.shape_cast %7 : vector<16x16x16xbf16> to vector<256x16xbf16>
    %c0_14 = arith.constant 0 : index
    %c2 = arith.constant 2 : index
    %c0_15 = arith.constant 0 : index
    %9 = vector.load %arg7[%c0_14, %c2, %c0_15] : memref<18x18x16xbf16, #tpu.memory_space<vmem>>, vector<16x16x16xbf16>
    %10 = vector.shape_cast %9 : vector<16x16x16xbf16> to vector<256x16xbf16>
    %c1_16 = arith.constant 1 : index
    %c0_17 = arith.constant 0 : index
    %c0_18 = arith.constant 0 : index
    %11 = vector.load %arg7[%c1_16, %c0_17, %c0_18] : memref<18x18x16xbf16, #tpu.memory_space<vmem>>, vector<16x16x16xbf16>
    %12 = vector.shape_cast %11 : vector<16x16x16xbf16> to vector<256x16xbf16>
    %c1_19 = arith.constant 1 : index
    %c1_20 = arith.constant 1 : index
    %c0_21 = arith.constant 0 : index
    %13 = vector.load %arg7[%c1_19, %c1_20, %c0_21] : memref<18x18x16xbf16, #tpu.memory_space<vmem>>, vector<16x16x16xbf16>
    %14 = vector.shape_cast %13 : vector<16x16x16xbf16> to vector<256x16xbf16>
    %c1_22 = arith.constant 1 : index
    %c2_23 = arith.constant 2 : index
    %c0_24 = arith.constant 0 : index
    %15 = vector.load %arg7[%c1_22, %c2_23, %c0_24] : memref<18x18x16xbf16, #tpu.memory_space<vmem>>, vector<16x16x16xbf16>
    %16 = vector.shape_cast %15 : vector<16x16x16xbf16> to vector<256x16xbf16>
    %c2_25 = arith.constant 2 : index
    %c0_26 = arith.constant 0 : index
    %c0_27 = arith.constant 0 : index
    %17 = vector.load %arg7[%c2_25, %c0_26, %c0_27] : memref<18x18x16xbf16, #tpu.memory_space<vmem>>, vector<16x16x16xbf16>
    %18 = vector.shape_cast %17 : vector<16x16x16xbf16> to vector<256x16xbf16>
    %c2_28 = arith.constant 2 : index
    %c1_29 = arith.constant 1 : index
    %c0_30 = arith.constant 0 : index
    %19 = vector.load %arg7[%c2_28, %c1_29, %c0_30] : memref<18x18x16xbf16, #tpu.memory_space<vmem>>, vector<16x16x16xbf16>
    %20 = vector.shape_cast %19 : vector<16x16x16xbf16> to vector<256x16xbf16>
    %c2_31 = arith.constant 2 : index
    %c2_32 = arith.constant 2 : index
    %c0_33 = arith.constant 0 : index
    %21 = vector.load %arg7[%c2_31, %c2_32, %c0_33] : memref<18x18x16xbf16, #tpu.memory_space<vmem>>, vector<16x16x16xbf16>
    %22 = vector.shape_cast %21 : vector<16x16x16xbf16> to vector<256x16xbf16>
    %23 = tpu.concatenate %6, %8, %10, %12, %14, %16, %18, %20, %22 in 1 : vector<256x16xbf16>, vector<256x16xbf16>, vector<256x16xbf16>, vector<256x16xbf16>, vector<256x16xbf16>, vector<256x16xbf16>, vector<256x16xbf16>, vector<256x16xbf16>, vector<256x16xbf16> -> vector<256x144xbf16>
    %c0_34 = arith.constant 0 : index
    %c0_35 = arith.constant 0 : index
    %24 = vector.load %arg2[%c0_34, %c0_35] : memref<144x16xbf16, #tpu.memory_space<vmem>>, vector<144x16xbf16>
    %cst_36 = arith.constant dense<0.000000e+00> : vector<256x16xf32>
    %25 = tpu.matmul %23, %24, %cst_36 {dimension_numbers = #tpu.dot_dimension_numbers<[1], [0], [0], [1], [0, 0, 1, 1], [], []>} : vector<256x144xbf16>, vector<144x16xbf16>, vector<256x16xf32> -> vector<256x16xf32>
    %c0_37 = arith.constant 0 : index
    %c0_38 = arith.constant 0 : index
    %26 = vector.load %arg3[%c0_37, %c0_38] : memref<1x16xf32, #tpu.memory_space<vmem>>, vector<1x16xf32>
    %27 = vector.broadcast %26 : vector<1x16xf32> to vector<256x16xf32>
    %28 = arith.addf %25, %27 : vector<256x16xf32>
    %cst_39 = arith.constant 0.000000e+00 : f32
    %29 = vector.broadcast %cst_39 : f32 to vector<256x16xf32>
    %30 = arith.maximumf %28, %29 : vector<256x16xf32>
    %31 = arith.truncf %30 : vector<256x16xf32> to vector<256x16xbf16>
    %c0_40 = arith.constant 0 : index
    %c0_41 = arith.constant 0 : index
    %32 = vector.load %arg4[%c0_40, %c0_41] : memref<16x128xbf16, #tpu.memory_space<vmem>>, vector<16x128xbf16>
    %cst_42 = arith.constant dense<0.000000e+00> : vector<256x128xf32>
    %33 = tpu.matmul %31, %32, %cst_42 {dimension_numbers = #tpu.dot_dimension_numbers<[1], [0], [0], [1], [0, 0, 1, 1], [], []>} : vector<256x16xbf16>, vector<16x128xbf16>, vector<256x128xf32> -> vector<256x128xf32>
    %c0_43 = arith.constant 0 : index
    %c0_44 = arith.constant 0 : index
    %34 = vector.load %arg5[%c0_43, %c0_44] : memref<1x128xf32, #tpu.memory_space<vmem>>, vector<1x128xf32>
    %35 = vector.broadcast %34 : vector<1x128xf32> to vector<256x128xf32>
    %36 = arith.addf %33, %35 : vector<256x128xf32>
    %c0_45 = arith.constant 0 : index
    %c0_46 = arith.constant 0 : index
    %c0_47 = arith.constant 0 : index
    %37 = vector.load %arg6[%c0_45, %c0_46, %c0_47] : memref<1x256x128xf32, #tpu.memory_space<vmem>>, vector<1x256x128xf32>
    %38 = vector.shape_cast %37 : vector<1x256x128xf32> to vector<256x128xf32>
    %39 = vector.shape_cast %36 : vector<256x128xf32> to vector<1x256x128xf32>
    tpu.vector_store %arg6[%c0_45, %c0_46, %c0_47], %39 {strides = array<i32>} : memref<1x256x128xf32, #tpu.memory_space<vmem>>, vector<1x256x128xf32>,
    return
  }
  func.func @transform_0(%arg0: i32) -> (i32, i32, i32, i32) {
    %c0_i32 = arith.constant 0 : i32
    %c0_i32_0 = arith.constant 0 : i32
    %c0_i32_1 = arith.constant 0 : i32
    %c0_i32_2 = arith.constant 0 : i32
    return %arg0, %c0_i32, %c0_i32_0, %c0_i32_1 : i32, i32, i32, i32
  }
  func.func @transform_1(%arg0: i32) -> (i32, i32) {
    %c0_i32 = arith.constant 0 : i32
    %c0_i32_0 = arith.constant 0 : i32
    %c0_i32_1 = arith.constant 0 : i32
    return %c0_i32, %c0_i32_0 : i32, i32
  }
  func.func @transform_2(%arg0: i32) -> (i32, i32) {
    %c0_i32 = arith.constant 0 : i32
    %c0_i32_0 = arith.constant 0 : i32
    %c0_i32_1 = arith.constant 0 : i32
    return %c0_i32, %c0_i32_0 : i32, i32
  }
  func.func @transform_3(%arg0: i32) -> (i32, i32) {
    %c0_i32 = arith.constant 0 : i32
    %c0_i32_0 = arith.constant 0 : i32
    %c0_i32_1 = arith.constant 0 : i32
    return %c0_i32, %c0_i32_0 : i32, i32
  }
  func.func @transform_4(%arg0: i32) -> (i32, i32) {
    %c0_i32 = arith.constant 0 : i32
    %c0_i32_0 = arith.constant 0 : i32
    %c0_i32_1 = arith.constant 0 : i32
    return %c0_i32, %c0_i32_0 : i32, i32
  }
  func.func @transform_5(%arg0: i32) -> (i32, i32, i32) {
    %c0_i32 = arith.constant 0 : i32
    %c0_i32_0 = arith.constant 0 : i32
    %c0_i32_1 = arith.constant 0 : i32
    return %arg0, %c0_i32, %c0_i32_0 : i32, i32, i32
  }
}

</mosaic_0001>

<bundles_post_ra>
// kernel: tpu_custom_call.1
= control target key start
LH: loop header
LB: loop body
LE: loop exit
PB: predicated region body
PF: predicated region fallthrough
CT: control target
= control target key end

     0   :  { %10 = vsyncpa [#allocation4], 0  ;;  %s6941_s0 = inlined_call_operand.hbm [shape: bf16[2,16,16,16], index: 0, kind: input, shape index: {}]   ;;  %s6942_s1 = inlined_call_operand.vmem [shape: bf16[144,16], index: 1, kind: input, shape index: {}]   ;;  %s6943_s2 = inlined_call_operand.vmem [shape: f32[1,16], index: 2, kind: input, shape index: {}]   ;;  %s6944_s3 = inlined_call_operand.vmem [shape: bf16[16,128], index: 3, kind: input, shape index: {}]   ;;  %s6945_s4 = inlined_call_operand.vmem [shape: f32[1,128], index: 4, kind: input, shape index: {}]   ;;  %s6946_s5 = inlined_call_operand.hbm [shape: f32[2,256,128], index: 5, kind: output, shape index: {}]  }
   0x1   :  { %12 = vsyncpa [#allocation4 + $0x1], 0 }
   0x2   :  { %13 = vsyncpa [#allocation5], 0 }
   0x3   :  { %15 = vsyncpa [#allocation5 + $0x1], 0  ;;  %s4855_s18 = smov 0   ;;  %s4857_s19 = smov 0  }
   0x4   :  { %s4859_s20 = smov 0   ;;  %s4861_s21 = smov 0  }
   0x5 LB: > { %s4876_s22 = sadd.s32 4294967295, %s4809_s21   ;;  %s4250_s23 = sadd.s32 4294967294, %s4809_s21   ;;  %s4809_s21 = sphi %s4861_s21, %s7017_s21   ;;  %s4805_s20 = sphi %s4859_s20, %s7016_s20   ;;  %s4801_s19 = sphi %s4857_s19, %s7015_s19   ;;  %s4797_s18 = sphi %s4855_s18, %s7014_s18  }
   0x6   : > { %s4880_s24 = sadd.s32 1, %s4809_s21   ;;  %s28_s25 = sadd.s32 1, %s4805_s20 }
   0x7   : > { %s25_s26 = ssub.s32 %s4809_s21, %s4880_s24  ;;  %p35_p0 = scmp.ne.s32.totalorder %s4805_s20, %s4801_s19 }
   0x8   : > { %p26_p1 = scmp.eq.s32.totalorder %s25_s26, 0  ;;  %p36_p2 = scmp.eq.s32.totalorder %s4809_s21, 0 }
   0x9   : > { %p41_p3 = scmp.ne.s32.totalorder %s4801_s19, %s4797_s18  ;;  %p42_p4 = scmp.eq.s32.totalorder %s4876_s22, 0 }
   0xa   : > { %s4892_s27 = scalar_select %p26_p1, %s4805_s20, %s28_s25  }
   0xb   : > { %p4894_p5 = por %p36_p2, %p35_p0  ;;  %p4898_p6 = por %p42_p4, %p41_p3 }
   0xc   : > { %p149_p7 = scmp.eq.s32.totalorder %s4876_s22, 1  ;;  %p155_p8 = scmp.eq.s32.totalorder %s4250_s23, 1 }
   0xd   : > { %s6958_s29 = scalar_select %p4898_p6, 1, 0 }
   0xe   : > { %p4583_p10 = scmp.lt.s32.totalorder %s4809_s21, 2  ;;  %p4905_p11 = por %p149_p7, %p35_p0 }
   0xf   : > { %p4909_p12 = por %p155_p8, %p41_p3  ;;  %s187_s7 = sand.u32 1, %s4805_s20  }
  0x10   : > { %s6959_s30 = scalar_select %p4905_p11, 1, 0 }
  0x11   : > { %s6960_s6 = scalar_select %p4909_p12, 1, 0 }
  0x12   : > { %s4500_s8 = sshll.u32 %s4809_s21, 11  ;;  %s4253_s9 = sshll.u32 %s187_s7, 7 }
  0x13   : > { %s4918_s12 = scalar_lea.hbm %s6941_s0, %s4500_s8  ;;  %s191_s13 = scalar_lea.vmem [#allocation3], %s4253_s9 }
  0x14   : > { %s198_s14 = sshll.u32 %s191_s13, 4  ;;  %p4922_p13 = pnand %p4583_p10, %p4894_p5  ;;  %s4926_s14 = int_to_ptr.vmem [resolvable:$true] %s198_s14 }
  0x15   : > { %s4928_s16 = scalar_lea.sflag [#allocation4], %s187_s7  ;;  %s4717_s17 = scalar_lea.hbm %s4918_s12, 2048 }
  0x16   : > { %p4718_p0 = scmp.ne.s32.totalorder %s4918_s12, %s4717_s17  ;;  %p4719_p1 = pneg %p4922_p13 }
  0x17   : > { %s4722_s26 = scalar_lea.hbm %s6941_s0, 4096  ;;  %p4723_p4 = scmp.lt.s32.totalorder %s4918_s12, %s6941_s0 }
  0x18   : > { %p4720_p2 = pnand %p4719_p1, %p4718_p0  ;;  %p4724_p5 = scmp.lt.s32.totalorder %s4722_s26, %s4717_s17 }
  0x1a   : > { %p4721_p3 = pneg %p4720_p2  ;;  %p4725_p7 = por %p4724_p5, %p4723_p4 }
  0x1c   : > { %p4726_p8 = pnand %p4725_p7, %p4721_p3 }
  0x1e   : > { %4729 = shalt.err (!%p4726_p8)
}
  0x1f   : > { %s4730_s7 = scalar_lea.vmem %s4926_s14, 2048  ;;  %s4811_s9 = smov [#allocation3]  }
  0x20   : > { %p4731_p10 = scmp.ne.s32.totalorder %s4926_s14, %s4730_s7  ;;  %s4735_s10 = sshll.u32 %s4811_s9, 4  ;;  %s4736_s10 = int_to_ptr.vmem [resolvable:$false] %s4735_s10 }
  0x21   : > { %s4737_s11 = scalar_lea.vmem %s4736_s10, 4096  ;;  %p4738_p2 = scmp.lt.s32.totalorder %s4926_s14, %s4736_s10 }
  0x22   : > { %p4733_p9 = pnand %p4731_p10, %p4719_p1  ;;  %p4739_p12 = scmp.lt.s32.totalorder %s4737_s11, %s4730_s7 }
  0x24   : > { %p4734_p0 = pneg %p4733_p9  ;;  %p4740_p11 = por %p4739_p12, %p4738_p2 }
  0x26   : > { %p4741_p6 = pnand %p4740_p11, %p4734_p0 }
  0x28   : > { %4744 = shalt.err (!%p4741_p6)
}
  0x29   : > { %s4812_s13 = smov 64   ;;  %s4813_s17 = smov 4  }
  0x2a   : > { %4578 = dma.hbm_to_vmem [thread:$0]  (!%p4922_p13), %s4918_s12, 2048, %s4926_s14, %s4928_s16, %s4812_s13, %s4812_s13, %s4813_s17  }
  0x2b   : > { %p4256_p9 = scmp.ge.s32.totalorder %s4809_s21, 1  ;;  %p206_p1 = scmp.lt.s32.totalorder %s4809_s21, 3 }
  0x2d   : > { %p207_p3 = pnand %p4256_p9, %p206_p1 }
  0x2f   : > { %210 = sbr.rel (%p207_p3) target bundleno = 980 (0x3d4), region = 40 }
  0x34   : > { %s4952_s23 = sand.u32 1, %s4801_s19   ;;  %p6962_p6 = scmp.ne.s32.totalorder %s6958_s29, 0 }
  0x35   : > { %s4257_s25 = sshll.u32 %s4952_s23, 7  ;;  %s213_s26 = scalar_lea.sflag [#allocation4], %s4952_s23 }
  0x36   : > { %s4956_s28 = scalar_lea.vmem [#allocation3], %s4257_s25 }
  0x37   : > { %4788 = dma.done.wait (%p6962_p6), %s213_s26, 2048  }
  0x38   : > { %4790 = vsyncadd (%p6962_p6), %s213_s26, 4294965248  ;;  %vm244_vm0 = vcmask 125952   ;;  %vm247_vm1 = vcmask 122880   ;;  %v4814_v0 = vmov 0   ;;  %vm1272_vm2 = vcmask 1042432   ;;  %s4815_s29 = smov 32  }
  0x39   : > { %245 = vst.msk [vmem:[#allocation2] sm:$0xf] %vm244_vm0, %v4814_v0  ;;  %246 = vst.msk [vmem:[#allocation2 + $0x4] sm:$0xf] %vm244_vm0, %v4814_v0  ;;  %3698 = vmatprep.subr.bf16.mxu0 %v4814_v0  ;;  %4553 = vmatprep.subr.bf16.mxu1 %v4814_v0  ;;  %vm1273_vm3 = vcmask 1046532   ;;  %s4816_s12 = smov 16  }
  0x3a   : > { %248 = vst.msk [vmem:[#allocation2 + $0x8] sm:$0x1] %vm247_vm1, %v4814_v0  ;;  %251 = vst.msk [vmem:[#allocation2 + $0x14] sm:$0x1] %vm247_vm1, %v4814_v0  ;;  %vm821_vm4 = vsmask.f32 3328 }
  0x3b   : > { %249 = vst.msk [vmem:[#allocation2 + $0xc] sm:$0xf] %vm244_vm0, %v4814_v0  ;;  %250 = vst.msk [vmem:[#allocation2 + $0x10] sm:$0xf] %vm244_vm0, %v4814_v0  ;;  %vm822_vm5 = vsmask.f32 7440 }
  0x3c   : > { %252 = vst.msk [vmem:[#allocation2 + $0x18] sm:$0xf] %vm244_vm0, %v4814_v0  ;;  %253 = vst.msk [vmem:[#allocation2 + $0x1c] sm:$0xf] %vm244_vm0, %v4814_v0  ;;  %vm332_vm6 = vsmask.f32 256 }
  0x3d   : > { %254 = vst.msk [vmem:[#allocation2 + $0x20] sm:$0x1] %vm247_vm1, %v4814_v0  ;;  %257 = vst.msk [vmem:[#allocation2 + $0x2c] sm:$0x1] %vm247_vm1, %v4814_v0  ;;  %v300_v2 = vld [vmem:[%s4956_s28] sm:$0xf] }
  0x3e   : > { %255 = vst.msk [vmem:[#allocation2 + $0x24] sm:$0xf] %vm244_vm0, %v4814_v0  ;;  %256 = vst.msk [vmem:[#allocation2 + $0x28] sm:$0xf] %vm244_vm0, %v4814_v0  ;;  %vm333_vm8 = vsmask.f32 4368 }
  0x3f   : > { %258 = vst.msk [vmem:[#allocation2 + $0x30] sm:$0xf] %vm244_vm0, %v4814_v0  ;;  %259 = vst.msk [vmem:[#allocation2 + $0x34] sm:$0xf] %vm244_vm0, %v4814_v0  ;;  %vm657_vm9 = vsmask.f32 7938 }
  0x40   : > { %260 = vst.msk [vmem:[#allocation2 + $0x38] sm:$0x1] %vm247_vm1, %v4814_v0  ;;  %263 = vst.msk [vmem:[#allocation2 + $0x44] sm:$0x1] %vm247_vm1, %v4814_v0  ;;  %v774_v3 = vld [vmem:[#allocation2 + $0x4] sm:$0xf] }
  0x41   : > { %261 = vst.msk [vmem:[#allocation2 + $0x3c] sm:$0xf] %vm244_vm0, %v4814_v0  ;;  %262 = vst.msk [vmem:[#allocation2 + $0x40] sm:$0xf] %vm244_vm0, %v4814_v0  ;;  %v805_v4 = vld [vmem:[#allocation2 + $0x8] sm:$0x1] }
  0x42   : > { %264 = vst.msk [vmem:[#allocation2 + $0x48] sm:$0xf] %vm244_vm0, %v4814_v0  ;;  %265 = vst.msk [vmem:[#allocation2 + $0x4c] sm:$0xf] %vm244_vm0, %v4814_v0  ;;  %v1208_v5 = vld [vmem:[#allocation2] sm:$0xe] }
  0x43   : > { %266 = vst.msk [vmem:[#allocation2 + $0x50] sm:$0x1] %vm247_vm1, %v4814_v0  ;;  %269 = vst.msk [vmem:[#allocation2 + $0x5c] sm:$0x1] %vm247_vm1, %v4814_v0  ;;  %v844_v6 = vshll.u32 %v805_v4, 16  ;;  %v4259_v7 = vrot.slane %v1208_v5, 9 }
  0x44   : > { %267 = vst.msk [vmem:[#allocation2 + $0x54] sm:$0xf] %vm244_vm0, %v4814_v0  ;;  %268 = vst.msk [vmem:[#allocation2 + $0x58] sm:$0xf] %vm244_vm0, %v4814_v0  ;;  %v1277_v8 = vrot.slane %v774_v3, 5  ;;  %v1280_v9 = vrot.slane %v805_v4, 5 }
  0x45   : > { %270 = vst.msk [vmem:[#allocation2 + $0x60] sm:$0xf] %vm244_vm0, %v4814_v0  ;;  %271 = vst.msk [vmem:[#allocation2 + $0x64] sm:$0xf] %vm244_vm0, %v4814_v0  ;;  %v773_v10 = vld [vmem:[#allocation2] sm:$0xf] }
  0x46   : > { %272 = vst.msk [vmem:[#allocation2 + $0x68] sm:$0x1] %vm247_vm1, %v4814_v0  ;;  %275 = vst.msk [vmem:[#allocation2 + $0x74] sm:$0x1] %vm247_vm1, %v4814_v0  ;;  %v825_v11 = vshrl.u32 %v773_v10, 16  ;;  %v828_v12 = vshll.u32 %v773_v10, 16 }
  0x47   : > { %273 = vst.msk [vmem:[#allocation2 + $0x6c] sm:$0xf] %vm244_vm0, %v4814_v0  ;;  %274 = vst.msk [vmem:[#allocation2 + $0x70] sm:$0xf] %vm244_vm0, %v4814_v0  ;;  %v834_v13 = vshll.u32 %v774_v3, 16  ;;  %v838_v14 = vshrl.u32 %v774_v3, 16 }
  0x48   : > { %276 = vst.msk [vmem:[#allocation2 + $0x78] sm:$0xf] %vm244_vm0, %v4814_v0  ;;  %277 = vst.msk [vmem:[#allocation2 + $0x7c] sm:$0xf] %vm244_vm0, %v4814_v0  ;;  %v301_v15 = vld [vmem:[%s4956_s28 + $0x4] sm:$0xf] }
  0x49   : > { %278 = vst.msk [vmem:[#allocation2 + $0x80] sm:$0x1] %vm247_vm1, %v4814_v0  ;;  %281 = vst.msk [vmem:[#allocation2 + $0x8c] sm:$0x1] %vm247_vm1, %v4814_v0  ;;  %v1279_v17 = vrot.slane %v1277_v8, 4  ;;  %v846_v18 = vrot.slane %v844_v6, 5 }
  0x4a   : > { %279 = vst.msk [vmem:[#allocation2 + $0x84] sm:$0xf] %vm244_vm0, %v4814_v0  ;;  %280 = vst.msk [vmem:[#allocation2 + $0x88] sm:$0xf] %vm244_vm0, %v4814_v0  ;;  %v336_v19 = vshrl.u32 %v300_v2, 16  ;;  %v827_v20 = vrot.slane %v825_v11, 4 }
  0x4b   : > { %282 = vst.msk [vmem:[#allocation2 + $0x90] sm:$0xf] %vm244_vm0, %v4814_v0  ;;  %283 = vst.msk [vmem:[#allocation2 + $0x94] sm:$0xf] %vm244_vm0, %v4814_v0  ;;  %v830_v21 = vrot.slane %v828_v12, 5  ;;  %v836_v22 = vrot.slane %v834_v13, 5 }
  0x4c   : > { %284 = vst.msk [vmem:[#allocation2 + $0x98] sm:$0x1] %vm247_vm1, %v4814_v0  ;;  %287 = vst.msk [vmem:[#allocation2 + $0xa4] sm:$0x1] %vm247_vm1, %v4814_v0  ;;  %v840_v23 = vrot.slane %v838_v14, 4  ;;  %v338_v26 = vrot.slane %v336_v19, 7 }
  0x4d   : > { %285 = vst.msk [vmem:[#allocation2 + $0x9c] sm:$0xf] %vm244_vm0, %v4814_v0  ;;  %286 = vst.msk [vmem:[#allocation2 + $0xa0] sm:$0xf] %vm244_vm0, %v4814_v0  ;;  %v304_v24 = vld [vmem:[%s4956_s28 + $0x10] sm:$0xf]  ;;  %v831_v31 = vor.u32 %v830_v21, %v827_v20 }
  0x4e   : > { %288 = vst.msk [vmem:[#allocation2 + $0xa8] sm:$0xf] %vm244_vm0, %v4814_v0  ;;  %289 = vst.msk [vmem:[#allocation2 + $0xac] sm:$0xf] %vm244_vm0, %v4814_v0  ;;  %v339_v27 = vshll.u32 %v300_v2, 16  ;;  %v344_v28 = vshrl.u32 %v301_v15, 16  ;;  %v841_v32 = vor.u32 %v840_v23, %v836_v22 }
  0x4f   : > { %290 = vst.msk [vmem:[#allocation2 + $0xb0] sm:$0x1] %vm247_vm1, %v4814_v0  ;;  %293 = vst.msk [vmem:[#allocation2 + $0xbc] sm:$0x1] %vm247_vm1, %v4814_v0  ;;  %v305_v29 = vld [vmem:[%s4956_s28 + $0x14] sm:$0xf] }
  0x50   : > { %291 = vst.msk [vmem:[#allocation2 + $0xb4] sm:$0xf] %vm244_vm0, %v4814_v0  ;;  %292 = vst.msk [vmem:[#allocation2 + $0xb8] sm:$0xf] %vm244_vm0, %v4814_v0  ;;  %v347_v33 = vshll.u32 %v301_v15, 16  ;;  %v341_v37 = vor.u32 %v339_v27, %v338_v26  ;;  %v342_v38 = vrot.slane %v338_v26, 4 }
  0x51   : > { %294 = vst.msk [vmem:[#allocation2 + $0xc0] sm:$0xf] %vm244_vm0, %v4814_v0  ;;  %295 = vst.msk [vmem:[#allocation2 + $0xc4] sm:$0xf] %vm244_vm0, %v4814_v0  ;;  %v659_v35 = vld [vmem:[#allocation2 + $0xc] sm:$0xf] }
  0x52   : > { %296 = vst.msk [vmem:[#allocation2 + $0xc8] sm:$0x1] %vm247_vm1, %v4814_v0  ;;  %299 = vst.msk [vmem:[#allocation2 + $0xd4] sm:$0x1] %vm247_vm1, %v4814_v0  ;;  %v346_v39 = vrot.slane %v344_v28, 7  ;;  %v370_v40 = vshrl.u32 %v304_v24, 16 }
  0x53   : > { %297 = vst.msk [vmem:[#allocation2 + $0xcc] sm:$0xf] %vm244_vm0, %v4814_v0  ;;  %298 = vst.msk [vmem:[#allocation2 + $0xd0] sm:$0xf] %vm244_vm0, %v4814_v0  ;;  %v832_v41 = vrot.slane %v831_v31, 4  ;;  %v842_v42 = vrot.slane %v841_v32, 4 }
  0x54   : > { %vm5072_vm7 = vmor %vm1272_vm2, %vm1273_vm3  ;;  %v373_v44 = vshll.u32 %v304_v24, 16  ;;  %v378_v45 = vshrl.u32 %v305_v29, 16  ;;  %v349_v46 = vor.u32 %v347_v33, %v346_v39  ;;  %v351_v47 = vrot.slane %v346_v39, 4  ;;  %v302_v50 = vld [vmem:[%s4956_s28 + $0x8] sm:$0xf]  ;;  %s4817_s14 = smov 48  }
  0x55   : > { %v1278_v16 = vsel %vm5072_vm7, %v4259_v7, %v1277_v8  ;;  %v1281_v25 = vsel %vm5072_vm7, %v1279_v17, %v1280_v9  ;;  %vm5086_vm10 = vmand %vm244_vm0, %vm657_vm9  ;;  %v372_v49 = vrot.slane %v370_v40, 7  ;;  %v303_v51 = vld [vmem:[%s4956_s28 + $0xc] sm:$0xf]  ;;  %v381_v56 = vshll.u32 %v305_v29, 16  ;;  %v665_v58 = vld [vmem:[#allocation2 + $0x14] sm:$0x1] }
  0x56   : > { %v4339_v30 = vcombine.low %v1278_v16, %v1281_v25  ;;  %vm5092_vm11 = vmor %vm821_vm4, %vm822_vm5  ;;  %v660_v48 = vsel %vm5086_vm10, %v341_v37, %v659_v35  ;;  %v380_v55 = vrot.slane %v378_v45, 7  ;;  %v675_v57 = vld [vmem:[#allocation2 + $0x24] sm:$0xf]  ;;  %v353_v2 = vshrl.u32 %v302_v50, 16  ;;  %v679_v5 = vld [vmem:[#allocation2 + $0x2c] sm:$0x1] }
  0x57   : > { %vm5099_vm12 = vmor %vm332_vm6, %vm333_vm8  ;;  %v837_v52 = vsel %vm5092_vm11, %v832_v41, %v836_v22  ;;  %v847_v53 = vsel %vm5092_vm11, %v842_v42, %v846_v18  ;;  %661 = vst [vmem:[#allocation2 + $0xc] sm:$0xf] %v660_v48  ;;  %v375_v61 = vor.u32 %v373_v44, %v372_v49  ;;  %v376_v62 = vrot.slane %v372_v49, 4  ;;  %v668_v13 = vld [vmem:[#allocation2 + $0x18] sm:$0xf]  ;;  %s4818_s15 = smov 96  }
  0x58   : > { %2796 = vrot.lane.b32.xlu0 %v4339_v30, %s4815_s29  ;;  %vm5113_vm13 = vmand %vm247_vm1, %vm332_vm6  ;;  %v4323_v59 = vcombine.low %v837_v52, %v847_v53  ;;  %v350_v60 = vsel %vm5099_vm12, %v342_v38, %v349_v46  ;;  %v383_v63 = vor.u32 %v381_v56, %v380_v55  ;;  %v356_v3 = vshll.u32 %v302_v50, 16  ;;  %v672_v14 = vld [vmem:[#allocation2 + $0x20] sm:$0x1]  ;;  %v5131_v20 = vld [vmem:[%s4956_s28 + $0x18] sm:$0xf]  ;;  %s4819_s16 = smov 80  }
  0x59   : > { %662 = vst.msk [vmem:[#allocation2 + $0x10] sm:$0xf] %vm244_vm0, %v350_v60  ;;  %v361_v4 = vshrl.u32 %v303_v51, 16  ;;  %v676_v6 = vsel %vm5086_vm10, %v375_v61, %v675_v57  ;;  %v364_v7 = vshll.u32 %v303_v51, 16  ;;  %v666_v8 = vsel %vm5113_vm13, %v351_v47, %v665_v58  ;;  %v5134_v21 = vld [vmem:[%s4956_s28 + $0x1c] sm:$0xf] }
  0x5a   : > { %v385_v9 = vrot.slane %v380_v55, 4  ;;  %v384_v10 = vsel %vm5099_vm12, %v376_v62, %v383_v63  ;;  %677 = vst [vmem:[#allocation2 + $0x24] sm:$0xf] %v676_v6  ;;  %v355_v11 = vrot.slane %v353_v2, 7  ;;  %667 = vst [vmem:[#allocation2 + $0x14] sm:$0x1] %v666_v8 }
  0x5b   : > { %v363_v12 = vrot.slane %v361_v4, 7  ;;  %678 = vst.msk [vmem:[#allocation2 + $0x28] sm:$0xf] %vm244_vm0, %v384_v10  ;;  %v387_v30 = vshrl.u32 %v5131_v20, 16  ;;  %v390_v31 = vshll.u32 %v5131_v20, 16  ;;  %v395_v32 = vshrl.u32 %v5134_v21, 16 }
  0x5c   : > { %2716 = vrot.lane.b32.xlu0 %v4323_v59, %s4816_s12  ;;  %v680_v15 = vsel %vm5113_vm13, %v385_v9, %v679_v5  ;;  %v358_v16 = vor.u32 %v356_v3, %v355_v11  ;;  %v359_v17 = vrot.slane %v355_v11, 4  ;;  %v398_v39 = vshll.u32 %v5134_v21, 16  ;;  %s4820_s8 = smov 112   ;;  %s4821_s7 = smov 64  }
  0x5d   : > { %v366_v18 = vor.u32 %v364_v7, %v363_v12  ;;  %v368_v19 = vrot.slane %v363_v12, 4  ;;  %681 = vst [vmem:[#allocation2 + $0x2c] sm:$0x1] %v680_v15  ;;  %vm3308_vm14 = vcmask 130048   ;;  %vm3357_vm15 = vcmask 261120   ;;  %s4501_s17 = sshll.u32 %s4876_s22, 12 }
  0x5e   : > { %v1387_v22 = vld [vmem:[#allocation2 + $0xc] sm:$0xf]  ;;  %v669_v26 = vsel %vm5086_vm10, %v358_v16, %v668_v13  ;;  %vm3390_vm1 = vcmask 392192   ;;  %vm3423_vm2 = vcmask 523264   ;;  %vm3456_vm3 = vcmask 654336   ;;  %s6893_s10 = scalar_lea.hbm %s6946_s5, %s4501_s17  ;;  %s4164_s22 = scalar_lea.sflag [#allocation5], %s4952_s23 }
  0x5f   : > { %v1436_v23 = vshrl.u32 %v1387_v22, 16  ;;  %v1439_v24 = vshll.u32 %v1387_v22, 16  ;;  %v367_v25 = vsel %vm5099_vm12, %v359_v17, %v366_v18  ;;  %v1819_v27 = vld [vmem:[#allocation2 + $0xc] sm:$0xe]  ;;  %670 = vst [vmem:[#allocation2 + $0x18] sm:$0xf] %v669_v26  ;;  %v673_v29 = vsel %vm5113_vm13, %v368_v19, %v672_v14 }
  0x60   : > { %v5140_v28 = vld [vmem:[#allocation2 + $0x10] sm:$0xf]  ;;  %671 = vst.msk [vmem:[#allocation2 + $0x1c] sm:$0xf] %vm244_vm0, %v367_v25  ;;  %674 = vst [vmem:[#allocation2 + $0x20] sm:$0x1] %v673_v29 }
  0x61   : > { %v1449_v33 = vshrl.u32 %v5140_v28, 16  ;;  %v4355_v35 = vcombine.low %v1387_v22, %v5140_v28  ;;  %v1438_v37 = vrot.slane %v1436_v23, 4  ;;  %v5150_v38 = vld [vmem:[#allocation2 + $0xc] sm:$0xe]  ;;  %v1441_v40 = vrot.slane %v1439_v24, 5  ;;  %p7011_p12 = scmp.ne.s32.totalorder %s6959_s30, 0 }
  0x62   : > { %v1998_v41 = vld [vmem:[#allocation2 + $0x24] sm:$0xf]  ;;  %v4275_v44 = vrot.slane %v1819_v27, 9  ;;  %v5156_v45 = vld [vmem:[#allocation2 + $0x28] sm:$0xf]  ;;  %v1885_v49 = vrot.slane %v5140_v28, 5 }
  0x63   : > { %v5153_v42 = vld [vmem:[#allocation2 + $0x24] sm:$0xf]  ;;  %2892 = vrot.lane.b32.xlu1 %v4355_v35, %s4817_s14  ;;  %v2069_v46 = vshrl.u32 %v1998_v41, 16  ;;  %v2072_v47 = vshll.u32 %v1998_v41, 16  ;;  %v1445_v50 = vshll.u32 %v5140_v28, 16  ;;  %v1442_v51 = vor.u32 %v1441_v40, %v1438_v37  ;;  %s4822_s13 = smov [#allocation6]  }
  0x64   : > { %v1484_v48 = vshrl.u32 %v5153_v42, 16  ;;  %v4404_v52 = vcombine.low %v1998_v41, %v5156_v45  ;;  %v5162_v53 = vld [vmem:[#allocation2 + $0x28] sm:$0xf]  ;;  %v4260_v55 = vrot.slane %v5150_v38, 9  ;;  %v5165_v56 = vrot.slane %v1449_v33, 4 }
  0x65   : > { %v5167_v57 = vrot.slane %v2069_v46, 4  ;;  %v5169_v58 = vrot.slane %v2072_v47, 5  ;;  %v2082_v59 = vshrl.u32 %v5156_v45, 16  ;;  %v5172_v60 = vld [vmem:[#allocation2 + $0x10] sm:$0xf]  ;;  %v5174_v61 = vrot.slane %v1442_v51, 4 }
  0x66   : > { %3150 = vrot.lane.b32.xlu0 %v4404_v52, %s4818_s15  ;;  %v5177_v62 = vrot.slane %v1484_v48, 4  ;;  %v1487_v63 = vshll.u32 %v5153_v42, 16  ;;  %v4357_v2 = vcombine.low %v5153_v42, %v5162_v53  ;;  %v5182_v3 = vld [vmem:[#allocation2 + $0x14] sm:$0x1]  ;;  %v1996_v4 = vld [vmem:[#allocation2 + $0x18] sm:$0xf]  ;;  %v1886_v7 = vsel %vm5072_vm7, %v4275_v44, %v1885_v49 }
  0x67   : > { %v1997_v5 = vld [vmem:[#allocation2 + $0x1c] sm:$0xf]  ;;  %v1497_v6 = vshrl.u32 %v5162_v53, 16  ;;  %v1887_v8 = vrot.slane %v1885_v49, 4  ;;  %v2075_v9 = vor.u32 %v5169_v58, %v5167_v57  ;;  %v2045_v10 = vshrl.u32 %v1996_v4, 16 }
  0x68   : > { %v2048_v11 = vshll.u32 %v1996_v4, 16  ;;  %v2058_v12 = vshrl.u32 %v1997_v5, 16  ;;  %v4403_v13 = vcombine.low %v1996_v4, %v1997_v5  ;;  %v1389_v14 = vld [vmem:[#allocation2 + $0x18] sm:$0xf]  ;;  %v5189_v15 = vld [vmem:[#allocation2 + $0x14] sm:$0x1] }
  0x69   : > { %v5191_v16 = vld [vmem:[#allocation2 + $0x1c] sm:$0xf]  ;;  %v1460_v17 = vshrl.u32 %v1389_v14, 16  ;;  %v1463_v18 = vshll.u32 %v1389_v14, 16  ;;  %v1888_v19 = vrot.slane %v5182_v3, 5  ;;  %v1284_v22 = vrot.slane %v5172_v60, 5 }
  0x6a   : > { %v2047_v23 = vrot.slane %v2045_v10, 4  ;;  %v2050_v24 = vrot.slane %v2048_v11, 5  ;;  %3148 = vrot.lane.b32.xlu1 %v4403_v13, %s4818_s15  ;;  %2896 = vrot.lane.b32.xlu0 %v4357_v2, %s4817_s14  ;;  %v1473_v25 = vshrl.u32 %v5191_v16, 16  ;;  %v4356_v26 = vcombine.low %v1389_v14, %v5191_v16  ;;  %v5199_v27 = vld [vmem:[#allocation2 + $0x20] sm:$0x1]  ;;  %v4645_v57 = vld [vmem:[%s6942_s1 + $0x38] sm:$0xff]  }
  0x6b   : > { %v1462_v29 = vrot.slane %v1460_v17, 4  ;;  %v1465_v33 = vrot.slane %v1463_v18, 5  ;;  %v1889_v35 = vsel %vm5072_vm7, %v1887_v8, %v1888_v19  ;;  %v1820_v37 = vld [vmem:[#allocation2 + $0x18] sm:$0xe]  ;;  %v1892_v38 = vrot.slane %v5191_v16, 5  ;;  %3699 = vmatpush1.bf16.msra.mxu0 %v4645_v57  ;;  %4562 = vmatpush1.bf16.msra.mxu1 %v4645_v57  ;;  %v4649_v57 = vld [vmem:[%s6942_s1 + $0x20] sm:$0xff]  }
  0x6c   : > { %v4387_v40 = vcombine.low %v1886_v7, %v1889_v35  ;;  %v4276_v41 = vrot.slane %v1820_v37, 9  ;;  %v1895_v44 = vrot.slane %v5199_v27, 5  ;;  %v1285_v46 = vsel %vm5072_vm7, %v4260_v55, %v1284_v22  ;;  %v5207_v47 = vld [vmem:[#allocation2 + $0x1c] sm:$0xf]  ;;  %v5209_v48 = vld [vmem:[#allocation2 + $0x20] sm:$0x1]  ;;  %3700 = vmatprep.subr.bf16.mxu0 %v4814_v0  ;;  %4554 = vmatprep.subr.bf16.mxu1 %v4814_v0 }
  0x6d   : > { %v1894_v49 = vrot.slane %v1892_v38, 4  ;;  %v1286_v51 = vrot.slane %v1284_v22, 4  ;;  %v1287_v52 = vrot.slane %v5189_v15, 5  ;;  %v1210_v2 = vld [vmem:[#allocation2 + $0x18] sm:$0xe]  ;;  %v1291_v4 = vrot.slane %v5207_v47, 5 }
  0x6e   : > { %2894 = vrot.lane.b32.xlu1 %v4356_v26, %s4817_s14  ;;  %3052 = vrot.lane.b32.xlu0 %v4387_v40, %s4819_s16  ;;  %v1893_v7 = vsel %vm5072_vm7, %v4276_v41, %v1892_v38  ;;  %v4261_v55 = vrot.slane %v1210_v2, 9  ;;  %v1294_v8 = vrot.slane %v5209_v48, 5  ;;  %v2028_v10 = vld [vmem:[#allocation2 + $0x20] sm:$0x1]  ;;  %v2051_v11 = vor.u32 %v2050_v24, %v2047_v23  ;;  %v808_v20 = vld [vmem:[#allocation2 + $0x2c] sm:$0x1] }
  0x6f   : > { %v1896_v13 = vsel %vm5072_vm7, %v1894_v49, %v1895_v44  ;;  %v1288_v14 = vsel %vm5072_vm7, %v1286_v51, %v1287_v52  ;;  %v1293_v17 = vrot.slane %v1291_v4, 4  ;;  %v2054_v18 = vshll.u32 %v1997_v5, 16 }
  0x70   : > { %v4388_v19 = vcombine.low %v1893_v7, %v1896_v13  ;;  %v4340_v22 = vcombine.low %v1285_v46, %v1288_v14  ;;  %v1292_v26 = vsel %vm5072_vm7, %v4261_v55, %v1291_v4  ;;  %v2052_v35 = vrot.slane %v2051_v11, 4  ;;  %v777_v14 = vld [vmem:[#allocation2 + $0x18] sm:$0xf] }
  0x71   : > { %v1295_v37 = vsel %vm5072_vm7, %v1293_v17, %v1294_v8  ;;  %v2056_v38 = vrot.slane %v2054_v18, 5  ;;  %v2060_v40 = vrot.slane %v2058_v12, 4  ;;  %v2064_v23 = vshll.u32 %v2028_v10, 16  ;;  %v775_v12 = vld [vmem:[#allocation2 + $0xc] sm:$0xf] }
  0x72   : > { %3054 = vrot.lane.b32.xlu1 %v4388_v19, %s4819_s16  ;;  %2798 = vrot.lane.b32.xlu0 %v4340_v22, %s4815_s29  ;;  %v4341_v24 = vcombine.low %v1292_v26, %v1295_v37  ;;  %v1447_v5 = vrot.slane %v1445_v50, 5  ;;  %v1455_v41 = vshll.u32 %v5182_v3, 16  ;;  %v1466_v44 = vor.u32 %v1465_v33, %v1462_v29 }
  0x73   : > { %v2057_v46 = vsel %vm5092_vm11, %v2052_v35, %v2056_v38  ;;  %v2061_v49 = vor.u32 %v2060_v40, %v2056_v38  ;;  %v2066_v51 = vrot.slane %v2064_v23, 5  ;;  %v1469_v52 = vshll.u32 %v5191_v16, 16 }
  0x74   : > { %v1448_v2 = vsel %vm5092_vm11, %v5174_v61, %v1447_v5  ;;  %v1452_v4 = vor.u32 %v5165_v56, %v1447_v5  ;;  %v1457_v7 = vrot.slane %v1455_v41, 5  ;;  %v1467_v28 = vrot.slane %v1466_v44, 4 }
  0x75   : > { %v2062_v50 = vrot.slane %v2061_v49, 4  ;;  %v1471_v55 = vrot.slane %v1469_v52, 5  ;;  %v1475_v3 = vrot.slane %v1473_v25, 4  ;;  %v1479_v29 = vshll.u32 %v5199_v27, 16 }
  0x76   : > { %2800 = vrot.lane.b32.xlu1 %v4341_v24, %s4815_s29  ;;  %v1453_v33 = vrot.slane %v1452_v4, 4  ;;  %v849_v8 = vshrl.u32 %v775_v12, 16  ;;  %v852_v10 = vshll.u32 %v775_v12, 16  ;;  %v858_v16 = vshll.u32 %v5172_v60, 16 }
  0x77   : > { %v2067_v11 = vsel %vm5092_vm11, %v2062_v50, %v2066_v51  ;;  %v1472_v56 = vsel %vm5092_vm11, %v1467_v28, %v1471_v55  ;;  %v1476_v61 = vor.u32 %v1475_v3, %v1471_v55  ;;  %v1481_v13 = vrot.slane %v1479_v29, 5 }
  0x78   : > { %v4419_v17 = vcombine.low %v2057_v46, %v2067_v11  ;;  %v1458_v25 = vsel %vm5092_vm11, %v1453_v33, %v1457_v7  ;;  %v851_v27 = vrot.slane %v849_v8, 4  ;;  %v854_v18 = vrot.slane %v852_v10, 5  ;;  %v1421_v10 = vld [vmem:[#allocation2 + $0x2c] sm:$0x1] }
  0x79   : > { %v4371_v19 = vcombine.low %v1448_v2, %v1458_v25  ;;  %v1477_v22 = vrot.slane %v1476_v61, 4  ;;  %v860_v26 = vrot.slane %v858_v16, 5  ;;  %v862_v35 = vshrl.u32 %v5172_v60, 16  ;;  %v5255_v60 = vld [vmem:[#allocation2 + $0x2c] sm:$0x1] }
  0x7a   : > { %3228 = vrot.lane.b32.xlu0 %v4419_v17, %s4820_s8  ;;  %v855_v37 = vor.u32 %v854_v18, %v851_v27  ;;  %v868_v38 = vshll.u32 %v5189_v15, 16  ;;  %v873_v40 = vshrl.u32 %v777_v14, 16  ;;  %v876_v23 = vshll.u32 %v777_v14, 16  ;;  %v1821_v15 = vld [vmem:[#allocation2 + $0x24] sm:$0xe] }
  0x7b   : > { %2972 = vrot.lane.b32.xlu1 %v4371_v19, %s4821_s7  ;;  %v1482_v24 = vsel %vm5092_vm11, %v1477_v22, %v1481_v13  ;;  %v864_v5 = vrot.slane %v862_v35, 4  ;;  %v882_v41 = vshll.u32 %v5207_v47, 16  ;;  %v886_v44 = vshrl.u32 %v5207_v47, 16  ;;  %v4646_v35 = vld [vmem:[%s6942_s1 + $0x30] sm:$0xff]  }
  0x7c   : > { %v4372_v46 = vcombine.low %v1472_v56, %v1482_v24  ;;  %v856_v49 = vrot.slane %v855_v37, 4  ;;  %v870_v51 = vrot.slane %v868_v38, 5  ;;  %v875_v52 = vrot.slane %v873_v40, 4  ;;  %v682_v24 = vld [vmem:[#allocation2 + $0x30] sm:$0xf]  ;;  %3701 = vmatpush1.bf16.msra.mxu0 %v4646_v35  ;;  %4563 = vmatpush1.bf16.msra.mxu1 %v4646_v35 }
  0x7d   : > { %v865_v12 = vor.u32 %v864_v5, %v860_v26  ;;  %v878_v2 = vrot.slane %v876_v23, 5  ;;  %v884_v4 = vrot.slane %v882_v41, 5  ;;  %v888_v7 = vrot.slane %v886_v44, 4  ;;  %v5294_v5 = vld [vmem:[#allocation2 + $0x28] sm:$0xf]  ;;  %3702 = vmatprep.subr.bf16.mxu0 %v4814_v0  ;;  %4555 = vmatprep.subr.bf16.mxu1 %v4814_v0 }
  0x7e   : > { %2974 = vrot.lane.b32.xlu0 %v4372_v46, %s4821_s7  ;;  %v861_v28 = vsel %vm5092_vm11, %v856_v49, %v860_v26  ;;  %v892_v50 = vshll.u32 %v5209_v48, 16  ;;  %v2076_v47 = vrot.slane %v2075_v9, 4  ;;  %v2078_v55 = vshll.u32 %v5156_v45, 16  ;;  %v5296_v41 = vld [vmem:[#allocation2 + $0x24] sm:$0xe] }
  0x7f   : > { %v866_v3 = vrot.slane %v865_v12, 4  ;;  %v879_v29 = vor.u32 %v878_v2, %v875_v52  ;;  %v889_v33 = vor.u32 %v888_v7, %v884_v4  ;;  %v2084_v8 = vrot.slane %v2082_v59, 4  ;;  %v779_v7 = vld [vmem:[#allocation2 + $0x24] sm:$0xf] }
  0x80   : > { %v1489_v16 = vrot.slane %v1487_v63, 5  ;;  %v894_v11 = vrot.slane %v892_v50, 5  ;;  %v2080_v56 = vrot.slane %v2078_v55, 5  ;;  %v2088_v48 = vshll.u32 %v5255_v60, 16 }
  0x81   : > { %v871_v58 = vsel %vm5092_vm11, %v866_v3, %v870_v51  ;;  %v880_v9 = vrot.slane %v879_v29, 4  ;;  %v890_v61 = vrot.slane %v889_v33, 4  ;;  %v4277_v13 = vrot.slane %v1821_v15, 9  ;;  %v686_v51 = vld [vmem:[#allocation2 + $0x38] sm:$0x1] }
  0x82   : > { %v4324_v45 = vcombine.low %v861_v28, %v871_v58  ;;  %v2081_v59 = vsel %vm5092_vm11, %v2076_v47, %v2080_v56  ;;  %v2085_v42 = vor.u32 %v2084_v8, %v2080_v56  ;;  %v2090_v63 = vrot.slane %v2088_v48, 5 }
  0x83   : > { %v885_v14 = vsel %vm5092_vm11, %v880_v9, %v884_v4  ;;  %v895_v17 = vsel %vm5092_vm11, %v890_v61, %v894_v11  ;;  %v1899_v25 = vrot.slane %v5162_v53, 5  ;;  %v1902_v27 = vrot.slane %v1421_v10, 5 }
  0x84   : > { %2718 = vrot.lane.b32.xlu1 %v4324_v45, %s4816_s12  ;;  %v4325_v18 = vcombine.low %v885_v14, %v895_v17  ;;  %v2086_v19 = vrot.slane %v2085_v42, 4  ;;  %v1490_v22 = vor.u32 %v1489_v16, %v5177_v62  ;;  %v1493_v26 = vshll.u32 %v5162_v53, 16  ;;  %v5340_v45 = vld [vmem:[%s4956_s28 + $0x24] sm:$0xf] }
  0x85   : > { %v1900_v37 = vsel %vm5072_vm7, %v4277_v13, %v1899_v25  ;;  %v1901_v38 = vrot.slane %v1899_v25, 4  ;;  %v1499_v40 = vrot.slane %v1497_v6, 4  ;;  %v1503_v23 = vshll.u32 %v1421_v10, 16  ;;  %v308_v10 = vld [vmem:[%s4956_s28 + $0x20] sm:$0xf] }
  0x86   : > { %2720 = vrot.lane.b32.xlu0 %v4325_v18, %s4816_s12  ;;  %v2091_v62 = vsel %vm5092_vm11, %v2086_v19, %v2090_v63  ;;  %v1491_v44 = vrot.slane %v1490_v22, 4  ;;  %v1495_v46 = vrot.slane %v1493_v26, 5  ;;  %v389_v49 = vrot.slane %v387_v30, 7  ;;  %v4648_v30 = vld [vmem:[%s6942_s1 + $0x28] sm:$0xff]  }
  0x87   : > { %v4420_v53 = vcombine.low %v2081_v59, %v2091_v62  ;;  %v1903_v6 = vsel %vm5072_vm7, %v1901_v38, %v1902_v27  ;;  %v397_v52 = vrot.slane %v395_v32, 7  ;;  %v1505_v2 = vrot.slane %v1503_v23, 5  ;;  %3703 = vmatpush1.bf16.msra.mxu0 %v4648_v30  ;;  %4564 = vmatpush1.bf16.msra.mxu1 %v4648_v30 }
  0x88   : > { %v4389_v15 = vcombine.low %v1900_v37, %v1903_v6  ;;  %v1500_v12 = vor.u32 %v1499_v40, %v1495_v46  ;;  %v392_v4 = vor.u32 %v390_v31, %v389_v49  ;;  %v1496_v32 = vsel %vm5092_vm11, %v1491_v44, %v1495_v46  ;;  %3704 = vmatprep.subr.bf16.mxu0 %v4814_v0 }
  0x89   : > { %3230 = vrot.lane.b32.xlu1 %v4420_v53, %s4820_s8  ;;  %v393_v28 = vrot.slane %v389_v49, 4  ;;  %v400_v50 = vor.u32 %v398_v39, %v397_v52  ;;  %v402_v47 = vrot.slane %v397_v52, 4  ;;  %v4262_v3 = vrot.slane %v5296_v41, 9  ;;  %4556 = vmatprep.subr.bf16.mxu1 %v4814_v0 }
  0x8a   : > { %3056 = vrot.lane.b32.xlu0 %v4389_v15, %s4819_s16  ;;  %v1501_v31 = vrot.slane %v1500_v12, 4  ;;  %v683_v55 = vsel %vm5086_vm10, %v392_v4, %v682_v24  ;;  %v1298_v29 = vrot.slane %v5294_v5, 5  ;;  %v897_v39 = vshrl.u32 %v779_v7, 16 }
  0x8b   : > { %v401_v33 = vsel %vm5099_vm12, %v393_v28, %v400_v50  ;;  %684 = vst [vmem:[#allocation2 + $0x30] sm:$0xf] %v683_v55  ;;  %v687_v21 = vsel %vm5113_vm13, %v402_v47, %v686_v51  ;;  %v900_v8 = vshll.u32 %v779_v7, 16  ;;  %v1301_v56 = vrot.slane %v808_v20, 5  ;;  %3705 = vmatpush1.bf16.msra.mxu0 %v4649_v57  ;;  %4565 = vmatpush1.bf16.msra.mxu1 %v4649_v57 }
  0x8c   : > { %v1506_v16 = vsel %vm5092_vm11, %v1501_v31, %v1505_v2  ;;  %685 = vst.msk [vmem:[#allocation2 + $0x34] sm:$0xf] %vm244_vm0, %v401_v33  ;;  %688 = vst [vmem:[#allocation2 + $0x38] sm:$0x1] %v687_v21  ;;  %v1300_v11 = vrot.slane %v1298_v29, 4  ;;  %v906_v48 = vshll.u32 %v5294_v5, 16  ;;  %3706 = vmatprep.subr.bf16.mxu0 %v4814_v0  ;;  %v5346_v27 = vsel %vm5072_vm7, %v4262_v3, %v1298_v29 }
  0x8d   : > { %v4373_v58 = vcombine.low %v1496_v32, %v1506_v16  ;;  %v899_v9 = vrot.slane %v897_v39, 4  ;;  %v902_v61 = vrot.slane %v900_v8, 5  ;;  %v910_v13 = vshrl.u32 %v5294_v5, 16  ;;  %4557 = vmatprep.subr.bf16.mxu1 %v4814_v0 }
  0x8e   : > { %v908_v59 = vrot.slane %v906_v48, 5  ;;  %v916_v42 = vshll.u32 %v808_v20, 16  ;;  %v404_v63 = vshrl.u32 %v308_v10, 16  ;;  %v407_v25 = vshll.u32 %v308_v10, 16  ;;  %v689_v10 = vld [vmem:[#allocation2 + $0x3c] sm:$0xf] }
  0x8f   : > { %2976 = vrot.lane.b32.xlu1 %v4373_v58, %s4821_s7  ;;  %v903_v14 = vor.u32 %v902_v61, %v899_v9  ;;  %v912_v17 = vrot.slane %v910_v13, 4  ;;  %v5350_v18 = vsel %vm5072_vm7, %v1300_v11, %v1301_v56  ;;  %v412_v22 = vshrl.u32 %v5340_v45, 16 }
  0x90   : > { %v406_v19 = vrot.slane %v404_v63, 7  ;;  %v918_v37 = vrot.slane %v916_v42, 5  ;;  %v415_v38 = vshll.u32 %v5340_v45, 16  ;;  %v4342_v49 = vcombine.low %v5346_v27, %v5350_v18 }
  0x91   : > { %v904_v26 = vrot.slane %v903_v14, 4  ;;  %v913_v35 = vor.u32 %v912_v17, %v908_v59  ;;  %v5357_v5 = vrot.slane %v412_v22, 7  ;;  %vm3489_vm4 = vcmask 785408  }
  0x92   : > { %v2000_v40 = vld [vmem:[#allocation2 + $0x30] sm:$0xf]  ;;  %v410_v24 = vrot.slane %v406_v19, 4  ;;  %v409_v51 = vor.u32 %v407_v25, %v406_v19  ;;  %vm3522_vm5 = vcmask 916480  }
  0x93   : > { %v5355_v23 = vld [vmem:[#allocation2 + $0x30] sm:$0xf]  ;;  %v2001_v41 = vld [vmem:[#allocation2 + $0x34] sm:$0xf]  ;;  %v5359_v62 = vld [vmem:[#allocation2 + $0x38] sm:$0x1]  ;;  %v909_v15 = vsel %vm5092_vm11, %v904_v26, %v908_v59  ;;  %v417_v13 = vor.u32 %v415_v38, %v5357_v5 }
  0x94   : > { %v2093_v44 = vshrl.u32 %v2000_v40, 16  ;;  %v2096_v46 = vshll.u32 %v2000_v40, 16  ;;  %v2102_v53 = vshll.u32 %v2001_v41, 16  ;;  %v2106_v6 = vshrl.u32 %v2001_v41, 16  ;;  %v1394_v12 = vld [vmem:[#allocation2 + $0x34] sm:$0xf] }
  0x95   : > { %v2112_v52 = vshll.u32 %v5359_v62, 16  ;;  %v4405_v7 = vcombine.low %v2000_v40, %v2001_v41  ;;  %v914_v30 = vrot.slane %v913_v35, 4  ;;  %v1422_v47 = vld [vmem:[#allocation2 + $0x38] sm:$0x1]  ;;  %v1508_v20 = vshrl.u32 %v5355_v23, 16 }
  0x96   : > { %v2095_v2 = vrot.slane %v2093_v44, 4  ;;  %v2098_v4 = vrot.slane %v2096_v46, 5  ;;  %v2104_v32 = vrot.slane %v2102_v53, 5  ;;  %v2108_v28 = vrot.slane %v2106_v6, 4  ;;  %v1822_v57 = vld [vmem:[#allocation2 + $0x30] sm:$0xe] }
  0x97   : > { %v2114_v50 = vrot.slane %v2112_v52, 5  ;;  %3152 = vrot.lane.b32.xlu1 %v4405_v7, %s4818_s15  ;;  %v919_v55 = vsel %vm5092_vm11, %v914_v30, %v918_v37  ;;  %v1511_v3 = vshll.u32 %v5355_v23, 16  ;;  %v1517_v29 = vshll.u32 %v1394_v12, 16  ;;  %v781_v14 = vld [vmem:[#allocation2 + $0x30] sm:$0xf] }
  0x98   : > { %v2099_v31 = vor.u32 %v2098_v4, %v2095_v2  ;;  %v2109_v33 = vor.u32 %v2108_v28, %v2104_v32  ;;  %v4326_v21 = vcombine.low %v909_v15, %v919_v55  ;;  %v1510_v39 = vrot.slane %v1508_v20, 4  ;;  %v5378_v17 = vld [vmem:[#allocation2 + $0x34] sm:$0xf]  ;;  %v5388_v44 = vld [vmem:[#allocation2 + $0x38] sm:$0x1] }
  0x99   : > { %v1521_v8 = vshrl.u32 %v1394_v12, 16  ;;  %v1513_v11 = vrot.slane %v1511_v3, 5  ;;  %v1519_v56 = vrot.slane %v1517_v29, 5  ;;  %v1527_v48 = vshll.u32 %v1422_v47, 16  ;;  %v693_v20 = vld [vmem:[#allocation2 + $0x44] sm:$0x1] }
  0x9a   : > { %v2100_v16 = vrot.slane %v2099_v31, 4  ;;  %v2110_v58 = vrot.slane %v2109_v33, 4  ;;  %v4358_v61 = vcombine.low %v5355_v23, %v1394_v12  ;;  %v690_v63 = vsel %vm5086_vm10, %v409_v51, %v689_v10  ;;  %v4650_v23 = vld [vmem:[%s6942_s1 + $0x18] sm:$0xff]   ;;  %v4652_v31 = vld [vmem:[%s6942_s1 + $0x10] sm:$0xff]  }
  0x9b   : > { %v1523_v9 = vrot.slane %v1521_v8, 4  ;;  %2722 = vrot.lane.b32.xlu1 %v4326_v21, %s4816_s12  ;;  %v1514_v59 = vor.u32 %v1513_v11, %v1510_v39  ;;  %v1529_v42 = vrot.slane %v1527_v48, 5  ;;  %v418_v22 = vsel %vm5099_vm12, %v410_v24, %v417_v13  ;;  %691 = vst [vmem:[#allocation2 + $0x3c] sm:$0xf] %v690_v63  ;;  %3707 = vmatpush1.bf16.msra.mxu0 %v4650_v23 }
  0x9c   : > { %v2105_v45 = vsel %vm5092_vm11, %v2100_v16, %v2104_v32  ;;  %v2115_v25 = vsel %vm5092_vm11, %v2110_v58, %v2114_v50  ;;  %v4278_v26 = vrot.slane %v1822_v57, 9  ;;  %692 = vst.msk [vmem:[#allocation2 + $0x40] sm:$0xf] %vm244_vm0, %v418_v22  ;;  %v1906_v38 = vrot.slane %v1394_v12, 5  ;;  %v5399_v12 = vld [vmem:[%s4956_s28 + $0x28] sm:$0xf]  ;;  %4566 = vmatpush1.bf16.msra.mxu1 %v4650_v23  ;;  %3708 = vmatprep.subr.bf16.mxu0 %v4814_v0 }
  0x9d   : > { %v1524_v19 = vor.u32 %v1523_v9, %v1519_v56  ;;  %v4421_v35 = vcombine.low %v2105_v45, %v2115_v25  ;;  %v1515_v37 = vrot.slane %v1514_v59, 4  ;;  %v1909_v40 = vrot.slane %v1422_v47, 5  ;;  %v5405_v32 = vld [vmem:[#allocation2 + $0x30] sm:$0xe]  ;;  %4558 = vmatprep.subr.bf16.mxu1 %v4814_v0 }
  0x9e   : > { %v921_v46 = vshrl.u32 %v781_v14, 16  ;;  %v924_v51 = vshll.u32 %v781_v14, 16  ;;  %v930_v24 = vshll.u32 %v5378_v17, 16  ;;  %v1907_v6 = vsel %vm5072_vm7, %v4278_v26, %v1906_v38 }
  0x9f   : > { %v1525_v41 = vrot.slane %v1524_v19, 4  ;;  %3232 = vrot.lane.b32.xlu0 %v4421_v35, %s4820_s8  ;;  %v1520_v53 = vsel %vm5092_vm11, %v1515_v37, %v1519_v56  ;;  %2898 = vrot.lane.b32.xlu1 %v4358_v61, %s4817_s14  ;;  %v1908_v52 = vrot.slane %v1906_v38, 4  ;;  %v934_v15 = vshrl.u32 %v5378_v17, 16  ;;  %v4653_v61 = vld [vmem:[%s6942_s1 + $0x8] sm:$0xff]  }
  0xa0   : > { %v923_v4 = vrot.slane %v921_v46, 4  ;;  %v926_v7 = vrot.slane %v924_v51, 5  ;;  %v5403_v30 = vrot.slane %v930_v24, 5  ;;  %v940_v47 = vshll.u32 %v5388_v44, 16  ;;  %3709 = vmatpush1.bf16.msra.mxu0 %v4652_v31  ;;  %4567 = vmatpush1.bf16.msra.mxu1 %v4652_v31 }
  0xa1   : > { %v1530_v2 = vsel %vm5092_vm11, %v1525_v41, %v1529_v42  ;;  %v1910_v28 = vsel %vm5072_vm7, %v1908_v52, %v1909_v40  ;;  %v936_v50 = vrot.slane %v934_v15, 4  ;;  %v419_v29 = vrot.slane %v5357_v5, 4  ;;  %3710 = vmatprep.subr.bf16.mxu0 %v4814_v0  ;;  %4559 = vmatprep.subr.bf16.mxu1 %v4814_v0  ;;  %v4656_v41 = vld [vmem:[%s6942_s1] sm:$0xff]  }
  0xa2   : > { %v4390_v55 = vcombine.low %v1907_v6, %v1910_v28  ;;  %v927_v3 = vor.u32 %v926_v7, %v923_v4  ;;  %v421_v33 = vshrl.u32 %v5399_v12, 16  ;;  %v4374_v21 = vcombine.low %v1520_v53, %v1530_v2  ;;  %v2002_v39 = vld [vmem:[#allocation2 + $0x3c] sm:$0xf]  ;;  %v311_v4 = vld [vmem:[%s4956_s28 + $0x2c] sm:$0xf] }
  0xa3   : > { %2802 = vrot.lane.b32.xlu0 %v4342_v49, %s4815_s29  ;;  %v937_v8 = vor.u32 %v936_v50, %v5403_v30  ;;  %v942_v10 = vrot.slane %v940_v47, 5  ;;  %v5422_v16 = vld [vmem:[#allocation2 + $0x3c] sm:$0xf]  ;;  %v4263_v11 = vrot.slane %v5405_v32, 9  ;;  %v5425_v56 = vld [vmem:[#allocation2 + $0x40] sm:$0xf]  ;;  %v694_v27 = vsel %vm5113_vm13, %v419_v29, %v693_v20 }
  0xa4   : > { %6973 = vst [vmem:[#allocation9_spill] sm:$0xff] %v5425_v56  ;;  %v2117_v48 = vshrl.u32 %v2002_v39, 16  ;;  %v2120_v5 = vshll.u32 %v2002_v39, 16  ;;  %3058 = vrot.lane.b32.xlu1 %v4390_v55, %s4819_s16  ;;  %v928_v57 = vrot.slane %v927_v3, 4  ;;  %v2130_v18 = vshrl.u32 %v5425_v56, 16  ;;  %3711 = vmatpush1.bf16.msra.mxu0 %v4653_v61  ;;  %v4657_v3 = vld [vmem:[%s6942_s1 + $0x40] sm:$0xff]  }
  0xa5   : > { %v938_v49 = vrot.slane %v937_v8, 4  ;;  %695 = vst [vmem:[#allocation2 + $0x44] sm:$0x1] %v694_v27  ;;  %v5431_v58 = vld [vmem:[#allocation2 + $0x40] sm:$0xf]  ;;  %v1305_v9 = vrot.slane %v5378_v17, 5  ;;  %v4406_v59 = vcombine.low %v2002_v39, %v5425_v56  ;;  %3712 = vmatprep.subr.bf16.mxu0 %v4814_v0  ;;  %4568 = vmatpush1.bf16.msra.mxu1 %v4653_v61 }
  0xa6   : > { %v2119_v13 = vrot.slane %v2117_v48, 4  ;;  %v2122_v45 = vrot.slane %v2120_v5, 5  ;;  %v2126_v42 = vshll.u32 %v5425_v56, 16  ;;  %v933_v63 = vsel %vm5092_vm11, %v928_v57, %v5403_v30  ;;  %v1823_v40 = vld [vmem:[#allocation2 + $0x3c] sm:$0xe]  ;;  %4560 = vmatprep.subr.bf16.mxu1 %v4814_v0 }
  0xa7   : > { %2978 = vrot.lane.b32.xlu0 %v4374_v21, %s4821_s7  ;;  %v2132_v14 = vrot.slane %v2130_v18, 4  ;;  %v1532_v17 = vshrl.u32 %v5422_v16, 16  ;;  %v1535_v25 = vshll.u32 %v5422_v16, 16  ;;  %v943_v19 = vsel %vm5092_vm11, %v938_v49, %v942_v10  ;;  %v696_v49 = vld [vmem:[#allocation2 + $0x48] sm:$0xf] }
  0xa8   : > { %v2123_v22 = vor.u32 %v2122_v45, %v2119_v13  ;;  %v2128_v26 = vrot.slane %v2126_v42, 5  ;;  %v1545_v35 = vshrl.u32 %v5431_v58, 16  ;;  %v424_v23 = vshll.u32 %v5399_v12, 16  ;;  %3713 = vmatpush1.bf16.msra.mxu0 %v4656_v41  ;;  %v783_v13 = vld [vmem:[#allocation2 + $0x3c] sm:$0xf] }
  0xa9   : > { %v1534_v37 = vrot.slane %v1532_v17, 4  ;;  %v1537_v38 = vrot.slane %v1535_v25, 5  ;;  %v1307_v24 = vrot.slane %v1305_v9, 4  ;;  %v1308_v53 = vrot.slane %v5388_v44, 5  ;;  %3728 = vmatprep.subr.bf16.mxu0 %v4814_v0  ;;  %4569 = vmatpush1.bf16.msra.mxu1 %v4656_v41 }
  0xaa   : > { %v2124_v46 = vrot.slane %v2123_v22, 4  ;;  %v2133_v51 = vor.u32 %v2132_v14, %v2128_v26  ;;  %v4327_v6 = vcombine.low %v933_v63, %v943_v19  ;;  %v1913_v52 = vrot.slane %v5431_v58, 5  ;;  %4561 = vmatprep.subr.bf16.mxu1 %v4814_v0  ;;  %v700_v22 = vld [vmem:[#allocation2 + $0x50] sm:$0x1] }
  0xab   : > { %3154 = vrot.lane.b32.xlu0 %v4406_v59, %s4818_s15  ;;  %v1538_v15 = vor.u32 %v1537_v38, %v1534_v37  ;;  %v1541_v2 = vshll.u32 %v5431_v58, 16  ;;  %v4359_v30 = vcombine.low %v5422_v16, %v5431_v58  ;;  %v5467_v32 = vsel %vm5072_vm7, %v4263_v11, %v1305_v9  ;;  %v784_v58 = vld [vmem:[#allocation2 + $0x40] sm:$0xf] }
  0xac   : > { %v5461_v7 = vld [vmem:[#allocation2 + $0x44] sm:$0x1]  ;;  %v4279_v28 = vrot.slane %v1823_v40, 9  ;;  %v1547_v50 = vrot.slane %v1545_v35, 4  ;;  %v2129_v47 = vsel %vm5092_vm11, %v2124_v46, %v2128_v26  ;;  %v2134_v20 = vrot.slane %v2133_v51, 4  ;;  %3729 = vmatpush2.bf16.msra.mxu0 %v4657_v3 }
  0xad   : > { %6974 = vst [vmem:[#allocation10_spill] sm:$0xff] %v5461_v7  ;;  %v1423_v44 = vld [vmem:[#allocation2 + $0x44] sm:$0x1]  ;;  %v2136_v31 = vshll.u32 %v5461_v7, 16  ;;  %v1309_v55 = vsel %vm5072_vm7, %v1307_v24, %v1308_v53  ;;  %v1915_v29 = vrot.slane %v1913_v52, 4  ;;  %v1539_v39 = vrot.slane %v1538_v15, 4  ;;  %4570 = vmatpush2.bf16.msra.mxu1 %v4657_v3 }
  0xae   : > { %v1916_v21 = vrot.slane %v1423_v44, 5  ;;  %v1543_v8 = vrot.slane %v1541_v2, 5  ;;  %v1551_v16 = vshll.u32 %v1423_v44, 16  ;;  %v423_v11 = vrot.slane %v421_v33, 7  ;;  %v1213_v33 = vld [vmem:[#allocation2 + $0x3c] sm:$0xe] }
  0xaf   : > { %2724 = vrot.lane.b32.xlu0 %v4327_v6, %s4816_s12  ;;  %v2138_v10 = vrot.slane %v2136_v31, 5  ;;  %v429_v48 = vshrl.u32 %v311_v4, 16  ;;  %v1914_v5 = vsel %vm5072_vm7, %v4279_v28, %v1913_v52  ;;  %v432_v18 = vshll.u32 %v311_v4, 16  ;;  %v810_v14 = vld [vmem:[#allocation2 + $0x44] sm:$0x1] }
  0xb0   : > { %v1917_v57 = vsel %vm5072_vm7, %v1915_v29, %v1916_v21  ;;  %v1548_v27 = vor.u32 %v1547_v50, %v1543_v8  ;;  %v4343_v9 = vcombine.low %v5467_v32, %v1309_v55  ;;  %v1553_v61 = vrot.slane %v1551_v16, 5  ;;  %v312_v24 = vld [vmem:[%s4956_s28 + $0x30] sm:$0xf]  ;;  %v313_v2 = vld [vmem:[%s4956_s28 + $0x34] sm:$0xf] }
  0xb1   : > { %v2139_v0 = vsel %vm5092_vm11, %v2134_v20, %v2138_v10  ;;  %v426_v12 = vor.u32 %v424_v23, %v423_v11  ;;  %v427_v42 = vrot.slane %v423_v11, 4  ;;  %v431_v63 = vrot.slane %v429_v48, 7 }
  0xb2   : > { %v4422_v45 = vcombine.low %v2129_v47, %v2139_v0  ;;  %v1549_v59 = vrot.slane %v1548_v27, 4  ;;  %v4391_v17 = vcombine.low %v1914_v5, %v1917_v57  ;;  %v1544_v25 = vsel %vm5092_vm11, %v1539_v39, %v1543_v8 }
  0xb3   : > { %2900 = vrot.lane.b32.xlu0 %v4359_v30, %s4817_s14  ;;  %v697_v19 = vsel %vm5086_vm10, %v426_v12, %v696_v49  ;;  %v1312_v26 = vrot.slane %v784_v58, 5  ;;  %v434_v35 = vor.u32 %v432_v18, %v431_v63  ;;  %v436_v37 = vrot.slane %v431_v63, 4 }
  0xb4   : > { %3234 = vrot.lane.b32.xlu1 %v4422_v45, %s4820_s8  ;;  %698 = vst [vmem:[#allocation2 + $0x48] sm:$0xf] %v697_v19  ;;  %v4264_v38 = vrot.slane %v1213_v33, 9  ;;  %v945_v40 = vshrl.u32 %v783_v13, 16  ;;  %v1554_v23 = vsel %vm5092_vm11, %v1549_v59, %v1553_v61  ;;  %v1315_v46 = vrot.slane %v810_v14, 5 }
  0xb5   : > { %v1314_v41 = vrot.slane %v1312_v26, 4  ;;  %v948_v51 = vshll.u32 %v783_v13, 16  ;;  %v435_v53 = vsel %vm5099_vm12, %v427_v42, %v434_v35  ;;  %v701_v6 = vsel %vm5113_vm13, %v436_v37, %v700_v22 }
  0xb6   : > { %v947_v52 = vrot.slane %v945_v40, 4  ;;  %v954_v15 = vshll.u32 %v784_v58, 16  ;;  %699 = vst.msk [vmem:[#allocation2 + $0x4c] sm:$0xf] %vm244_vm0, %v435_v53  ;;  %702 = vst [vmem:[#allocation2 + $0x50] sm:$0x1] %v701_v6  ;;  %v4375_v32 = vcombine.low %v1544_v25, %v1554_v23  ;;  %v5508_v47 = vsel %vm5072_vm7, %v4264_v38, %v1312_v26 }
  0xb7   : > { %3060 = vrot.lane.b32.xlu0 %v4391_v17, %s4819_s16  ;;  %v950_v4 = vrot.slane %v948_v51, 5  ;;  %v958_v30 = vshrl.u32 %v784_v58, 16  ;;  %v964_v28 = vshll.u32 %v810_v14, 16  ;;  %v438_v50 = vshrl.u32 %v312_v24, 16 }
  0xb8   : > { %2804 = vrot.lane.b32.xlu1 %v4343_v9, %s4815_s29  ;;  %v956_v44 = vrot.slane %v954_v15, 5  ;;  %v446_v55 = vshrl.u32 %v313_v2, 16  ;;  %v5512_v3 = vsel %vm5072_vm7, %v1314_v41, %v1315_v46  ;;  %v441_v21 = vshll.u32 %v312_v24, 16  ;;  %v703_v46 = vld [vmem:[#allocation2 + $0x54] sm:$0xf] }
  0xb9   : > { %v951_v20 = vor.u32 %v950_v4, %v947_v52  ;;  %v960_v31 = vrot.slane %v958_v30, 4  ;;  %v440_v29 = vrot.slane %v438_v50, 7  ;;  %v449_v39 = vshll.u32 %v313_v2, 16 }
  0xba   : > { %v5516_v48 = vrot.slane %v446_v55, 7  ;;  %v966_v27 = vrot.slane %v964_v28, 5  ;;  %v4344_v49 = vcombine.low %v5508_v47, %v5512_v3 }
  0xbb   : > { %v2004_v8 = vld [vmem:[#allocation2 + $0x48] sm:$0xf]  ;;  %v952_v10 = vrot.slane %v951_v20, 4  ;;  %v961_v16 = vor.u32 %v960_v31, %v956_v44  ;;  %v444_v9 = vrot.slane %v440_v29, 4  ;;  %v443_v59 = vor.u32 %v441_v21, %v440_v29 }
  0xbc   : > { %v5514_v11 = vld [vmem:[#allocation2 + $0x48] sm:$0xf]  ;;  %2980 = vrot.lane.b32.xlu1 %v4375_v32, %s4821_s7  ;;  %v2141_v5 = vshrl.u32 %v2004_v8, 16  ;;  %v2144_v57 = vshll.u32 %v2004_v8, 16  ;;  %v451_v25 = vor.u32 %v449_v39, %v5516_v48 }
  0xbd   : > { %v1556_v18 = vshrl.u32 %v5514_v11, 16  ;;  %v962_v58 = vrot.slane %v961_v16, 4  ;;  %v1559_v0 = vshll.u32 %v5514_v11, 16  ;;  %v2005_v61 = vld [vmem:[#allocation2 + $0x4c] sm:$0xf]  ;;  %v957_v45 = vsel %vm5092_vm11, %v952_v10, %v956_v44 }
  0xbe   : > { %v5523_v12 = vld [vmem:[#allocation2 + $0x50] sm:$0x1]  ;;  %v2143_v33 = vrot.slane %v2141_v5, 4  ;;  %v2146_v13 = vrot.slane %v2144_v57, 5  ;;  %v2150_v42 = vshll.u32 %v2005_v61, 16  ;;  %v2154_v63 = vshrl.u32 %v2005_v61, 16 }
  0xbf   : > { %6975 = vst [vmem:[#allocation11_spill] sm:$0xff] %v5523_v12  ;;  %v2160_v14 = vshll.u32 %v5523_v12, 16  ;;  %v1398_v17 = vld [vmem:[#allocation2 + $0x4c] sm:$0xf]  ;;  %v4407_v22 = vcombine.low %v2004_v8, %v2005_v61  ;;  %v967_v26 = vsel %vm5092_vm11, %v962_v58, %v966_v27  ;;  %v1424_v35 = vld [vmem:[#allocation2 + $0x50] sm:$0x1]  ;;  %v452_v30 = vsel %vm5099_vm12, %v444_v9, %v451_v25 }
  0xc0   : > { %v2147_v19 = vor.u32 %v2146_v13, %v2143_v33  ;;  %v1558_v37 = vrot.slane %v1556_v18, 4  ;;  %v2152_v38 = vrot.slane %v2150_v42, 5  ;;  %v2156_v40 = vrot.slane %v2154_v63, 4  ;;  %v1824_v52 = vld [vmem:[#allocation2 + $0x48] sm:$0xe] }
  0xc1   : > { %v2162_v23 = vrot.slane %v2160_v14, 5  ;;  %v4328_v41 = vcombine.low %v957_v45, %v967_v26  ;;  %3156 = vrot.lane.b32.xlu1 %v4407_v22, %s4818_s15  ;;  %v1561_v24 = vrot.slane %v1559_v0, 5  ;;  %v1565_v53 = vshll.u32 %v1398_v17, 16  ;;  %706 = vst.msk [vmem:[#allocation2 + $0x58] sm:$0xf] %vm244_vm0, %v452_v30 }
  0xc2   : > { %v2148_v51 = vrot.slane %v2147_v19, 4  ;;  %v1569_v6 = vshrl.u32 %v1398_v17, 16  ;;  %v2157_v15 = vor.u32 %v2156_v40, %v2152_v38  ;;  %v1575_v2 = vshll.u32 %v1424_v35, 16  ;;  %v785_v20 = vld [vmem:[#allocation2 + $0x48] sm:$0xf] }
  0xc3   : > { %v4360_v4 = vcombine.low %v5514_v11, %v1398_v17  ;;  %v1562_v44 = vor.u32 %v1561_v24, %v1558_v37  ;;  %v1567_v28 = vrot.slane %v1565_v53, 5  ;;  %v5538_v31 = vld [vmem:[#allocation2 + $0x4c] sm:$0xf]  ;;  %v704_v21 = vsel %vm5086_vm10, %v443_v59, %v703_v46  ;;  %v5545_v57 = vld [vmem:[#allocation2 + $0x50] sm:$0x1] }
  0xc4   : > { %v2153_v32 = vsel %vm5092_vm11, %v2148_v51, %v2152_v38  ;;  %v1571_v50 = vrot.slane %v1569_v6, 4  ;;  %v2158_v55 = vrot.slane %v2157_v15, 4  ;;  %v1577_v29 = vrot.slane %v1575_v2, 5  ;;  %705 = vst [vmem:[#allocation2 + $0x54] sm:$0xf] %v704_v21 }
  0xc5   : > { %v4280_v39 = vrot.slane %v1824_v52, 9  ;;  %2726 = vrot.lane.b32.xlu1 %v4328_v41, %s4816_s12  ;;  %v1563_v8 = vrot.slane %v1562_v44, 4  ;;  %v1920_v16 = vrot.slane %v1398_v17, 5  ;;  %v1923_v11 = vrot.slane %v1424_v35, 5  ;;  %v707_v63 = vld [vmem:[#allocation2 + $0x5c] sm:$0x1] }
  0xc6   : > { %v1572_v10 = vor.u32 %v1571_v50, %v1567_v28  ;;  %v2163_v5 = vsel %vm5092_vm11, %v2158_v55, %v2162_v23  ;;  %v969_v27 = vshrl.u32 %v785_v20, 16  ;;  %v972_v18 = vshll.u32 %v785_v20, 16  ;;  %v1214_v22 = vld [vmem:[#allocation2 + $0x48] sm:$0xe] }
  0xc7   : > { %v978_v58 = vshll.u32 %v5538_v31, 16  ;;  %v4423_v0 = vcombine.low %v2153_v32, %v2163_v5  ;;  %v1568_v9 = vsel %vm5092_vm11, %v1563_v8, %v1567_v28  ;;  %v1921_v33 = vsel %vm5072_vm7, %v4280_v39, %v1920_v16  ;;  %v5559_v26 = vld [vmem:[#allocation2 + $0x28] sm:$0xf] }
  0xc8   : > { %v1573_v61 = vrot.slane %v1572_v10, 4  ;;  %v1922_v13 = vrot.slane %v1920_v16, 4  ;;  %v971_v45 = vrot.slane %v969_v27, 4  ;;  %v974_v59 = vrot.slane %v972_v18, 5  ;;  %v5562_v37 = vld [vmem:[#allocation2 + $0x58] sm:$0xf] }
  0xc9   : > { %v980_v42 = vrot.slane %v978_v58, 5  ;;  %3236 = vrot.lane.b32.xlu0 %v4423_v0, %s4820_s8  ;;  %2902 = vrot.lane.b32.xlu1 %v4360_v4, %s4817_s14  ;;  %v982_v17 = vshrl.u32 %v5538_v31, 16  ;;  %v988_v25 = vshll.u32 %v5545_v57, 16  ;;  %v453_v19 = vrot.slane %v5516_v48, 4  ;;  %6976 = vst [vmem:[#allocation12_spill] sm:$0xff] %v5562_v37 }
  0xca   : > { %v1578_v14 = vsel %vm5092_vm11, %v1573_v61, %v1577_v29  ;;  %v1924_v38 = vsel %vm5072_vm7, %v1922_v13, %v1923_v11  ;;  %v975_v40 = vor.u32 %v974_v59, %v971_v45  ;;  %v2178_v41 = vshrl.u32 %v5562_v37, 16  ;;  %v5567_v24 = vld [vmem:[#allocation2 + $0x58] sm:$0xf]  ;;  %v314_v29 = vld [vmem:[%s4956_s28 + $0x38] sm:$0xf] }
  0xcb   : > { %v4376_v23 = vcombine.low %v1568_v9, %v1578_v14  ;;  %v4392_v46 = vcombine.low %v1921_v33, %v1924_v38  ;;  %v984_v51 = vrot.slane %v982_v17, 4  ;;  %v2006_v53 = vld [vmem:[#allocation2 + $0x54] sm:$0xf]  ;;  %v708_v6 = vsel %vm5113_vm13, %v453_v19, %v707_v63 }
  0xcc   : > { %v976_v48 = vrot.slane %v975_v40, 4  ;;  %v2174_v52 = vshll.u32 %v5562_v37, 16  ;;  %v4265_v15 = vrot.slane %v1214_v22, 9  ;;  %v2165_v2 = vshrl.u32 %v2006_v53, 16  ;;  %709 = vst [vmem:[#allocation2 + $0x5c] sm:$0x1] %v708_v6 }
  0xcd   : > { %2806 = vrot.lane.b32.xlu0 %v4344_v49, %s4815_s29  ;;  %v2168_v4 = vshll.u32 %v2006_v53, 16  ;;  %3062 = vrot.lane.b32.xlu1 %v4392_v46, %s4819_s16  ;;  %v985_v30 = vor.u32 %v984_v51, %v980_v42  ;;  %v990_v32 = vrot.slane %v988_v25, 5  ;;  %v5577_v44 = vld [vmem:[#allocation2 + $0x54] sm:$0xf]  ;;  %v4408_v28 = vcombine.low %v2006_v53, %v5562_v37 }
  0xce   : > { %v2176_v50 = vrot.slane %v2174_v52, 5  ;;  %v2180_v20 = vrot.slane %v2178_v41, 4  ;;  %v1580_v55 = vshrl.u32 %v5577_v44, 16  ;;  %v2167_v21 = vrot.slane %v2165_v2, 4  ;;  %v1825_v49 = vld [vmem:[#allocation2 + $0x54] sm:$0xe]  ;;  %v5600_v41 = vpop.permute.xlu0 %2796 }
  0xcf   : > { %v2170_v39 = vrot.slane %v2168_v4, 5  ;;  %v986_v47 = vrot.slane %v985_v30, 4  ;;  %v1583_v3 = vshll.u32 %v5577_v44, 16  ;;  %v981_v8 = vsel %vm5092_vm11, %v976_v48, %v980_v42 }
  0xd0   : > { %v2181_v10 = vor.u32 %v2180_v20, %v2176_v50  ;;  %v1582_v16 = vrot.slane %v1580_v55, 4  ;;  %v1593_v11 = vshrl.u32 %v5567_v24, 16  ;;  %v1319_v58 = vrot.slane %v5538_v31, 5 }
  0xd1   : > { %2982 = vrot.lane.b32.xlu0 %v4376_v23, %s4821_s7  ;;  %v991_v5 = vsel %vm5092_vm11, %v986_v47, %v990_v32  ;;  %v2171_v27 = vor.u32 %v2170_v39, %v2167_v21  ;;  %v1585_v18 = vrot.slane %v1583_v3, 5  ;;  %v1322_v9 = vrot.slane %v5545_v57, 5  ;;  %v315_v23 = vld [vmem:[%s4956_s28 + $0x3c] sm:$0xf]  ;;  %v5613_v39 = vld [vmem:[#allocation2 + $0x58] sm:$0xf] }
  0xd2   : > { %v4281_v61 = vrot.slane %v1825_v49, 9  ;;  %v455_v33 = vshrl.u32 %v314_v29, 16  ;;  %v1321_v45 = vrot.slane %v1319_v58, 4  ;;  %v1927_v59 = vrot.slane %v5567_v24, 5  ;;  %v787_v47 = vld [vmem:[#allocation2 + $0x54] sm:$0xf] }
  0xd3   : > { %v2172_v13 = vrot.slane %v2171_v27, 4  ;;  %v458_v42 = vshll.u32 %v314_v29, 16  ;;  %v4329_v63 = vcombine.low %v981_v8, %v991_v5  ;;  %v2033_v14 = vld [vmem:[#allocation2 + $0x5c] sm:$0x1]  ;;  %v2182_v17 = vrot.slane %v2181_v10, 4 }
  0xd4   : > { %v1425_v25 = vld [vmem:[#allocation2 + $0x5c] sm:$0x1]  ;;  %v1586_v19 = vor.u32 %v1585_v18, %v1582_v16  ;;  %v1589_v22 = vshll.u32 %v5567_v24, 16  ;;  %v2184_v57 = vshll.u32 %v2033_v14, 16  ;;  %v1320_v38 = vsel %vm5072_vm7, %v4265_v15, %v1319_v58  ;;  %v1215_v8 = vld [vmem:[#allocation2 + $0x54] sm:$0xe]  ;;  %v5617_v18 = vpop.permute.xlu0 %2716 }
  0xd5   : > { %3158 = vrot.lane.b32.xlu0 %v4408_v28, %s4818_s15  ;;  %v2177_v31 = vsel %vm5092_vm11, %v2172_v13, %v2176_v50  ;;  %v1595_v40 = vrot.slane %v1593_v11, 4  ;;  %v1323_v46 = vsel %vm5072_vm7, %v1321_v45, %v1322_v9  ;;  %v1928_v51 = vsel %vm5072_vm7, %v4281_v61, %v1927_v59  ;;  %v710_v50 = vld [vmem:[#allocation2 + $0x60] sm:$0xf]  ;;  %v812_v27 = vld [vmem:[#allocation2 + $0x5c] sm:$0x1] }
  0xd6   : > { %v1929_v53 = vrot.slane %v1927_v59, 4  ;;  %v1930_v48 = vrot.slane %v1425_v25, 5  ;;  %v2186_v6 = vrot.slane %v2184_v57, 5  ;;  %v1587_v52 = vrot.slane %v1586_v19, 4  ;;  %v714_v9 = vld [vmem:[#allocation2 + $0x68] sm:$0x1] }
  0xd7   : > { %v1591_v2 = vrot.slane %v1589_v22, 5  ;;  %v1599_v4 = vshll.u32 %v1425_v25, 16  ;;  %v4361_v30 = vcombine.low %v5577_v44, %v5567_v24  ;;  %v457_v32 = vrot.slane %v455_v33, 7  ;;  %v316_v14 = vld [vmem:[%s4956_s28 + $0x40] sm:$0xf] }
  0xd8   : > { %v1931_v15 = vsel %vm5072_vm7, %v1929_v53, %v1930_v48  ;;  %v463_v28 = vshrl.u32 %v315_v23, 16  ;;  %v2187_v20 = vsel %vm5092_vm11, %v2182_v17, %v2186_v6  ;;  %v4345_v55 = vcombine.low %v1320_v38, %v1323_v46 }
  0xd9   : > { %2728 = vrot.lane.b32.xlu0 %v4329_v63, %s4816_s12  ;;  %v1596_v29 = vor.u32 %v1595_v40, %v1591_v2  ;;  %v466_v21 = vshll.u32 %v315_v23, 16  ;;  %v4424_v3 = vcombine.low %v2177_v31, %v2187_v20  ;;  %v4393_v49 = vcombine.low %v1928_v51, %v1931_v15  ;;  %v317_v23 = vld [vmem:[%s4956_s28 + $0x44] sm:$0xf] }
  0xda   : > { %v1601_v24 = vrot.slane %v1599_v4, 5  ;;  %v460_v44 = vor.u32 %v458_v42, %v457_v32  ;;  %v1592_v10 = vsel %vm5092_vm11, %v1587_v52, %v1591_v2  ;;  %v461_v11 = vrot.slane %v457_v32, 4  ;;  %v5637_v4 = vld [vmem:[#allocation2 + $0x4] sm:$0xf]  ;;  %v5643_v32 = vpop.permute.xlu0 %3150 }
  0xdb   : > { %v1597_v16 = vrot.slane %v1596_v29, 4  ;;  %v465_v5 = vrot.slane %v463_v28, 7  ;;  %3238 = vrot.lane.b32.xlu1 %v4424_v3, %s4820_s8  ;;  %v1326_v61 = vrot.slane %v5613_v39, 5  ;;  %v993_v33 = vshrl.u32 %v787_v47, 16  ;;  %v717_v3 = vld [vmem:[#allocation2 + $0x6c] sm:$0xf] }
  0xdc   : > { %v711_v58 = vsel %vm5086_vm10, %v460_v44, %v710_v50  ;;  %v996_v13 = vshll.u32 %v787_v47, 16  ;;  %v4266_v63 = vrot.slane %v1215_v8, 9  ;;  %v1329_v25 = vrot.slane %v812_v27, 5 }
  0xdd   : > { %2904 = vrot.lane.b32.xlu0 %v4361_v30, %s4817_s14  ;;  %v1602_v45 = vsel %vm5092_vm11, %v1597_v16, %v1601_v24  ;;  %v468_v59 = vor.u32 %v466_v21, %v465_v5  ;;  %v470_v42 = vrot.slane %v465_v5, 4  ;;  %712 = vst [vmem:[#allocation2 + $0x60] sm:$0xf] %v711_v58  ;;  %v995_v19 = vrot.slane %v993_v33, 4  ;;  %v5639_v30 = vld [vmem:[#allocation2] sm:$0xf] }
  0xde   : > { %v4377_v17 = vcombine.low %v1592_v10, %v1602_v45  ;;  %v998_v22 = vrot.slane %v996_v13, 5  ;;  %v1002_v38 = vshll.u32 %v5613_v39, 16  ;;  %v1006_v40 = vshrl.u32 %v5613_v39, 16 }
  0xdf   : > { %v469_v31 = vsel %vm5099_vm12, %v461_v11, %v468_v59  ;;  %v715_v57 = vsel %vm5113_vm13, %v470_v42, %v714_v9  ;;  %2808 = vrot.lane.b32.xlu1 %v4345_v55, %s4815_s29  ;;  %v1328_v46 = vrot.slane %v1326_v61, 4  ;;  %v1012_v53 = vshll.u32 %v812_v27, 16  ;;  %v5666_v59 = vpop.permute.xlu1 %2892 }
  0xe0   : > { %713 = vst.msk [vmem:[#allocation2 + $0x64] sm:$0xf] %vm244_vm0, %v469_v31  ;;  %716 = vst [vmem:[#allocation2 + $0x68] sm:$0x1] %v715_v57  ;;  %v999_v51 = vor.u32 %v998_v22, %v995_v19  ;;  %v472_v48 = vshrl.u32 %v316_v14, 16  ;;  %v1004_v6 = vrot.slane %v1002_v38, 5  ;;  %v4307_v15 = vcombine.low %v5639_v30, %v5637_v4  ;;  %v5671_v22 = vpop.permute.xlu0 %2896 }
  0xe1   : > { %3064 = vrot.lane.b32.xlu0 %v4393_v49, %s4819_s16  ;;  %v1008_v52 = vrot.slane %v1006_v40, 4  ;;  %v475_v2 = vshll.u32 %v316_v14, 16  ;;  %v480_v55 = vshrl.u32 %v317_v23, 16  ;;  %v1014_v39 = vrot.slane %v1012_v53, 5 }
  0xe2   : > { %v1000_v50 = vrot.slane %v999_v51, 4  ;;  %v474_v20 = vrot.slane %v472_v48, 7  ;;  %v483_v47 = vshll.u32 %v317_v23, 16  ;;  %v5650_v24 = vsel %vm5072_vm7, %v4266_v63, %v1326_v61 }
  0xe3   : > { %v1009_v21 = vor.u32 %v1008_v52, %v1004_v6  ;;  %2984 = vrot.lane.b32.xlu1 %v4377_v17, %s4821_s7  ;;  %v5654_v44 = vsel %vm5072_vm7, %v1328_v46, %v1329_v25  ;;  %v5658_v16 = vrot.slane %v480_v55, 7 }
  0xe4   : > { %v2008_v49 = vld [vmem:[#allocation2 + $0x60] sm:$0xf]  ;;  %v477_v10 = vor.u32 %v475_v2, %v474_v20  ;;  %v1005_v33 = vsel %vm5092_vm11, %v1000_v50, %v1004_v6  ;;  %v478_v13 = vrot.slane %v474_v20, 4 }
  0xe5   : > { %v5656_v8 = vld [vmem:[#allocation2 + $0x60] sm:$0xf]  ;;  %v2189_v11 = vshrl.u32 %v2008_v49, 16  ;;  %v2192_v5 = vshll.u32 %v2008_v49, 16  ;;  %v1010_v27 = vrot.slane %v1009_v21, 4  ;;  %v485_v19 = vor.u32 %v483_v47, %v5658_v16 }
  0xe6   : > { %v1604_v58 = vshrl.u32 %v5656_v8, 16  ;;  %v1826_v9 = vld [vmem:[#allocation2 + $0x60] sm:$0xe]  ;;  %v1607_v61 = vshll.u32 %v5656_v8, 16  ;;  %v718_v45 = vsel %vm5086_vm10, %v477_v10, %v717_v3 }
  0xe7   : > { %v2009_v42 = vld [vmem:[#allocation2 + $0x64] sm:$0xf]  ;;  %v2034_v63 = vld [vmem:[#allocation2 + $0x68] sm:$0x1]  ;;  %v2191_v14 = vrot.slane %v2189_v11, 4  ;;  %v2194_v17 = vrot.slane %v2192_v5, 5  ;;  %v1015_v25 = vsel %vm5092_vm11, %v1010_v27, %v1014_v39  ;;  %v5677_v27 = vpop.permute.xlu1 %3148 }
  0xe8   : > { %719 = vst [vmem:[#allocation2 + $0x6c] sm:$0xf] %v718_v45  ;;  %v2198_v31 = vshll.u32 %v2009_v42, 16  ;;  %v2202_v57 = vshrl.u32 %v2009_v42, 16  ;;  %v2208_v38 = vshll.u32 %v2034_v63, 16  ;;  %v4282_v23 = vrot.slane %v1826_v9, 9  ;;  %v5682_v45 = vpop.permute.xlu0 %3052 }
  0xe9   : > { %v1402_v40 = vld [vmem:[#allocation2 + $0x64] sm:$0xf]  ;;  %v2195_v46 = vor.u32 %v2194_v17, %v2191_v14  ;;  %v4409_v51 = vcombine.low %v2008_v49, %v2009_v42  ;;  %v4330_v53 = vcombine.low %v1005_v33, %v1015_v25  ;;  %v1426_v48 = vld [vmem:[#allocation2 + $0x68] sm:$0x1]  ;;  %v1606_v6 = vrot.slane %v1604_v58, 4 }
  0xea   : > { %v2200_v52 = vrot.slane %v2198_v31, 5  ;;  %v2204_v2 = vrot.slane %v2202_v57, 4  ;;  %v2210_v50 = vrot.slane %v2208_v38, 5  ;;  %v1609_v20 = vrot.slane %v1607_v61, 5  ;;  %v789_v5 = vld [vmem:[#allocation2 + $0x60] sm:$0xf] }
  0xeb   : > { %v2196_v55 = vrot.slane %v2195_v46, 4  ;;  %3160 = vrot.lane.b32.xlu1 %v4409_v51, %s4818_s15  ;;  %v1613_v21 = vshll.u32 %v1402_v40, 16  ;;  %v1617_v39 = vshrl.u32 %v1402_v40, 16  ;;  %v1623_v47 = vshll.u32 %v1426_v48, 16  ;;  %v5689_v31 = vld [vmem:[#allocation2 + $0x64] sm:$0xf] }
  0xec   : > { %v2205_v3 = vor.u32 %v2204_v2, %v2200_v52  ;;  %v1610_v10 = vor.u32 %v1609_v20, %v1606_v6  ;;  %v4362_v11 = vcombine.low %v5656_v8, %v1402_v40  ;;  %v486_v49 = vsel %vm5099_vm12, %v478_v13, %v485_v19  ;;  %v5697_v2 = vld [vmem:[#allocation2 + $0x68] sm:$0x1] }
  0xed   : > { %v2201_v58 = vsel %vm5092_vm11, %v2196_v55, %v2200_v52  ;;  %v1615_v9 = vrot.slane %v1613_v21, 5  ;;  %v1619_v33 = vrot.slane %v1617_v39, 4  ;;  %v1625_v61 = vrot.slane %v1623_v47, 5  ;;  %720 = vst.msk [vmem:[#allocation2 + $0x70] sm:$0xf] %vm244_vm0, %v486_v49  ;;  %v5702_v39 = vpop.permute.xlu1 %2894  ;;  %v5713_v49 = vpop.permute.xlu0 %2798 }
  0xee   : > { %v2206_v42 = vrot.slane %v2205_v3, 4  ;;  %v1611_v63 = vrot.slane %v1610_v10, 4  ;;  %v1934_v8 = vrot.slane %v1402_v40, 5  ;;  %v1937_v17 = vrot.slane %v1426_v48, 5  ;;  %v721_v3 = vld [vmem:[#allocation2 + $0x74] sm:$0x1] }
  0xef   : > { %v5684_v14 = vld [vmem:[#allocation2 + $0x6c] sm:$0xf]  ;;  %2730 = vrot.lane.b32.xlu1 %v4330_v53, %s4816_s12  ;;  %v1620_v13 = vor.u32 %v1619_v33, %v1615_v9  ;;  %v1017_v57 = vshrl.u32 %v789_v5, 16  ;;  %v4346_v46 = vcombine.low %v5650_v24, %v5654_v44  ;;  %v1020_v21 = vshll.u32 %v789_v5, 16 }
  0xf0   : > { %v2213_v25 = vshrl.u32 %v5684_v14, 16  ;;  %v2216_v19 = vshll.u32 %v5684_v14, 16  ;;  %v2211_v38 = vsel %vm5092_vm11, %v2206_v42, %v2210_v50  ;;  %v1935_v40 = vsel %vm5072_vm7, %v4282_v23, %v1934_v8  ;;  %v5711_v10 = vld [vmem:[#allocation2 + $0x6c] sm:$0xf] }
  0xf1   : > { %v1936_v51 = vrot.slane %v1934_v8, 4  ;;  %v4425_v48 = vcombine.low %v2201_v58, %v2211_v38  ;;  %v1621_v53 = vrot.slane %v1620_v13, 4  ;;  %v1019_v55 = vrot.slane %v1017_v57, 4  ;;  %v5723_v8 = vld [vmem:[#allocation2 + $0x10] sm:$0xf] }
  0xf2   : > { %v2215_v6 = vrot.slane %v2213_v25, 4  ;;  %v2218_v52 = vrot.slane %v2216_v19, 5  ;;  %v1026_v50 = vshll.u32 %v5689_v31, 16  ;;  %v1616_v24 = vsel %vm5092_vm11, %v1611_v63, %v1615_v9  ;;  %v1217_v29 = vld [vmem:[#allocation2 + $0x6c] sm:$0xe] }
  0xf3   : > { %v1938_v20 = vsel %vm5072_vm7, %v1936_v51, %v1937_v17  ;;  %3240 = vrot.lane.b32.xlu0 %v4425_v48, %s4820_s8  ;;  %v1626_v44 = vsel %vm5092_vm11, %v1621_v53, %v1625_v61  ;;  %2906 = vrot.lane.b32.xlu1 %v4362_v11, %s4817_s14  ;;  %v1030_v47 = vshrl.u32 %v5689_v31, 16  ;;  %v1022_v58 = vrot.slane %v1020_v21, 5  ;;  %v5725_v17 = vld [vmem:[#allocation2 + $0xc] sm:$0xf]  ;;  %v1216_v53 = vld [vmem:[#allocation2 + $0x60] sm:$0xe] }
  0xf4   : > { %v4394_v23 = vcombine.low %v1935_v40, %v1938_v20  ;;  %v5715_v5 = vld [vmem:[#allocation2 + $0x70] sm:$0xf]  ;;  %v5717_v33 = vrot.slane %v1026_v50, 5  ;;  %v1036_v9 = vshll.u32 %v5697_v2, 16  ;;  %v487_v42 = vrot.slane %v5658_v16, 4  ;;  %v5737_v50 = vpop.permute.xlu1 %3054 }
  0xf5   : > { %v2226_v11 = vshrl.u32 %v5715_v5, 16  ;;  %v1032_v63 = vrot.slane %v1030_v47, 4  ;;  %v4378_v25 = vcombine.low %v1616_v24, %v1626_v44  ;;  %v1023_v19 = vor.u32 %v1022_v58, %v1019_v55  ;;  %v5743_v24 = vpop.permute.xlu0 %3228  ;;  %v5745_v44 = vld [vmem:[#allocation2 + $0x1c] sm:$0xf] }
  0xf6   : > { %v722_v57 = vsel %vm5113_vm13, %v487_v42, %v721_v3  ;;  %v2219_v38 = vor.u32 %v2218_v52, %v2215_v6  ;;  %v2222_v40 = vshll.u32 %v5715_v5, 16  ;;  %v1628_v48 = vshrl.u32 %v5711_v10, 16  ;;  %v5751_v3 = vld [vmem:[#allocation2 + $0x70] sm:$0xf] }
  0xf7   : > { %2810 = vrot.lane.b32.xlu0 %v4346_v46, %s4815_s29  ;;  %3066 = vrot.lane.b32.xlu1 %v4394_v23, %s4819_s16  ;;  %v1033_v16 = vor.u32 %v1032_v63, %v5717_v33  ;;  %723 = vst [vmem:[#allocation2 + $0x74] sm:$0x1] %v722_v57  ;;  %v2228_v51 = vrot.slane %v2226_v11, 4  ;;  %v1024_v20 = vrot.slane %v1023_v19, 4  ;;  %v1038_v21 = vrot.slane %v1036_v9, 5 }
  0xf8   : > { %v1631_v55 = vshll.u32 %v5711_v10, 16  ;;  %v5739_v46 = vrot.slane %v2219_v38, 4  ;;  %v5741_v52 = vrot.slane %v2222_v40, 5  ;;  %v5747_v23 = vld [vmem:[#allocation2 + $0x18] sm:$0xf]  ;;  %v1630_v58 = vrot.slane %v1628_v48, 4 }
  0xf9   : > { %v1034_v6 = vrot.slane %v1033_v16, 4  ;;  %v4267_v42 = vrot.slane %v1216_v53, 9  ;;  %v1333_v11 = vrot.slane %v5689_v31, 5  ;;  %v4410_v63 = vcombine.low %v5684_v14, %v5715_v5  ;;  %v1827_v16 = vld [vmem:[#allocation2 + $0x6c] sm:$0xe] }
  0xfa   : > { %v1633_v9 = vrot.slane %v1631_v55, 5  ;;  %v2229_v19 = vor.u32 %v2228_v51, %v5741_v52  ;;  %v5763_v57 = vsel %vm3308_vm14, %v4307_v15, %v5617_v18  ;;  %v1336_v38 = vrot.slane %v5697_v2, 5  ;;  %v318_v2 = vld [vmem:[%s4956_s28 + $0x48] sm:$0xf] }
  0xfb   : > { %2986 = vrot.lane.b32.xlu0 %v4378_v25, %s4821_s7  ;;  %v1029_v31 = vsel %vm5092_vm11, %v1024_v20, %v5717_v33  ;;  %v1039_v25 = vsel %vm5092_vm11, %v1034_v6, %v1038_v21  ;;  %v5773_v14 = vsel %vm5072_vm7, %v4267_v42, %v1333_v11  ;;  %v1335_v5 = vrot.slane %v1333_v11, 4  ;;  %v5789_v21 = vpop.permute.xlu1 %2800  ;;  %v5795_v42 = vpop.permute.xlu0 %2974 }
  0xfc   : > { %v2225_v18 = vsel %vm5092_vm11, %v5739_v46, %v5741_v52  ;;  %v1641_v4 = vshrl.u32 %v5751_v3, 16  ;;  %v4363_v30 = vcombine.low %v5711_v10, %v5751_v3  ;;  %v1941_v15 = vrot.slane %v5751_v3, 5  ;;  %v319_v52 = vld [vmem:[%s4956_s28 + $0x4c] sm:$0xf] }
  0xfd   : > { %v5786_v40 = vsel %vm5072_vm7, %v1335_v5, %v1336_v38  ;;  %v4283_v48 = vrot.slane %v1827_v16, 9  ;;  %v1634_v53 = vor.u32 %v1633_v9, %v1630_v58  ;;  %v1637_v20 = vshll.u32 %v5751_v3, 16 }
  0xfe   : > { %v2035_v33 = vld [vmem:[#allocation2 + $0x74] sm:$0x1]  ;;  %v4331_v10 = vcombine.low %v1029_v31, %v1039_v25  ;;  %v2230_v55 = vrot.slane %v2229_v19, 4  ;;  %v4347_v46 = vcombine.low %v5773_v14, %v5786_v40  ;;  %v1943_v11 = vrot.slane %v1941_v15, 4  ;;  %v792_v14 = vld [vmem:[#allocation2 + $0x70] sm:$0xf] }
  0xff   : > { %v1427_v51 = vld [vmem:[#allocation2 + $0x74] sm:$0x1]  ;;  %3162 = vrot.lane.b32.xlu0 %v4410_v63, %s4818_s15  ;;  %v2232_v6 = vshll.u32 %v2035_v33, 16  ;;  %v1635_v5 = vrot.slane %v1634_v53, 4  ;;  %v1639_v16 = vrot.slane %v1637_v20, 5  ;;  %v1643_v9 = vrot.slane %v1641_v4, 4 }
 0x100   : > { %v1944_v38 = vrot.slane %v1427_v51, 5  ;;  %v1647_v3 = vshll.u32 %v1427_v51, 16  ;;  %v489_v61 = vshrl.u32 %v318_v2, 16  ;;  %v1942_v63 = vsel %vm5072_vm7, %v4283_v48, %v1941_v15  ;;  %v5801_v33 = vld [vmem:[#allocation2 + $0x74] sm:$0x1] }
 0x101   : > { %v2234_v58 = vrot.slane %v2232_v6, 5  ;;  %v492_v31 = vshll.u32 %v318_v2, 16  ;;  %v497_v25 = vshrl.u32 %v319_v52, 16  ;;  %v1640_v4 = vsel %vm5092_vm11, %v1635_v5, %v1639_v16  ;;  %v724_v15 = vld [vmem:[#allocation2 + $0x78] sm:$0xf] }
 0x102   : > { %v1945_v19 = vsel %vm5072_vm7, %v1943_v11, %v1944_v38  ;;  %v1644_v51 = vor.u32 %v1643_v9, %v1639_v16  ;;  %v1649_v53 = vrot.slane %v1647_v3, 5  ;;  %v491_v20 = vrot.slane %v489_v61, 7  ;;  %v791_v11 = vld [vmem:[#allocation2 + $0x6c] sm:$0xf]  ;;  %v5808_v38 = vpop.permute.xlu1 %2972 }
 0x103   : > { %2732 = vrot.lane.b32.xlu0 %v4331_v10, %s4816_s12  ;;  %v2235_v40 = vsel %vm5092_vm11, %v2230_v55, %v2234_v58  ;;  %v499_v6 = vrot.slane %v497_v25, 7  ;;  %v500_v2 = vshll.u32 %v319_v52, 16  ;;  %v728_v10 = vld [vmem:[#allocation2 + $0x80] sm:$0x1]  ;;  %v4268_v0 = vrot.slane %v1217_v29, 9  ;;  %v5811_v58 = vpop.permute.xlu0 %2720 }
 0x104   : > { %v4426_v48 = vcombine.low %v2225_v18, %v2235_v40  ;;  %v1645_v28 = vrot.slane %v1644_v51, 4  ;;  %v1340_v35 = vrot.slane %v792_v14, 5  ;;  %v1343_v55 = vrot.slane %v5801_v33, 5  ;;  %v320_v25 = vld [vmem:[%s4956_s28 + $0x50] sm:$0xf] }
 0x105   : > { %v494_v5 = vor.u32 %v492_v31, %v491_v20  ;;  %v495_v18 = vrot.slane %v491_v20, 4  ;;  %v502_v61 = vor.u32 %v500_v2, %v499_v6  ;;  %v504_v16 = vrot.slane %v499_v6, 4 }
 0x106   : > { %3242 = vrot.lane.b32.xlu1 %v4426_v48, %s4820_s8  ;;  %v4395_v52 = vcombine.low %v1942_v63, %v1945_v19  ;;  %v1650_v9 = vsel %vm5092_vm11, %v1645_v28, %v1649_v53  ;;  %v1342_v3 = vrot.slane %v1340_v35, 4  ;;  %v1041_v29 = vshrl.u32 %v791_v11, 16  ;;  %v321_v63 = vld [vmem:[%s4956_s28 + $0x54] sm:$0xf]  ;;  %v5838_v6 = vpop.permute.xlu1 %2718 }
 0x107   : > { %2908 = vrot.lane.b32.xlu0 %v4363_v30, %s4817_s14  ;;  %v3359_v40 = vsel %vm3357_vm15, %v5763_v57, %v5600_v41  ;;  %v503_v51 = vsel %vm5099_vm12, %v495_v18, %v502_v61  ;;  %v725_v31 = vsel %vm5086_vm10, %v494_v5, %v724_v15  ;;  %v729_v30 = vsel %vm5113_vm13, %v504_v16, %v728_v10  ;;  %v731_v16 = vld [vmem:[#allocation2 + $0x84] sm:$0xf] }
 0x108   : > { %726 = vst [vmem:[#allocation2 + $0x78] sm:$0xf] %v725_v31  ;;  %727 = vst.msk [vmem:[#allocation2 + $0x7c] sm:$0xf] %vm244_vm0, %v503_v51  ;;  %v5831_v28 = vsel %vm5072_vm7, %v4268_v0, %v1340_v35  ;;  %v1043_v19 = vrot.slane %v1041_v29, 4  ;;  %v1044_v41 = vshll.u32 %v791_v11, 16  ;;  %v4379_v53 = vcombine.low %v1640_v4, %v1650_v9  ;;  %v5842_v11 = vpop.permute.xlu0 %3056 }
 0x109   : > { %730 = vst [vmem:[#allocation2 + $0x80] sm:$0x1] %v729_v30  ;;  %v1050_v57 = vshll.u32 %v792_v14, 16  ;;  %v5836_v15 = vsel %vm5072_vm7, %v1342_v3, %v1343_v55  ;;  %v1054_v48 = vshrl.u32 %v792_v14, 16  ;;  %v506_v20 = vshrl.u32 %v320_v25, 16 }
 0x10a   : > { %2812 = vrot.lane.b32.xlu1 %v4347_v46, %s4815_s29  ;;  %v1046_v2 = vrot.slane %v1044_v41, 5  ;;  %v1060_v35 = vshll.u32 %v5801_v33, 16  ;;  %v509_v0 = vshll.u32 %v320_v25, 16  ;;  %v514_v10 = vshrl.u32 %v321_v63, 16  ;;  %v5854_v3 = vld [vmem:[#allocation2 + $0x28] sm:$0xf] }
 0x10b   : > { %3068 = vrot.lane.b32.xlu0 %v4395_v52, %s4819_s16  ;;  %v1052_v5 = vrot.slane %v1050_v57, 5  ;;  %v1056_v46 = vrot.slane %v1054_v48, 4  ;;  %v5844_v4 = vrot.slane %v506_v20, 7  ;;  %v517_v18 = vshll.u32 %v321_v63, 16  ;;  %v5856_v29 = vld [vmem:[#allocation2 + $0x24] sm:$0xf]  ;;  %v5870_v20 = vpop.permute.xlu1 %3230 }
 0x10c   : > { %v1047_v14 = vor.u32 %v1046_v2, %v1043_v19  ;;  %v5847_v61 = vrot.slane %v514_v10, 7  ;;  %v3392_v33 = vsel %vm3390_vm1, %v3359_v40, %v5666_v59  ;;  %v1062_v30 = vrot.slane %v1060_v35, 5 }
 0x10d   : > { %v511_v9 = vor.u32 %v509_v0, %v5844_v4  ;;  %v512_v63 = vrot.slane %v5844_v4, 4  ;;  %v1057_v41 = vor.u32 %v1056_v46, %v1052_v5  ;;  %v5868_v48 = vsel %vm3423_vm2, %v3392_v33, %v5808_v38 }
 0x10e   : > { %2988 = vrot.lane.b32.xlu1 %v4379_v53, %s4821_s7  ;;  %v1048_v31 = vrot.slane %v1047_v14, 4  ;;  %v519_v57 = vor.u32 %v517_v18, %v5847_v61 }
 0x10f   : > { %v2012_v19 = vld [vmem:[#allocation2 + $0x78] sm:$0xf]  ;;  %v2013_v59 = vld [vmem:[#allocation2 + $0x7c] sm:$0xf]  ;;  %v732_v53 = vsel %vm5086_vm10, %v511_v9, %v731_v16 }
 0x110   : > { %v2036_v40 = vld [vmem:[#allocation2 + $0x80] sm:$0x1]  ;;  %v2237_v2 = vshrl.u32 %v2012_v19, 16  ;;  %v2240_v0 = vshll.u32 %v2012_v19, 16  ;;  %v2246_v35 = vshll.u32 %v2013_v59, 16  ;;  %v2250_v10 = vshrl.u32 %v2013_v59, 16 }
 0x111   : > { %v1405_v4 = vld [vmem:[#allocation2 + $0x78] sm:$0xf]  ;;  %733 = vst [vmem:[#allocation2 + $0x84] sm:$0xf] %v732_v53  ;;  %v5872_v14 = vpop.permute.xlu0 %3232  ;;  %v2256_v46 = vshll.u32 %v2036_v40, 16  ;;  %v4411_v52 = vcombine.low %v2012_v19, %v2013_v59  ;;  %v1053_v18 = vsel %vm5092_vm11, %v1048_v31, %v1052_v5  ;;  %v1058_v53 = vrot.slane %v1057_v41, 4 }
 0x112   : > { %6977 = vst [vmem:[#allocation13_spill] sm:$0xff] %v5872_v14  ;;  %v1406_v16 = vld [vmem:[#allocation2 + $0x7c] sm:$0xf]  ;;  %v2239_v38 = vrot.slane %v2237_v2, 4  ;;  %v2242_v33 = vrot.slane %v2240_v0, 5  ;;  %v2248_v55 = vrot.slane %v2246_v35, 5  ;;  %v5883_v35 = vpop.permute.xlu1 %2976 }
 0x113   : > { %v2252_v25 = vrot.slane %v2250_v10, 4  ;;  %v5877_v47 = vld [vmem:[#allocation2 + $0x80] sm:$0x1]  ;;  %v2258_v51 = vrot.slane %v2256_v46, 5  ;;  %3164 = vrot.lane.b32.xlu1 %v4411_v52, %s4818_s15  ;;  %v1652_v13 = vshrl.u32 %v1405_v4, 16  ;;  %v1655_v37 = vshll.u32 %v1405_v4, 16 }
 0x114   : > { %v2243_v40 = vor.u32 %v2242_v33, %v2239_v38  ;;  %v1661_v59 = vshll.u32 %v1406_v16, 16  ;;  %v1665_v12 = vshrl.u32 %v1406_v16, 16  ;;  %v1063_v5 = vsel %vm5092_vm11, %v1058_v53, %v1062_v30  ;;  %v1828_v14 = vld [vmem:[#allocation2 + $0x78] sm:$0xe] }
 0x115   : > { %v2253_v19 = vor.u32 %v2252_v25, %v2248_v55  ;;  %v1654_v31 = vrot.slane %v1652_v13, 4  ;;  %v1657_v2 = vrot.slane %v1655_v37, 5  ;;  %v1671_v0 = vshll.u32 %v5877_v47, 16  ;;  %v5885_v41 = vpop.permute.xlu0 %2802  ;;  %v793_v53 = vld [vmem:[#allocation2 + $0x78] sm:$0xf] }
 0x116   : > { %v2244_v10 = vrot.slane %v2243_v40, 4  ;;  %v4332_v9 = vcombine.low %v1053_v18, %v1063_v5  ;;  %v1663_v52 = vrot.slane %v1661_v59, 5  ;;  %v1667_v38 = vrot.slane %v1665_v12, 4  ;;  %v794_v59 = vld [vmem:[#allocation2 + $0x7c] sm:$0xf] }
 0x117   : > { %v2254_v46 = vrot.slane %v2253_v19, 4  ;;  %v1658_v7 = vor.u32 %v1657_v2, %v1654_v31  ;;  %v1673_v25 = vrot.slane %v1671_v0, 5  ;;  %v4364_v33 = vcombine.low %v1405_v4, %v1406_v16  ;;  %v5903_v0 = vpop.permute.xlu1 %3152 }
 0x118   : > { %v5887_v56 = vld [vmem:[#allocation2 + $0x84] sm:$0xf]  ;;  %v2249_v37 = vsel %vm5092_vm11, %v2244_v10, %v2248_v55  ;;  %2734 = vrot.lane.b32.xlu1 %v4332_v9, %s4816_s12  ;;  %v520_v30 = vsel %vm5099_vm12, %v512_v63, %v519_v57  ;;  %v1668_v4 = vor.u32 %v1667_v38, %v1663_v52  ;;  %v4284_v5 = vrot.slane %v1828_v14, 9  ;;  %v815_v9 = vld [vmem:[#allocation2 + $0x80] sm:$0x1] }
 0x119   : > { %v2259_v13 = vsel %vm5092_vm11, %v2254_v46, %v2258_v51  ;;  %v2261_v18 = vshrl.u32 %v5887_v56, 16  ;;  %v1659_v40 = vrot.slane %v1658_v7, 4  ;;  %734 = vst.msk [vmem:[#allocation2 + $0x88] sm:$0xf] %vm244_vm0, %v520_v30  ;;  %v2264_v19 = vshll.u32 %v5887_v56, 16  ;;  %v5908_v38 = vpop.permute.xlu0 %2978 }
 0x11a   : > { %v4427_v12 = vcombine.low %v2249_v37, %v2259_v13  ;;  %v1948_v31 = vrot.slane %v1406_v16, 5  ;;  %v1951_v51 = vrot.slane %v5877_v47, 5  ;;  %v1669_v57 = vrot.slane %v1668_v4, 4  ;;  %v735_v46 = vld [vmem:[#allocation2 + $0x8c] sm:$0x1] }
 0x11b   : > { %v2263_v55 = vrot.slane %v2261_v18, 4  ;;  %v1664_v63 = vsel %vm5092_vm11, %v1659_v40, %v1663_v52  ;;  %v2266_v2 = vrot.slane %v2264_v19, 5  ;;  %v1065_v7 = vshrl.u32 %v793_v53, 16  ;;  %v1218_v18 = vld [vmem:[#allocation2 + $0x78] sm:$0xe] }
 0x11c   : > { %3244 = vrot.lane.b32.xlu0 %v4427_v12, %s4820_s8  ;;  %2910 = vrot.lane.b32.xlu1 %v4364_v33, %s4817_s14  ;;  %v1949_v14 = vsel %vm5072_vm7, %v4284_v5, %v1948_v31  ;;  %v1950_v16 = vrot.slane %v1948_v31, 4  ;;  %v1068_v10 = vshll.u32 %v793_v53, 16  ;;  %v1074_v47 = vshll.u32 %v794_v59, 16 }
 0x11d   : > { %v1674_v52 = vsel %vm5092_vm11, %v1669_v57, %v1673_v25  ;;  %v1067_v37 = vrot.slane %v1065_v7, 4  ;;  %v1078_v13 = vshrl.u32 %v794_v59, 16  ;;  %v1084_v30 = vshll.u32 %v815_v9, 16 }
 0x11e   : > { %v1952_v12 = vsel %vm5072_vm7, %v1950_v16, %v1951_v51  ;;  %v1070_v33 = vrot.slane %v1068_v10, 5  ;;  %v1076_v40 = vrot.slane %v1074_v47, 5  ;;  %v6978_v53 = vcombine.low %v5725_v17, %v5723_v8 }
 0x11f   : > { %v6979_v19 = vcombine.low %v5831_v28, %v5836_v15  ;;  %v4380_v25 = vcombine.low %v1664_v63, %v1674_v52  ;;  %v4396_v5 = vcombine.low %v1949_v14, %v1952_v12  ;;  %v1080_v31 = vrot.slane %v1078_v13, 4  ;;  %v2428_v63 = vld [vmem:[#allocation2 + $0x18] sm:$0xe]  ;;  %v5929_v14 = vpop.permute.xlu1 %2722 }
 0x120   : > { %v3314_v4 = vsel %vm3308_vm14, %v6978_v53, %v5838_v6  ;;  %v6980_v57 = vrot.slane %v5847_v61, 4  ;;  %v2015_v7 = vld [vmem:[#allocation2 + $0x88] sm:$0xf]  ;;  %v1071_v16 = vor.u32 %v1070_v33, %v1067_v37  ;;  %v2267_v10 = vor.u32 %v2266_v2, %v2263_v55  ;;  %v5935_v55 = vpop.permute.xlu0 %3154  ;;  %v4681_v33 = vld [vmem:[#allocation2 + $0x1c] sm:$0xf] }
 0x121   : > { %2814 = vrot.lane.b32.xlu0 %v6979_v19, %s4815_s29  ;;  %v4269_v8 = vrot.slane %v1218_v18, 9  ;;  %v1347_v17 = vrot.slane %v794_v59, 5  ;;  %v2274_v6 = vshrl.u32 %v2015_v7, 16  ;;  %v4412_v47 = vcombine.low %v5887_v56, %v2015_v7  ;;  %3070 = vrot.lane.b32.xlu1 %v4396_v5, %s4819_s16 }
 0x122   : > { %v736_v51 = vsel %vm5113_vm13, %v6980_v57, %v735_v46  ;;  %v1081_v28 = vor.u32 %v1080_v31, %v1076_v40  ;;  %v1086_v15 = vrot.slane %v1084_v30, 5  ;;  %v1072_v61 = vrot.slane %v1071_v16, 4 }
 0x123   : > { %737 = vst [vmem:[#allocation2 + $0x8c] sm:$0x1] %v736_v51  ;;  %v2268_v52 = vrot.slane %v2267_v10, 4  ;;  %v2270_v13 = vshll.u32 %v2015_v7, 16  ;;  %v5933_v46 = vsel %vm5072_vm7, %v4269_v8, %v1347_v17  ;;  %v2276_v56 = vrot.slane %v2274_v6, 4 }
 0x124   : > { %v1082_v59 = vrot.slane %v1081_v28, 4  ;;  %v1349_v2 = vrot.slane %v1347_v17, 4  ;;  %v1350_v37 = vrot.slane %v815_v9, 5  ;;  %v1077_v30 = vsel %vm5092_vm11, %v1072_v61, %v1076_v40  ;;  %v322_v10 = vld [vmem:[%s4956_s28 + $0x58] sm:$0xf]  ;;  %v5962_v28 = vpop.permute.xlu1 %2898 }
 0x125   : > { %2990 = vrot.lane.b32.xlu0 %v4380_v25, %s4821_s7  ;;  %v2272_v18 = vrot.slane %v2270_v13, 5  ;;  %v4291_v12 = vrot.slane %v2428_v63, 9  ;;  %v2494_v53 = vrot.slane %v4681_v33, 5  ;;  %v4682_v25 = vld [vmem:[#allocation2 + $0x20] sm:$0x1]  ;;  %v6981_v9 = vcombine.low %v5747_v23, %v5745_v44 }
 0x126   : > { %v1087_v19 = vsel %vm5092_vm11, %v1082_v59, %v1086_v15  ;;  %v1351_v5 = vsel %vm5072_vm7, %v1349_v2, %v1350_v37  ;;  %v2497_v31 = vrot.slane %v4682_v25, 5  ;;  %v3458_v51 = vsel %vm3456_vm3, %v5868_v48, %v5682_v45  ;;  %v323_v6 = vld [vmem:[%s4956_s28 + $0x5c] sm:$0xf] }
 0x127   : > { %v3317_v57 = vsel %vm3308_vm14, %v6981_v9, %v5811_v58  ;;  %v4333_v40 = vcombine.low %v1077_v30, %v1087_v19  ;;  %v2277_v7 = vor.u32 %v2276_v56, %v2272_v18  ;;  %v3361_v16 = vsel %vm3357_vm15, %v3314_v4, %v5713_v49  ;;  %v1407_v4 = vld [vmem:[#allocation2 + $0x84] sm:$0xf] }
 0x128   : > { %v2273_v17 = vsel %vm5092_vm11, %v2268_v52, %v2272_v18  ;;  %v4349_v44 = vcombine.low %v5933_v46, %v1351_v5  ;;  %v2495_v23 = vsel %vm5072_vm7, %v4291_v12, %v2494_v53  ;;  %v2496_v58 = vrot.slane %v2494_v53, 4  ;;  %v5972_v52 = vld [vmem:[#allocation2 + $0x88] sm:$0xf]  ;;  %v2429_v9 = vld [vmem:[#allocation2 + $0x24] sm:$0xe] }
 0x129   : > { %3166 = vrot.lane.b32.xlu0 %v4412_v47, %s4818_s15  ;;  %v2278_v45 = vrot.slane %v2277_v7, 4  ;;  %v3363_v49 = vsel %vm3357_vm15, %v3317_v57, %v5789_v21  ;;  %v5966_v47 = vpop.permute.xlu0 %2724  ;;  %v3491_v63 = vsel %vm3489_vm4, %v3458_v51, %v5677_v27  ;;  %v523_v61 = vshrl.u32 %v322_v10, 16  ;;  %v738_v27 = vld [vmem:[#allocation2 + $0x90] sm:$0xf]  ;;  %v5984_v57 = vpop.permute.xlu1 %3058 }
 0x12a   : > { %v2037_v8 = vld [vmem:[#allocation2 + $0x8c] sm:$0x1]  ;;  %v2498_v15 = vsel %vm5072_vm7, %v2496_v58, %v2497_v31  ;;  %v3524_v59 = vsel %vm3522_vm5, %v3491_v63, %v5743_v24  ;;  %v526_v21 = vshll.u32 %v322_v10, 16  ;;  %v531_v2 = vshrl.u32 %v323_v6, 16 }
 0x12b   : > { %v2280_v48 = vshll.u32 %v2037_v8, 16  ;;  %v4435_v46 = vcombine.low %v2495_v23, %v2498_v15  ;;  %v525_v56 = vrot.slane %v523_v61, 7  ;;  %v534_v37 = vshll.u32 %v323_v6, 16  ;;  %v5982_v19 = vld [vmem:[#allocation2 + $0x8c] sm:$0x1] }
 0x12c   : > { %v1676_v30 = vshrl.u32 %v1407_v4, 16  ;;  %v1679_v12 = vshll.u32 %v1407_v4, 16  ;;  %v1689_v33 = vshrl.u32 %v5972_v52, 16  ;;  %v4365_v53 = vcombine.low %v1407_v4, %v5972_v52  ;;  %v324_v61 = vld [vmem:[%s4956_s28 + $0x60] sm:$0xf] }
 0x12d   : > { %v2282_v13 = vrot.slane %v2280_v48, 5  ;;  %2736 = vrot.lane.b32.xlu0 %v4333_v40, %s4816_s12  ;;  %4461 = vmatprep.mubr.msk.bf16.mxu0 %vm3308_vm14, %v4435_v46  ;;  %v528_v5 = vor.u32 %v526_v21, %v525_v56  ;;  %v529_v25 = vrot.slane %v525_v56, 4  ;;  %v533_v31 = vrot.slane %v531_v2, 7  ;;  %v742_v40 = vld [vmem:[#allocation2 + $0x98] sm:$0x1]  ;;  %v5987_v23 = vpop.permute.xlu0 %2900 }
 0x12e   : > { %3731 = vmatmul.mubr.bf16.vlgmr.msra.gmra.mxu0 %v3524_v59  ;;  %v1678_v51 = vrot.slane %v1676_v30, 4  ;;  %v1681_v7 = vrot.slane %v1679_v12, 5  ;;  %v1685_v10 = vshll.u32 %v5972_v52, 16  ;;  %v1691_v8 = vrot.slane %v1689_v33, 4  ;;  %v1829_v12 = vld [vmem:[#allocation2 + $0x84] sm:$0xe]  ;;  %v6016_v33 = vpop.permute.xlu1 %3234 }
 0x12f   : > { %v2283_v18 = vsel %vm5092_vm11, %v2278_v45, %v2282_v13  ;;  %v538_v58 = vrot.slane %v533_v31, 4  ;;  %v739_v6 = vsel %vm5086_vm10, %v528_v5, %v738_v27  ;;  %v1695_v45 = vshll.u32 %v5982_v19, 16  ;;  %v325_v13 = vld [vmem:[%s4956_s28 + $0x64] sm:$0xf] }
 0x130   : > { %v4428_v24 = vcombine.low %v2273_v17, %v2283_v18  ;;  %v536_v17 = vor.u32 %v534_v37, %v533_v31  ;;  %v3394_v48 = vsel %vm3390_vm1, %v3361_v16, %v5702_v39  ;;  %740 = vst [vmem:[#allocation2 + $0x90] sm:$0xf] %v739_v6  ;;  %v1682_v4 = vor.u32 %v1681_v7, %v1678_v51 }
 0x131   : > { %2816 = vrot.lane.b32.xlu0 %v4349_v44, %s4815_s29  ;;  %v1687_v15 = vrot.slane %v1685_v10, 5  ;;  %v4292_v63 = vrot.slane %v2429_v9, 9  ;;  %v743_v44 = vsel %vm5113_vm13, %v538_v58, %v742_v40  ;;  %v1697_v59 = vrot.slane %v1695_v45, 5  ;;  %v6026_v31 = vpop.permute.xlu0 %3060 }
 0x132   : > { %3246 = vrot.lane.b32.xlu1 %v4428_v24, %s4820_s8  ;;  %v537_v46 = vsel %vm5099_vm12, %v529_v25, %v536_v17  ;;  %v6004_v21 = vsel %vm3390_vm1, %v3363_v49, %v5671_v22  ;;  %744 = vst [vmem:[#allocation2 + $0x98] sm:$0x1] %v743_v44  ;;  %v1683_v39 = vrot.slane %v1682_v4, 4  ;;  %v6982_v56 = vrot.slane %v5559_v26, 5 }
 0x133   : > { %741 = vst.msk [vmem:[#allocation2 + $0x94] sm:$0xf] %vm244_vm0, %v537_v46  ;;  %v1692_v16 = vor.u32 %v1691_v8, %v1687_v15  ;;  %v3427_v18 = vsel %vm3423_vm2, %v3394_v48, %v5795_v42  ;;  %v540_v22 = vshrl.u32 %v324_v61, 16  ;;  %v543_v49 = vshll.u32 %v324_v61, 16  ;;  %v745_v8 = vld [vmem:[#allocation2 + $0x9c] sm:$0xf] }
 0x134   : > { %v2502_v2 = vsel %vm5072_vm7, %v4292_v63, %v6982_v56  ;;  %v6983_v37 = vmov %v6982_v56  ;;  %v548_v27 = vshrl.u32 %v325_v13, 16  ;;  %v1688_v24 = vsel %vm5092_vm11, %v1683_v39, %v1687_v15 }
 0x135   : > { %v2503_v30 = vrot.slane %v6983_v37, 4  ;;  %2912 = vrot.lane.b32.xlu0 %v4365_v53, %s4817_s14  ;;  %v1693_v5 = vrot.slane %v1692_v16, 4  ;;  %v6984_v25 = vrot.slane %v5255_v60, 5  ;;  %v3460_v53 = vsel %vm3456_vm3, %v3427_v18, %v5737_v50  ;;  %v6042_v16 = vpop.permute.xlu1 %2804 }
 0x136   : > { %v3493_v9 = vsel %vm3489_vm4, %v3460_v53, %v5643_v32  ;;  %v542_v40 = vrot.slane %v540_v22, 7  ;;  %v550_v51 = vrot.slane %v548_v27, 7  ;;  %v551_v10 = vshll.u32 %v325_v13, 16 }
 0x137   : > { %v2505_v26 = vsel %vm5072_vm7, %v2503_v30, %v6984_v25  ;;  %v1698_v7 = vsel %vm5092_vm11, %v1693_v5, %v1697_v59  ;;  %v3527_v60 = vsel %vm3522_vm5, %v3493_v9, %v5870_v20  ;;  %v4285_v17 = vrot.slane %v1829_v12, 9  ;;  %v797_v58 = vld [vmem:[#allocation2 + $0x90] sm:$0xf] }
 0x138   : > { %v4436_v42 = vcombine.low %v2502_v2, %v2505_v26  ;;  %v1220_v6 = vld [vmem:[#allocation2 + $0x90] sm:$0xe]  ;;  %v4381_v50 = vcombine.low %v1688_v24, %v1698_v7  ;;  %v545_v45 = vor.u32 %v543_v49, %v542_v40  ;;  %v546_v48 = vrot.slane %v542_v40, 4  ;;  %v749_v40 = vld [vmem:[#allocation2 + $0xa4] sm:$0x1] }
 0x139   : > { %v1955_v32 = vrot.slane %v5972_v52, 5  ;;  %v1113_v4 = vshrl.u32 %v797_v58, 16  ;;  %v1116_v15 = vshll.u32 %v797_v58, 16  ;;  %v4271_v63 = vrot.slane %v1220_v6, 9  ;;  %v817_v44 = vld [vmem:[#allocation2 + $0x98] sm:$0x1] }
 0x13a   : > { %4462 = vmatprep.mubr.msk.bf16.mxu0 %vm3308_vm14, %v4436_v42  ;;  %v553_v61 = vor.u32 %v551_v10, %v550_v51  ;;  %v798_v46 = vld [vmem:[#allocation2 + $0x94] sm:$0xf]  ;;  %2992 = vrot.lane.b32.xlu0 %v4381_v50, %s4821_s7  ;;  %v746_v20 = vsel %vm5086_vm10, %v545_v45, %v745_v8  ;;  %v1958_v39 = vrot.slane %v5982_v19, 5  ;;  %v1132_v18 = vshll.u32 %v817_v44, 16  ;;  %v2016_v25 = vld [vmem:[#allocation2 + $0x90] sm:$0xf] }
 0x13b   : > { %3739 = vmatmul.mubr.bf16.gmra.mxu0 %v3527_v60  ;;  %v1956_v13 = vsel %vm5072_vm7, %v4285_v17, %v1955_v32  ;;  %v1957_v59 = vrot.slane %v1955_v32, 4  ;;  %v1115_v52 = vrot.slane %v1113_v4, 4  ;;  %v1118_v56 = vrot.slane %v1116_v15, 5  ;;  %747 = vst [vmem:[#allocation2 + $0x9c] sm:$0xf] %v746_v20  ;;  %v6044_v30 = vpop.permute.xlu0 %3236 }
 0x13c   : > { %v1122_v2 = vshll.u32 %v798_v46, 16  ;;  %v1126_v37 = vshrl.u32 %v798_v46, 16  ;;  %v1361_v22 = vrot.slane %v798_v46, 5  ;;  %v1364_v49 = vrot.slane %v817_v44, 5  ;;  %v2017_v4 = vld [vmem:[#allocation2 + $0x94] sm:$0xf] }
 0x13d   : > { %v554_v27 = vsel %vm5099_vm12, %v546_v48, %v553_v61  ;;  %v1119_v12 = vor.u32 %v1118_v56, %v1115_v52  ;;  %v1959_v19 = vsel %vm5072_vm7, %v1957_v59, %v1958_v39  ;;  %v1134_v26 = vrot.slane %v1132_v18, 5  ;;  %v2430_v15 = vld [vmem:[#allocation2 + $0x30] sm:$0xe] }
 0x13e   : > { %v1124_v24 = vrot.slane %v1122_v2, 5  ;;  %v1128_v5 = vrot.slane %v1126_v37, 4  ;;  %748 = vst.msk [vmem:[#allocation2 + $0xa0] sm:$0xf] %vm244_vm0, %v554_v27  ;;  %v1363_v53 = vrot.slane %v1361_v22, 4  ;;  %v3429_v42 = vsel %vm3423_vm2, %v6004_v21, %v5883_v35  ;;  %v6066_v21 = vpop.permute.xlu1 %2980 }
 0x13f   : > { %v4397_v9 = vcombine.low %v1956_v13, %v1959_v19  ;;  %v1120_v7 = vrot.slane %v1119_v12, 4  ;;  %v1362_v10 = vsel %vm5072_vm7, %v4271_v63, %v1361_v22  ;;  %v555_v8 = vrot.slane %v550_v51, 4  ;;  %v6074_v63 = vpop.permute.xlu0 %2806  ;;  %v4683_v37 = vld [vmem:[#allocation2 + $0x34] sm:$0xf] }
 0x140   : > { %v1129_v60 = vor.u32 %v1128_v5, %v1124_v24  ;;  %v1365_v17 = vsel %vm5072_vm7, %v1363_v53, %v1364_v49  ;;  %v2285_v58 = vshrl.u32 %v2016_v25, 16  ;;  %v2288_v6 = vshll.u32 %v2016_v25, 16 }
 0x141   : > { %3072 = vrot.lane.b32.xlu0 %v4397_v9, %s4819_s16  ;;  %v6985_v50 = vcombine.low %v5856_v29, %v5854_v3  ;;  %v1125_v45 = vsel %vm5092_vm11, %v1120_v7, %v1124_v24  ;;  %v3462_v48 = vsel %vm3456_vm3, %v3429_v42, %v5842_v11  ;;  %v750_v32 = vsel %vm5113_vm13, %v555_v8, %v749_v40  ;;  %v2038_v8 = vld [vmem:[#allocation2 + $0x98] sm:$0x1] }
 0x142   : > { %v1130_v51 = vrot.slane %v1129_v60, 4  ;;  %v4351_v3 = vcombine.low %v1362_v10, %v1365_v17  ;;  %v6076_v29 = vld [vmem:[#allocation2 + $0x9c] sm:$0xf]  ;;  %751 = vst [vmem:[#allocation2 + $0xa4] sm:$0x1] %v750_v32  ;;  %v2287_v61 = vrot.slane %v2285_v58, 4  ;;  %v4413_v13 = vcombine.low %v2016_v25, %v2017_v4  ;;  %v6089_v25 = vpop.permute.xlu1 %3156 }
 0x143   : > { %v6064_v35 = vsel %vm3308_vm14, %v6985_v50, %v5929_v14  ;;  %v3495_v14 = vsel %vm3489_vm4, %v3462_v48, %v5903_v0  ;;  %v2290_v46 = vrot.slane %v2288_v6, 5  ;;  %v1724_v11 = vshrl.u32 %v6076_v29, 16  ;;  %v1831_v59 = vld [vmem:[#allocation2 + $0x9c] sm:$0xe]  ;;  %v6091_v40 = vpop.permute.xlu0 %2982 }
 0x144   : > { %v1135_v44 = vsel %vm5092_vm11, %v1130_v51, %v1134_v26  ;;  %v1727_v20 = vshll.u32 %v6076_v29, 16  ;;  %v2298_v56 = vshrl.u32 %v2017_v4, 16  ;;  %v4293_v2 = vrot.slane %v2430_v15, 9 }
 0x145   : > { %v4335_v39 = vcombine.low %v1125_v45, %v1135_v44  ;;  %v1412_v52 = vld [vmem:[#allocation2 + $0xa0] sm:$0xf]  ;;  %v2508_v18 = vrot.slane %v4683_v37, 5  ;;  %v1726_v22 = vrot.slane %v1724_v11, 4  ;;  %3168 = vrot.lane.b32.xlu0 %v4413_v13, %s4818_s15  ;;  %v4287_v19 = vrot.slane %v1831_v59, 9 }
 0x146   : > { %v1729_v0 = vrot.slane %v1727_v20, 5  ;;  %v1737_v49 = vshrl.u32 %v1412_v52, 16  ;;  %v4367_v27 = vcombine.low %v6076_v29, %v1412_v52  ;;  %v1733_v12 = vshll.u32 %v1412_v52, 16  ;;  %v326_v20 = vld [vmem:[%s4956_s28 + $0x68] sm:$0xf] }
 0x147   : > { %2740 = vrot.lane.b32.xlu1 %v4335_v39, %s4816_s12  ;;  %v2509_v24 = vsel %vm5072_vm7, %v4293_v2, %v2508_v18  ;;  %v2510_v5 = vrot.slane %v2508_v18, 4  ;;  %v1969_v42 = vrot.slane %v1412_v52, 5  ;;  %v2291_v9 = vor.u32 %v2290_v46, %v2287_v61  ;;  %v6987_v61 = vld [vmem:[#allocation13_spill] sm:$0xff]  ;;  %v327_v52 = vld [vmem:[%s4956_s28 + $0x6c] sm:$0xf] }
 0x148   : > { %v1730_v26 = vor.u32 %v1729_v0, %v1726_v22  ;;  %v1739_v53 = vrot.slane %v1737_v49, 4  ;;  %v1735_v7 = vrot.slane %v1733_v12, 5  ;;  %v6986_v60 = vrot.slane %v5359_v62, 5  ;;  %v795_v22 = vld [vmem:[#allocation2 + $0x84] sm:$0xf]  ;;  %v6119_v49 = vpop.permute.xlu0 %3158 }
 0x149   : > { %v2294_v17 = vshll.u32 %v2017_v4, 16  ;;  %v2300_v58 = vrot.slane %v2298_v56, 4  ;;  %v1431_v6 = vld [vmem:[#allocation2 + $0xa4] sm:$0x1]  ;;  %v6099_v51 = vsel %vm5072_vm7, %v4287_v19, %v1969_v42  ;;  %v1971_v48 = vrot.slane %v1969_v42, 4  ;;  %v6114_v56 = vpop.permute.xlu1 %2726 }
 0x14a   : > { %v2512_v10 = vsel %vm5072_vm7, %v2510_v5, %v6986_v60  ;;  %v1731_v50 = vrot.slane %v1730_v26, 4  ;;  %v1740_v32 = vor.u32 %v1739_v53, %v1735_v7  ;;  %v1743_v62 = vshll.u32 %v1431_v6, 16  ;;  %v796_v0 = vld [vmem:[#allocation2 + $0x88] sm:$0xf]  ;;  %v6126_v5 = vld [vmem:[#allocation2 + $0x8c] sm:$0x1] }
 0x14b   : > { %v4437_v45 = vcombine.low %v2509_v24, %v2512_v10  ;;  %2820 = vrot.lane.b32.xlu1 %v4351_v3, %s4815_s29  ;;  %v1972_v15 = vrot.slane %v1431_v6, 5  ;;  %v2292_v29 = vrot.slane %v2291_v9, 4  ;;  %v3530_v46 = vsel %vm3522_vm5, %v3495_v14, %v6987_v61 }
 0x14c   : > { %v1736_v4 = vsel %vm5092_vm11, %v1731_v50, %v1735_v7  ;;  %v2296_v44 = vrot.slane %v2294_v17, 5  ;;  %v2304_v11 = vshll.u32 %v2038_v8, 16  ;;  %v1741_v13 = vrot.slane %v1740_v32, 4  ;;  %v752_v17 = vld [vmem:[#allocation2 + $0xa8] sm:$0xf]  ;;  %v6134_v61 = vpop.permute.xlu0 %2728 }
 0x14d   : > { %4463 = vmatprep.mubr.msk.bf16.mxu0 %vm3308_vm14, %v4437_v45  ;;  %v1745_v59 = vrot.slane %v1743_v62, 5  ;;  %v1973_v3 = vsel %vm5072_vm7, %v1971_v48, %v1972_v15  ;;  %v3365_v39 = vsel %vm3357_vm15, %v6064_v35, %v5885_v41  ;;  %v557_v35 = vshrl.u32 %v326_v20, 16  ;;  %v6132_v48 = vpop.permute.xlu1 %2902 }
 0x14e   : > { %3747 = vmatmul.mubr.bf16.gmra.mxu0 %v3530_v46  ;;  %v4399_v2 = vcombine.low %v6099_v51, %v1973_v3  ;;  %v2297_v14 = vsel %vm5092_vm11, %v2292_v29, %v2296_v44  ;;  %v2301_v37 = vor.u32 %v2300_v58, %v2296_v44  ;;  %v2306_v18 = vrot.slane %v2304_v11, 5  ;;  %v6136_v46 = vld [vmem:[#allocation2 + $0x5c] sm:$0x1] }
 0x14f   : > { %2916 = vrot.lane.b32.xlu1 %v4367_v27, %s4817_s14  ;;  %v1746_v12 = vsel %vm5092_vm11, %v1741_v13, %v1745_v59  ;;  %v3398_v41 = vsel %vm3390_vm1, %v3365_v39, %v5962_v28  ;;  %v560_v24 = vshll.u32 %v326_v20, 16  ;;  %v565_v53 = vshrl.u32 %v327_v52, 16  ;;  %v2431_v59 = vld [vmem:[#allocation2 + $0x3c] sm:$0xe] }
 0x150   : > { %v4383_v19 = vcombine.low %v1736_v4, %v1746_v12  ;;  %v2302_v26 = vrot.slane %v2301_v37, 4  ;;  %v568_v42 = vshll.u32 %v327_v52, 16  ;;  %v559_v9 = vrot.slane %v557_v35, 7  ;;  %v1219_v4 = vld [vmem:[#allocation2 + $0x84] sm:$0xe] }
 0x151   : > { %v1089_v7 = vshrl.u32 %v795_v22, 16  ;;  %v1092_v60 = vshll.u32 %v795_v22, 16  ;;  %v1098_v10 = vshll.u32 %v796_v0, 16  ;;  %v567_v8 = vrot.slane %v565_v53, 7  ;;  %v4686_v37 = vld [vmem:[#allocation2 + $0x34] sm:$0xf] }
 0x152   : > { %v2307_v27 = vsel %vm5092_vm11, %v2302_v26, %v2306_v18  ;;  %v1102_v58 = vshrl.u32 %v796_v0, 16  ;;  %v1108_v28 = vshll.u32 %v6126_v5, 16  ;;  %v562_v50 = vor.u32 %v560_v24, %v559_v9  ;;  %v756_v22 = vld [vmem:[#allocation2 + $0xb0] sm:$0x1]  ;;  %v799_v24 = vld [vmem:[#allocation2 + $0x9c] sm:$0xf] }
 0x153   : > { %2996 = vrot.lane.b32.xlu1 %v4383_v19, %s4821_s7  ;;  %v4429_v6 = vcombine.low %v2297_v14, %v2307_v27  ;;  %v563_v45 = vrot.slane %v559_v9, 4  ;;  %v1091_v51 = vrot.slane %v1089_v7, 4  ;;  %v570_v32 = vor.u32 %v568_v42, %v567_v8  ;;  %v4685_v14 = vld [vmem:[#allocation2 + $0x30] sm:$0xf]  ;;  %v6159_v27 = vld [vmem:[#allocation2 + $0xa0] sm:$0xf] }
 0x154   : > { %v1094_v62 = vrot.slane %v1092_v60, 5  ;;  %v1100_v15 = vrot.slane %v1098_v10, 5  ;;  %v1104_v29 = vrot.slane %v1102_v58, 4  ;;  %v2532_v44 = vrot.slane %v6136_v46, 5  ;;  %v6988_v60 = vld [vmem:[#allocation9_spill] sm:$0xff] }
 0x155   : > { %3248 = vrot.lane.b32.xlu0 %v4429_v6, %s4820_s8  ;;  %v753_v11 = vsel %vm5086_vm10, %v562_v50, %v752_v17  ;;  %v1110_v20 = vrot.slane %v1108_v28, 5  ;;  %v3431_v13 = vsel %vm3423_vm2, %v3398_v41, %v5908_v38  ;;  %v571_v3 = vsel %vm5099_vm12, %v563_v45, %v570_v32  ;;  %v6171_v28 = vld [vmem:[#allocation2 + $0xa4] sm:$0x1]  ;;  %v1409_v50 = vld [vmem:[#allocation2 + $0x90] sm:$0xf]  ;;  %v6173_v45 = vpop.permute.xlu0 %2904 }
 0x156   : > { %754 = vst [vmem:[#allocation2 + $0xa8] sm:$0xf] %v753_v11  ;;  %v1095_v39 = vor.u32 %v1094_v62, %v1091_v51  ;;  %v1105_v52 = vor.u32 %v1104_v29, %v1100_v15  ;;  %v4311_v18 = vcombine.low %v4685_v14, %v4686_v37  ;;  %755 = vst.msk [vmem:[#allocation2 + $0xac] sm:$0xf] %vm244_vm0, %v571_v3  ;;  %v572_v38 = vrot.slane %v567_v8, 4  ;;  %v6161_v8 = vpop.permute.xlu1 %3062  ;;  %v6991_v62 = vld [vmem:[#allocation10_spill] sm:$0xff] }
 0x157   : > { %3076 = vrot.lane.b32.xlu1 %v4399_v2, %s4819_s16  ;;  %v6150_v12 = vsel %vm3456_vm3, %v3431_v13, %v5984_v57  ;;  %v4270_v41 = vrot.slane %v1219_v4, 9  ;;  %v1354_v35 = vrot.slane %v796_v0, 5  ;;  %v1357_v53 = vrot.slane %v6126_v5, 5  ;;  %v330_v46 = vld [vmem:[%s4956_s28 + $0x78] sm:$0xf] }
 0x158   : > { %v1096_v19 = vrot.slane %v1095_v39, 4  ;;  %v1106_v26 = vrot.slane %v1105_v52, 4  ;;  %v4294_v42 = vrot.slane %v2431_v59, 9  ;;  %v757_v9 = vsel %vm5113_vm13, %v572_v38, %v756_v22 }
 0x159   : > { %v1355_v2 = vsel %vm5072_vm7, %v4270_v41, %v1354_v35  ;;  %v1356_v7 = vrot.slane %v1354_v35, 4  ;;  %v6989_v10 = vrot.slane %v6988_v60, 5  ;;  %758 = vst [vmem:[#allocation2 + $0xb0] sm:$0x1] %v757_v9  ;;  %v1137_v6 = vshrl.u32 %v799_v24, 16 }
 0x15a   : > { %v1101_v0 = vsel %vm5092_vm11, %v1096_v19, %v1100_v15  ;;  %v1111_v5 = vsel %vm5092_vm11, %v1106_v26, %v1110_v20  ;;  %v6992_v15 = vrot.slane %v6991_v62, 5  ;;  %v1140_v4 = vshll.u32 %v799_v24, 16  ;;  %v6186_v9 = vpop.permute.xlu1 %3238 }
 0x15b   : > { %v2517_v57 = vrot.slane %v6989_v10, 4  ;;  %v6990_v17 = vmov %v6989_v10  ;;  %v4334_v51 = vcombine.low %v1101_v0, %v1111_v5  ;;  %v1358_v32 = vsel %vm5072_vm7, %v1356_v7, %v1357_v53  ;;  %v6192_v0 = vpop.permute.xlu0 %3064 }
 0x15c   : > { %v2516_v58 = vsel %vm5072_vm7, %v4294_v42, %v6990_v17  ;;  %v4350_v11 = vcombine.low %v1355_v2, %v1358_v32  ;;  %v1139_v13 = vrot.slane %v1137_v6, 4  ;;  %v1146_v59 = vshll.u32 %v6159_v27, 16 }
 0x15d   : > { %v2519_v29 = vsel %vm5072_vm7, %v2517_v57, %v6992_v15  ;;  %v2020_v3 = vld [vmem:[#allocation2 + $0xa8] sm:$0xf]  ;;  %2738 = vrot.lane.b32.xlu0 %v4334_v51, %s4816_s12  ;;  %v1142_v39 = vrot.slane %v1140_v4, 5  ;;  %v1150_v52 = vshrl.u32 %v6159_v27, 16  ;;  %v1156_v14 = vshll.u32 %v6171_v28, 16 }
 0x15e   : > { %v4438_v20 = vcombine.low %v2516_v58, %v2519_v29  ;;  %v1700_v37 = vshrl.u32 %v1409_v50, 16  ;;  %v2021_v22 = vld [vmem:[#allocation2 + $0xac] sm:$0xf]  ;;  %v2333_v38 = vshrl.u32 %v2020_v3, 16  ;;  %v2336_v41 = vshll.u32 %v2020_v3, 16 }
 0x15f   : > { %v1148_v35 = vrot.slane %v1146_v59, 5  ;;  %v1703_v24 = vshll.u32 %v1409_v50, 16  ;;  %v2346_v19 = vshrl.u32 %v2021_v22, 16  ;;  %v4415_v26 = vcombine.low %v2020_v3, %v2021_v22  ;;  %v6190_v57 = vld [vmem:[#allocation2 + $0x94] sm:$0xf] }
 0x160   : > { %4464 = vmatprep.mubr.msk.bf16.mxu0 %vm3308_vm14, %v4438_v20  ;;  %v2342_v53 = vshll.u32 %v2021_v22, 16  ;;  %v1143_v42 = vor.u32 %v1142_v39, %v1139_v13  ;;  %v2335_v2 = vrot.slane %v2333_v38, 4  ;;  %v2338_v7 = vrot.slane %v2336_v41, 5  ;;  %v6195_v5 = vld [vmem:[#allocation2 + $0xb0] sm:$0x1]  ;;  %v6211_v22 = vpop.permute.xlu1 %2808 }
 0x161   : > { %v3323_v60 = vsel %vm3308_vm14, %v4311_v18, %v5966_v47  ;;  %v1152_v10 = vrot.slane %v1150_v52, 4  ;;  %3172 = vrot.lane.b32.xlu1 %v4415_v26, %s4818_s15  ;;  %v2348_v58 = vrot.slane %v2346_v19, 4  ;;  %2818 = vrot.lane.b32.xlu0 %v4350_v11, %s4815_s29  ;;  %v1158_v51 = vrot.slane %v1156_v14, 5  ;;  %v1221_v13 = vld [vmem:[#allocation2 + $0x9c] sm:$0xe] }
 0x162   : > { %v2344_v17 = vrot.slane %v2342_v53, 5  ;;  %v1144_v6 = vrot.slane %v1143_v42, 4  ;;  %v2339_v32 = vor.u32 %v2338_v7, %v2335_v2  ;;  %v2352_v62 = vshll.u32 %v6195_v5, 16  ;;  %v6224_v53 = vld [vmem:[#allocation2 + $0xa8] sm:$0xf] }
 0x163   : > { %v1153_v15 = vor.u32 %v1152_v10, %v1148_v35  ;;  %v1702_v47 = vrot.slane %v1700_v37, 4  ;;  %v1705_v29 = vrot.slane %v1703_v24, 5  ;;  %v1713_v4 = vshrl.u32 %v6190_v57, 16  ;;  %v6226_v42 = vld [vmem:[#allocation2 + $0x68] sm:$0x1] }
 0x164   : > { %v2349_v18 = vor.u32 %v2348_v58, %v2344_v17  ;;  %v4366_v20 = vcombine.low %v1409_v50, %v6190_v57  ;;  %v2340_v59 = vrot.slane %v2339_v32, 4  ;;  %v2354_v3 = vrot.slane %v2352_v62, 5  ;;  %v331_v2 = vld [vmem:[%s4956_s28 + $0x7c] sm:$0xf] }
 0x165   : > { %v1154_v39 = vrot.slane %v1153_v15, 4  ;;  %v3497_v11 = vsel %vm3489_vm4, %v6150_v12, %v5935_v55  ;;  %v1149_v14 = vsel %vm5092_vm11, %v1144_v6, %v1148_v35  ;;  %v3367_v50 = vsel %vm3357_vm15, %v3323_v60, %v6042_v16  ;;  %v1430_v35 = vld [vmem:[#allocation2 + $0x98] sm:$0x1]  ;;  %v6218_v24 = vpop.permute.xlu0 %3240 }
 0x166   : > { %v2350_v52 = vrot.slane %v2349_v18, 4  ;;  %2914 = vrot.lane.b32.xlu0 %v4366_v20, %s4817_s14  ;;  %v3533_v37 = vsel %vm3522_vm5, %v3497_v11, %v6016_v33  ;;  %v2345_v38 = vsel %vm5092_vm11, %v2340_v59, %v2344_v17  ;;  %v4272_v12 = vrot.slane %v1221_v13, 9  ;;  %v6242_v13 = vpop.permute.xlu1 %2984 }
 0x167   : > { %v1159_v55 = vsel %vm5092_vm11, %v1154_v39, %v1158_v51  ;;  %3755 = vmatmul.mubr.bf16.gmra.mxu0 %v3533_v37  ;;  %v1368_v41 = vrot.slane %v6159_v27, 5  ;;  %v1371_v16 = vrot.slane %v6171_v28, 5  ;;  %v1706_v19 = vor.u32 %v1705_v29, %v1702_v47  ;;  %v6229_v51 = vld [vmem:[#allocation2 + $0xac] sm:$0xf]  ;;  %v1830_v47 = vld [vmem:[#allocation2 + $0x90] sm:$0xe] }
 0x168   : > { %v2355_v33 = vsel %vm5092_vm11, %v2350_v52, %v2354_v3  ;;  %v1709_v26 = vshll.u32 %v6190_v57, 16  ;;  %v1715_v27 = vrot.slane %v1713_v4, 4  ;;  %v4336_v10 = vcombine.low %v1149_v14, %v1159_v55 }
 0x169   : > { %v4431_v7 = vcombine.low %v2345_v38, %v2355_v33  ;;  %v1370_v60 = vrot.slane %v1368_v41, 4  ;;  %v1707_v17 = vrot.slane %v1706_v19, 4  ;;  %v1719_v6 = vshll.u32 %v1430_v35, 16  ;;  %v6244_v59 = vpop.permute.xlu0 %2810  ;;  %v6250_v38 = vld [vmem:[#allocation2 + $0xb0] sm:$0x1] }
 0x16a   : > { %v1711_v58 = vrot.slane %v1709_v26, 5  ;;  %v1369_v28 = vsel %vm5072_vm7, %v4272_v12, %v1368_v41  ;;  %v3400_v32 = vsel %vm3390_vm1, %v3367_v50, %v5987_v23  ;;  %v1748_v62 = vshrl.u32 %v6224_v53, 16  ;;  %v6254_v33 = vld [vmem:[#allocation2 + $0x9c] sm:$0xf] }
 0x16b   : > { %3252 = vrot.lane.b32.xlu1 %v4431_v7, %s4820_s8  ;;  %v1751_v15 = vshll.u32 %v6224_v53, 16  ;;  %v1372_v18 = vsel %vm5072_vm7, %v1370_v60, %v1371_v16  ;;  %v1721_v4 = vrot.slane %v1719_v6, 5  ;;  %v3433_v20 = vsel %vm3423_vm2, %v3400_v32, %v6066_v21  ;;  %v6271_v32 = vpop.permute.xlu1 %3160 }
 0x16c   : > { %v1716_v29 = vor.u32 %v1715_v27, %v1711_v58  ;;  %v1712_v23 = vsel %vm5092_vm11, %v1707_v17, %v1711_v58  ;;  %v1750_v3 = vrot.slane %v1748_v62, 4  ;;  %v1761_v11 = vshrl.u32 %v6229_v51, 16 }
 0x16d   : > { %v1753_v39 = vrot.slane %v1751_v15, 5  ;;  %v4286_v14 = vrot.slane %v1830_v47, 9  ;;  %v1962_v37 = vrot.slane %v6190_v57, 5  ;;  %v1965_v50 = vrot.slane %v1430_v35, 5  ;;  %v6273_v62 = vpop.permute.xlu0 %2986 }
 0x16e   : > { %v1717_v52 = vrot.slane %v1716_v29, 4  ;;  %v4352_v21 = vcombine.low %v1369_v28, %v1372_v18  ;;  %v1757_v12 = vshll.u32 %v6229_v51, 16  ;;  %v1763_v41 = vrot.slane %v1761_v11, 4  ;;  %v2432_v28 = vld [vmem:[#allocation2 + $0x48] sm:$0xe] }
 0x16f   : > { %2742 = vrot.lane.b32.xlu1 %v4336_v10, %s4816_s12  ;;  %v1754_v55 = vor.u32 %v1753_v39, %v1750_v3  ;;  %v4368_v19 = vcombine.low %v6224_v53, %v6229_v51  ;;  %v1963_v57 = vsel %vm5072_vm7, %v4286_v14, %v1962_v37  ;;  %v1964_v35 = vrot.slane %v1962_v37, 4  ;;  %v6263_v10 = vld [vmem:[#allocation2 + $0xa0] sm:$0xf]  ;;  %v4688_v14 = vld [vmem:[#allocation2 + $0x4c] sm:$0xf] }
 0x170   : > { %v1722_v16 = vsel %vm5092_vm11, %v1717_v52, %v1721_v4  ;;  %v1759_v60 = vrot.slane %v1757_v12, 5  ;;  %v1767_v27 = vshll.u32 %v6250_v38, 16  ;;  %v3466_v58 = vsel %vm3456_vm3, %v3433_v20, %v6026_v31  ;;  %v1832_v31 = vld [vmem:[#allocation2 + $0xa8] sm:$0xe] }
 0x171   : > { %v4382_v26 = vcombine.low %v1712_v23, %v1722_v16  ;;  %v1755_v7 = vrot.slane %v1754_v55, 4  ;;  %v1966_v17 = vsel %vm5072_vm7, %v1964_v35, %v1965_v50  ;;  %v2309_v6 = vshrl.u32 %v6254_v33, 16  ;;  %v4689_v50 = vld [vmem:[#allocation2 + $0x40] sm:$0xf]  ;;  %v6292_v35 = vld [vmem:[#allocation2 + $0xa4] sm:$0x1] }
 0x172   : > { %v2312_v53 = vshll.u32 %v6254_v33, 16  ;;  %v4398_v15 = vcombine.low %v1963_v57, %v1966_v17  ;;  %v3499_v47 = vsel %vm3489_vm4, %v3466_v58, %v6089_v25  ;;  %v1764_v18 = vor.u32 %v1763_v41, %v1759_v60  ;;  %v6301_v17 = vpop.permute.xlu0 %3162  ;;  %v6993_v58 = vld [vmem:[#allocation11_spill] sm:$0xff] }
 0x173   : > { %2822 = vrot.lane.b32.xlu1 %v4352_v21, %s4815_s29  ;;  %2994 = vrot.lane.b32.xlu0 %v4382_v26, %s4821_s7  ;;  %v1769_v29 = vrot.slane %v1767_v27, 5  ;;  %v1760_v4 = vsel %vm5092_vm11, %v1755_v7, %v1759_v60  ;;  %v2311_v20 = vrot.slane %v2309_v6, 4  ;;  %v2322_v3 = vshrl.u32 %v6263_v10, 16  ;;  %v4690_v21 = vld [vmem:[#allocation2 + $0x3c] sm:$0xf]  ;;  %v6299_v27 = vpop.permute.xlu1 %2730 }
 0x174   : > { %v2314_v23 = vrot.slane %v2312_v53, 5  ;;  %v1765_v39 = vrot.slane %v1764_v18, 4  ;;  %v4414_v11 = vcombine.low %v6254_v33, %v6263_v10  ;;  %v4295_v52 = vrot.slane %v2432_v28, 9  ;;  %v328_v60 = vld [vmem:[%s4956_s28 + $0x70] sm:$0xf] }
 0x175   : > { %v2522_v37 = vrot.slane %v4688_v14, 5  ;;  %v4312_v25 = vcombine.low %v4690_v21, %v4689_v50  ;;  %v4288_v55 = vrot.slane %v1832_v31, 9  ;;  %v1976_v12 = vrot.slane %v6229_v51, 5  ;;  %v6318_v14 = vld [vmem:[#allocation2 + $0xa8] sm:$0xf] }
 0x176   : > { %v1979_v41 = vrot.slane %v6250_v38, 5  ;;  %v1770_v16 = vsel %vm5092_vm11, %v1765_v39, %v1769_v29  ;;  %v2315_v26 = vor.u32 %v2314_v23, %v2311_v20  ;;  %v6994_v6 = vrot.slane %v6993_v58, 5  ;;  %v329_v29 = vld [vmem:[%s4956_s28 + $0x74] sm:$0xf]  ;;  %6995 = vst [vmem:[#allocation13_spill] sm:$0xff] %v6318_v14  ;;  %s4749_s28 = sshll.u32 %s4822_s13, 4  ;;  %s4750_s28 = int_to_ptr.vmem [resolvable:$false] %s4749_s28 }
 0x177   : > { %2918 = vrot.lane.b32.xlu1 %v4368_v19, %s4817_s14  ;;  %3074 = vrot.lane.b32.xlu0 %v4398_v15, %s4819_s16  ;;  %v2523_v33 = vsel %vm5072_vm7, %v4295_v52, %v2522_v37  ;;  %v2524_v57 = vrot.slane %v2522_v37, 4  ;;  %v4384_v7 = vcombine.low %v1760_v4, %v1770_v16  ;;  %v3326_v51 = vsel %vm3308_vm14, %v4312_v25, %v6114_v56  ;;  %v4691_v16 = vld [vmem:[#allocation2 + $0x48] sm:$0xf] }
 0x178   : > { %v1977_v38 = vsel %vm5072_vm7, %v4288_v55, %v1976_v12  ;;  %v1978_v19 = vrot.slane %v1976_v12, 4  ;;  %v2316_v28 = vrot.slane %v2315_v26, 4  ;;  %v2318_v15 = vshll.u32 %v6263_v10, 16  ;;  %v6327_v26 = vld [vmem:[#allocation2 + $0xac] sm:$0xf] }
 0x179   : > { %v2526_v53 = vsel %vm5072_vm7, %v2524_v57, %v6994_v6  ;;  %v2324_v18 = vrot.slane %v2322_v3, 4  ;;  %v3536_v31 = vsel %vm3522_vm5, %v3499_v47, %v6044_v30  ;;  %v2328_v20 = vshll.u32 %v6292_v35, 16  ;;  %6996 = vst [vmem:[#allocation9_spill] sm:$0xff] %v6327_v26 }
 0x17a   : > { %v4439_v56 = vcombine.low %v2523_v33, %v2526_v53  ;;  %v1980_v4 = vsel %vm5072_vm7, %v1978_v19, %v1979_v41  ;;  %v2320_v39 = vrot.slane %v2318_v15, 5  ;;  %v3369_v52 = vsel %vm3357_vm15, %v3326_v51, %v6074_v63  ;;  %v759_v63 = vld [vmem:[#allocation2 + $0xb4] sm:$0xf]  ;;  %v4692_v33 = vld [vmem:[#allocation2 + $0x4c] sm:$0xf]  ;;  %v6332_v51 = vpop.permute.xlu0 %2732 }
 0x17b   : > { %2998 = vrot.lane.b32.xlu1 %v4384_v7, %s4821_s7  ;;  %3170 = vrot.lane.b32.xlu0 %v4414_v11, %s4818_s15  ;;  %v4400_v23 = vcombine.low %v1977_v38, %v1980_v4  ;;  %v574_v3 = vshrl.u32 %v328_v60, 16  ;;  %v2330_v30 = vrot.slane %v2328_v20, 5  ;;  %v3402_v47 = vsel %vm3390_vm1, %v3369_v52, %v6132_v48  ;;  %v6330_v7 = vpop.permute.xlu1 %2906  ;;  %v819_v15 = vld [vmem:[#allocation2 + $0xb0] sm:$0x1] }
 0x17c   : > { %4465 = vmatprep.mubr.msk.bf16.mxu0 %vm3308_vm14, %v4439_v56  ;;  %v577_v37 = vshll.u32 %v328_v60, 16  ;;  %v582_v50 = vshrl.u32 %v329_v29, 16  ;;  %v2321_v11 = vsel %vm5092_vm11, %v2316_v28, %v2320_v39  ;;  %v2325_v21 = vor.u32 %v2324_v18, %v2320_v39 }
 0x17d   : > { %3763 = vmatmul.mubr.bf16.gmra.mxu0 %v3536_v31  ;;  %v576_v25 = vrot.slane %v574_v3, 7  ;;  %v585_v55 = vshll.u32 %v329_v29, 16  ;;  %v3435_v41 = vsel %vm3423_vm2, %v3402_v47, %v6091_v40  ;;  %v4313_v57 = vcombine.low %v4691_v16, %v4692_v33  ;;  %v763_v40 = vld [vmem:[#allocation2 + $0xbc] sm:$0x1]  ;;  %v2433_v29 = vld [vmem:[#allocation2 + $0x54] sm:$0xe] }
 0x17e   : > { %v584_v12 = vrot.slane %v582_v50, 7  ;;  %v1161_v48 = vshrl.u32 %v6318_v14, 16  ;;  %v2326_v38 = vrot.slane %v2325_v21, 4  ;;  %v3468_v58 = vsel %vm3456_vm3, %v3435_v41, %v6161_v8  ;;  %v1222_v8 = vld [vmem:[#allocation2 + $0xa8] sm:$0xe]  ;;  %v6357_v41 = vpop.permute.xlu0 %2908 }
 0x17f   : > { %3078 = vrot.lane.b32.xlu1 %v4400_v23, %s4819_s16  ;;  %v579_v19 = vor.u32 %v577_v37, %v576_v25  ;;  %v580_v60 = vrot.slane %v576_v25, 4  ;;  %v3329_v53 = vsel %vm3308_vm14, %v4313_v57, %v6134_v61  ;;  %v1164_v4 = vshll.u32 %v6318_v14, 16 }
 0x180   : > { %v587_v6 = vor.u32 %v585_v55, %v584_v12  ;;  %v589_v28 = vrot.slane %v584_v12, 4  ;;  %v1163_v18 = vrot.slane %v1161_v48, 4  ;;  %v2331_v56 = vsel %vm5092_vm11, %v2326_v38, %v2330_v30 }
 0x181   : > { %v760_v31 = vsel %vm5086_vm10, %v579_v19, %v759_v63  ;;  %v1170_v20 = vshll.u32 %v6327_v26, 16  ;;  %v4430_v23 = vcombine.low %v2321_v11, %v2331_v56  ;;  %v1174_v52 = vshrl.u32 %v6327_v26, 16  ;;  %v6997_v11 = vld [vmem:[#allocation12_spill] sm:$0xff]  ;;  %v6355_v63 = vpop.permute.xlu1 %3066 }
 0x182   : > { %v588_v39 = vsel %vm5099_vm12, %v580_v60, %v587_v6  ;;  %761 = vst [vmem:[#allocation2 + $0xb4] sm:$0xf] %v760_v31  ;;  %v764_v61 = vsel %vm5113_vm13, %v589_v28, %v763_v40  ;;  %v1166_v3 = vrot.slane %v1164_v4, 5  ;;  %v1180_v47 = vshll.u32 %v819_v15, 16 }
 0x183   : > { %762 = vst.msk [vmem:[#allocation2 + $0xb8] sm:$0xf] %vm244_vm0, %v588_v39  ;;  %765 = vst [vmem:[#allocation2 + $0xbc] sm:$0x1] %v764_v61  ;;  %v1172_v30 = vrot.slane %v1170_v20, 5  ;;  %v4296_v37 = vrot.slane %v2433_v29, 9  ;;  %3250 = vrot.lane.b32.xlu0 %v4430_v23, %s4820_s8  ;;  %v3501_v29 = vsel %vm3489_vm4, %v3468_v58, %v6119_v49  ;;  %v3371_v56 = vsel %vm3357_vm15, %v3329_v53, %v6211_v22 }
 0x184   : > { %v1176_v50 = vrot.slane %v1174_v52, 4  ;;  %v6998_v21 = vrot.slane %v6997_v11, 5  ;;  %v4273_v55 = vrot.slane %v1222_v8, 9  ;;  %v1375_v12 = vrot.slane %v6327_v26, 5  ;;  %v6384_v20 = vld [vmem:[#allocation2 + $0x74] sm:$0x1] }
 0x185   : > { %v1167_v16 = vor.u32 %v1166_v3, %v1163_v18  ;;  %v1182_v33 = vrot.slane %v1180_v47, 5  ;;  %v1378_v38 = vrot.slane %v819_v15, 5  ;;  %v6375_v15 = vld [vmem:[#allocation2 + $0x70] sm:$0xf]  ;;  %v3539_v4 = vsel %vm3522_vm5, %v3501_v29, %v6186_v9  ;;  %v6387_v49 = vld [vmem:[#allocation2 + $0x80] sm:$0x1] }
 0x186   : > { %v2531_v25 = vrot.slane %v6998_v21, 4  ;;  %v6999_v57 = vmov %v6998_v21  ;;  %v1177_v19 = vor.u32 %v1176_v50, %v1172_v30  ;;  %v6369_v40 = vsel %vm5072_vm7, %v4273_v55, %v1375_v12  ;;  %v6405_v50 = vpop.permute.xlu0 %3068 }
 0x187   : > { %v2530_v48 = vsel %vm5072_vm7, %v4296_v37, %v6999_v57  ;;  %v1377_v6 = vrot.slane %v1375_v12, 4  ;;  %v1168_v28 = vrot.slane %v1167_v16, 4  ;;  %v3404_v39 = vsel %vm3390_vm1, %v3371_v56, %v6173_v45  ;;  %v6413_v57 = vld [vmem:[#allocation2 + $0x58] sm:$0xf] }
 0x188   : > { %v2533_v60 = vsel %vm5072_vm7, %v2531_v25, %v2532_v44  ;;  %v1178_v31 = vrot.slane %v1177_v19, 4  ;;  %v3437_v55 = vsel %vm3423_vm2, %v3404_v39, %v6242_v13 }
 0x189   : > { %v4440_v18 = vcombine.low %v2530_v48, %v2533_v60  ;;  %v6380_v44 = vsel %vm5072_vm7, %v1377_v6, %v1378_v38  ;;  %v2022_v58 = vld [vmem:[#allocation2 + $0xb4] sm:$0xf]  ;;  %v1173_v53 = vsel %vm5092_vm11, %v1168_v28, %v1172_v30  ;;  %v6403_v30 = vpop.permute.xlu1 %3242  ;;  %v594_v38 = vshll.u32 %v330_v46, 16 }
 0x18a   : > { %v1415_v23 = vld [vmem:[#allocation2 + $0xb4] sm:$0xf]  ;;  %v6395_v61 = vld [vmem:[#allocation2 + $0xb8] sm:$0xf]  ;;  %v2357_v9 = vshrl.u32 %v2022_v58, 16  ;;  %v2360_v52 = vshll.u32 %v2022_v58, 16  ;;  %v1183_v47 = vsel %vm5092_vm11, %v1178_v31, %v1182_v33 }
 0x18b   : > { %4466 = vmatprep.mubr.msk.bf16.mxu0 %vm3308_vm14, %v4440_v18  ;;  %v6397_v3 = vld [vmem:[#allocation2 + $0xbc] sm:$0x1]  ;;  %v2370_v11 = vshrl.u32 %v6395_v61, 16  ;;  %v4416_v45 = vcombine.low %v2022_v58, %v6395_v61  ;;  %v2366_v21 = vshll.u32 %v6395_v61, 16  ;;  %v1416_v25 = vld [vmem:[#allocation2 + $0xb8] sm:$0xf]  ;;  %v4337_v6 = vcombine.low %v1173_v53, %v1183_v47 }
 0x18c   : > { %3771 = vmatmul.mubr.bf16.gmra.mxu0 %v3539_v4  ;;  %v2359_v12 = vrot.slane %v2357_v9, 4  ;;  %v2362_v16 = vrot.slane %v2360_v52, 5  ;;  %v2376_v33 = vshll.u32 %v6397_v3, 16  ;;  %v6415_v48 = vld [vmem:[#allocation2 + $0x54] sm:$0xf]  ;;  %v1772_v28 = vshrl.u32 %v1415_v23, 16 }
 0x18d   : > { %3174 = vrot.lane.b32.xlu1 %v4416_v45, %s4818_s15  ;;  %v2368_v19 = vrot.slane %v2366_v21, 5  ;;  %v2372_v60 = vrot.slane %v2370_v11, 4  ;;  %v1433_v18 = vld [vmem:[#allocation2 + $0xbc] sm:$0x1]  ;;  %v1775_v56 = vshll.u32 %v1415_v23, 16  ;;  %v1785_v31 = vshrl.u32 %v1416_v25, 16  ;;  %2744 = vrot.lane.b32.xlu0 %v4337_v6, %s4816_s12  ;;  %v6421_v53 = vpop.permute.xlu1 %2812 }
 0x18e   : > { %v2363_v29 = vor.u32 %v2362_v16, %v2359_v12  ;;  %v2378_v13 = vrot.slane %v2376_v33, 5  ;;  %v1833_v4 = vld [vmem:[#allocation2 + $0xb4] sm:$0xe]  ;;  %v1774_v39 = vrot.slane %v1772_v28, 4  ;;  %v4369_v9 = vcombine.low %v1415_v23, %v1416_v25  ;;  %v6423_v47 = vpop.permute.xlu0 %3244 }
 0x18f   : > { %v2373_v58 = vor.u32 %v2372_v60, %v2368_v19  ;;  %v1781_v52 = vshll.u32 %v1416_v25, 16  ;;  %v1777_v45 = vrot.slane %v1775_v56, 5  ;;  %v1787_v21 = vrot.slane %v1785_v31, 4  ;;  %v6434_v37 = vld [vmem:[#allocation2 + $0xb4] sm:$0xf] }
 0x190   : > { %v2364_v22 = vrot.slane %v2363_v29, 4  ;;  %v1791_v11 = vshll.u32 %v1433_v18, 16  ;;  %v4289_v33 = vrot.slane %v1833_v4, 9  ;;  %v1983_v8 = vrot.slane %v1416_v25, 5 }
 0x191   : > { %v2374_v12 = vrot.slane %v2373_v58, 4  ;;  %v1783_v16 = vrot.slane %v1781_v52, 5  ;;  %v1778_v6 = vor.u32 %v1777_v45, %v1774_v39  ;;  %v1986_v28 = vrot.slane %v1433_v18, 5  ;;  %2920 = vrot.lane.b32.xlu0 %v4369_v9, %s4817_s14  ;;  %v6440_v9 = vld [vmem:[#allocation2 + $0xb8] sm:$0xf] }
 0x192   : > { %v2369_v60 = vsel %vm5092_vm11, %v2364_v22, %v2368_v19  ;;  %v1793_v23 = vrot.slane %v1791_v11, 5  ;;  %v1984_v31 = vsel %vm5072_vm7, %v4289_v33, %v1983_v8  ;;  %v1985_v58 = vrot.slane %v1983_v8, 4 }
 0x193   : > { %v2379_v29 = vsel %vm5092_vm11, %v2374_v12, %v2378_v13  ;;  %v1788_v56 = vor.u32 %v1787_v21, %v1783_v16  ;;  %v1779_v25 = vrot.slane %v1778_v6, 4  ;;  %v591_v52 = vshrl.u32 %v330_v46, 16  ;;  %v6436_v22 = vpop.permute.xlu0 %2814  ;;  %v766_v46 = vld [vmem:[#allocation2 + $0xc0] sm:$0xf]  ;;  %v6447_v12 = vpop.permute.xlu1 %2988 }
 0x194   : > { %v4432_v4 = vcombine.low %v2369_v60, %v2379_v29  ;;  %v1987_v18 = vsel %vm5072_vm7, %v1985_v58, %v1986_v28  ;;  %v599_v13 = vshrl.u32 %v331_v2, 16  ;;  %v602_v39 = vshll.u32 %v331_v2, 16  ;;  %v820_v2 = vld [vmem:[#allocation2 + $0xbc] sm:$0x1] }
 0x195   : > { %v1789_v19 = vrot.slane %v1788_v56, 4  ;;  %v1784_v8 = vsel %vm5092_vm11, %v1779_v25, %v1783_v16  ;;  %v4401_v45 = vcombine.low %v1984_v31, %v1987_v18  ;;  %v593_v21 = vrot.slane %v591_v52, 7  ;;  %v770_v31 = vld [vmem:[#allocation2 + $0xc8] sm:$0x1] }
 0x196   : > { %3254 = vrot.lane.b32.xlu1 %v4432_v4, %s4820_s8  ;;  %v3470_v11 = vsel %vm3456_vm3, %v3437_v55, %v6192_v0  ;;  %v601_v60 = vrot.slane %v599_v13, 7  ;;  %v1185_v6 = vshrl.u32 %v6434_v37, 16  ;;  %v1188_v28 = vshll.u32 %v6434_v37, 16  ;;  %v2434_v0 = vld [vmem:[#allocation2 + $0x60] sm:$0xe] }
 0x197   : > { %v1794_v33 = vsel %vm5092_vm11, %v1789_v19, %v1793_v23  ;;  %3080 = vrot.lane.b32.xlu0 %v4401_v45, %s4819_s16  ;;  %v596_v16 = vor.u32 %v594_v38, %v593_v21  ;;  %v597_v56 = vrot.slane %v593_v21, 4  ;;  %v1194_v58 = vshll.u32 %v6440_v9, 16  ;;  %v6455_v55 = vpop.permute.xlu0 %2990  ;;  %v1223_v19 = vld [vmem:[#allocation2 + $0xb4] sm:$0xe] }
 0x198   : > { %v4385_v29 = vcombine.low %v1784_v8, %v1794_v33  ;;  %v604_v4 = vor.u32 %v602_v39, %v601_v60  ;;  %v606_v25 = vrot.slane %v601_v60, 4  ;;  %v1187_v23 = vrot.slane %v1185_v6, 4 }
 0x199   : > { %v1190_v52 = vrot.slane %v1188_v28, 5  ;;  %v7000_v18 = vcombine.low %v6369_v40, %v6380_v44  ;;  %v767_v38 = vsel %vm5086_vm10, %v596_v16, %v766_v46  ;;  %v1196_v13 = vrot.slane %v1194_v58, 5  ;;  %v4698_v44 = vld [vmem:[#allocation2 + $0x64] sm:$0xf]  ;;  %v6471_v28 = vpop.permute.xlu1 %3164 }
 0x19a   : > { %v1198_v8 = vshrl.u32 %v6440_v9, 16  ;;  %v1204_v45 = vshll.u32 %v820_v2, 16  ;;  %v605_v21 = vsel %vm5099_vm12, %v597_v56, %v604_v4  ;;  %768 = vst [vmem:[#allocation2 + $0xc0] sm:$0xf] %v767_v38  ;;  %v771_v39 = vsel %vm5113_vm13, %v606_v25, %v770_v31  ;;  %v6482_v4 = vld [vmem:[#allocation2 + $0xcc] sm:$0xf] }
 0x19b   : > { %2824 = vrot.lane.b32.xlu1 %v7000_v18, %s4815_s29  ;;  %v1191_v33 = vor.u32 %v1190_v52, %v1187_v23  ;;  %v4297_v60 = vrot.slane %v2434_v0, 9  ;;  %769 = vst.msk [vmem:[#allocation2 + $0xc4] sm:$0xf] %vm244_vm0, %v605_v21  ;;  %772 = vst [vmem:[#allocation2 + $0xc8] sm:$0x1] %v771_v39  ;;  %v3503_v34 = vsel %vm3489_vm4, %v3470_v11, %v6271_v32  ;;  %v2536_v46 = vrot.slane %v4698_v44, 5  ;;  %v6484_v25 = vpop.permute.xlu0 %3166 }
 0x19c   : > { %v1200_v40 = vrot.slane %v1198_v8, 4  ;;  %v4274_v6 = vrot.slane %v1223_v19, 9  ;;  %v1206_v16 = vrot.slane %v1204_v45, 5  ;;  %v1382_v56 = vrot.slane %v6440_v9, 5  ;;  %v6494_v19 = vld [vmem:[#allocation2 + $0xd0] sm:$0xf] }
 0x19d   : > { %v1192_v43 = vrot.slane %v1191_v33, 4  ;;  %v1385_v54 = vrot.slane %v820_v2, 5  ;;  %v2537_v58 = vsel %vm5072_vm7, %v4297_v60, %v2536_v46  ;;  %v2538_v0 = vrot.slane %v2536_v46, 4  ;;  %v6519_v60 = vpop.permute.xlu1 %2734 }
 0x19e   : > { %v1201_v31 = vor.u32 %v1200_v40, %v1196_v13  ;;  %v7001_v32 = vcombine.low %v6415_v48, %v6413_v57  ;;  %v6488_v2 = vsel %vm5072_vm7, %v4274_v6, %v1382_v56  ;;  %v3542_v23 = vsel %vm3522_vm5, %v3503_v34, %v6218_v24 }
 0x19f   : > { %3000 = vrot.lane.b32.xlu1 %v4385_v29, %s4821_s7  ;;  %v1384_v29 = vrot.slane %v1382_v56, 4  ;;  %v7002_v48 = vrot.slane %v6226_v42, 5  ;;  %v2408_v45 = vshll.u32 %v6482_v4, 16 }
 0x1a0   : > { %v3332_v11 = vsel %vm3308_vm14, %v7001_v32, %v6299_v27  ;;  %v1197_v27 = vsel %vm5092_vm11, %v1192_v43, %v1196_v13  ;;  %v1202_v57 = vrot.slane %v1201_v31, 4 }
 0x1a1   : > { %v3373_v52 = vsel %vm3357_vm15, %v3332_v11, %v6244_v59  ;;  %v2540_v18 = vsel %vm5072_vm7, %v2538_v0, %v7002_v48  ;;  %v6506_v24 = vsel %vm5072_vm7, %v1384_v29, %v1385_v54  ;;  %v2405_v59 = vshrl.u32 %v6482_v4, 16  ;;  %v2024_v21 = vld [vmem:[#allocation2 + $0xc0] sm:$0xf]  ;;  %v6540_v42 = vpop.permute.xlu1 %2910 }
 0x1a2   : > { %v3406_v38 = vsel %vm3390_vm1, %v3373_v52, %v6330_v7  ;;  %v4441_v8 = vcombine.low %v2537_v58, %v2540_v18  ;;  %v1207_v13 = vsel %vm5092_vm11, %v1202_v57, %v1206_v16  ;;  %v6514_v39 = vld [vmem:[#allocation2 + $0xc0] sm:$0xf]  ;;  %v6521_v34 = vld [vmem:[#allocation2 + $0xc4] sm:$0xf]  ;;  %v2381_v40 = vshrl.u32 %v2024_v21, 16  ;;  %v6534_v58 = vpop.permute.xlu0 %2736 }
 0x1a3   : > { %v3439_v33 = vsel %vm3423_vm2, %v3406_v38, %v6273_v62  ;;  %v2384_v44 = vshll.u32 %v2024_v21, 16  ;;  %v6523_v46 = vld [vmem:[#allocation2 + $0xc8] sm:$0x1]  ;;  %v4338_v6 = vcombine.low %v1197_v27, %v1207_v13  ;;  %v2394_v16 = vshrl.u32 %v6521_v34, 16  ;;  %v1418_v31 = vld [vmem:[#allocation2 + $0xc4] sm:$0xf] }
 0x1a4   : > { %4467 = vmatprep.mubr.msk.bf16.mxu0 %vm3308_vm14, %v4441_v8  ;;  %v6528_v43 = vsel %vm3456_vm3, %v3439_v33, %v6355_v63  ;;  %v4417_v56 = vcombine.low %v2024_v21, %v6521_v34  ;;  %v2390_v62 = vshll.u32 %v6521_v34, 16  ;;  %v2400_v54 = vshll.u32 %v6523_v46, 16  ;;  %v1434_v63 = vld [vmem:[#allocation2 + $0xc8] sm:$0x1]  ;;  %v1834_v18 = vld [vmem:[#allocation2 + $0xc0] sm:$0xe] }
 0x1a5   : > { %3779 = vmatmul.mubr.bf16.gmra.mxu0 %v3542_v23  ;;  %v2383_v0 = vrot.slane %v2381_v40, 4  ;;  %v2386_v32 = vrot.slane %v2384_v44, 5  ;;  %v1796_v11 = vshrl.u32 %v6514_v39, 16  ;;  %v1799_v29 = vshll.u32 %v6514_v39, 16 }
 0x1a6   : > { %3176 = vrot.lane.b32.xlu1 %v4417_v56, %s4818_s15  ;;  %v2392_v52 = vrot.slane %v2390_v62, 5  ;;  %v2396_v27 = vrot.slane %v2394_v16, 4  ;;  %v2402_v57 = vrot.slane %v2400_v54, 5  ;;  %v1809_v48 = vshrl.u32 %v1418_v31, 16 }
 0x1a7   : > { %v2387_v38 = vor.u32 %v2386_v32, %v2383_v0  ;;  %v1798_v8 = vrot.slane %v1796_v11, 4  ;;  %v1801_v23 = vrot.slane %v1799_v29, 5  ;;  %v4370_v21 = vcombine.low %v6514_v39, %v1418_v31  ;;  %v6543_v32 = vpop.permute.xlu0 %2816 }
 0x1a8   : > { %v2397_v13 = vor.u32 %v2396_v27, %v2392_v52  ;;  %v1805_v33 = vshll.u32 %v1418_v31, 16  ;;  %v1811_v40 = vrot.slane %v1809_v48, 4  ;;  %v1815_v44 = vshll.u32 %v1434_v63, 16 }
 0x1a9   : > { %v2388_v7 = vrot.slane %v2387_v38, 4  ;;  %v1802_v14 = vor.u32 %v1801_v23, %v1798_v8  ;;  %v4290_v26 = vrot.slane %v1834_v18, 9  ;;  %v1990_v56 = vrot.slane %v1418_v31, 5  ;;  %v2435_v8 = vld [vmem:[#allocation2 + $0x6c] sm:$0xe] }
 0x1aa   : > { %v2398_v62 = vrot.slane %v2397_v13, 4  ;;  %2746 = vrot.lane.b32.xlu1 %v4338_v6, %s4816_s12  ;;  %v1807_v16 = vrot.slane %v1805_v33, 5  ;;  %v1817_v54 = vrot.slane %v1815_v44, 5  ;;  %v1993_v0 = vrot.slane %v1434_v63, 5  ;;  %v6551_v6 = vld [vmem:[#allocation2 + $0xd4] sm:$0x1] }
 0x1ab   : > { %v2393_v39 = vsel %vm5092_vm11, %v2388_v7, %v2392_v52  ;;  %v1803_v11 = vrot.slane %v1802_v14, 4  ;;  %v1991_v29 = vsel %vm5072_vm7, %v4290_v26, %v1990_v56  ;;  %v1992_v27 = vrot.slane %v1990_v56, 4  ;;  %v4699_v7 = vld [vmem:[#allocation2 + $0x60] sm:$0xf]  ;;  %v4700_v52 = vld [vmem:[#allocation2 + $0x64] sm:$0xf] }
 0x1ac   : > { %v2403_v48 = vsel %vm5092_vm11, %v2398_v62, %v2402_v57  ;;  %v1812_v31 = vor.u32 %v1811_v40, %v1807_v16  ;;  %v2407_v18 = vrot.slane %v2405_v59, 4  ;;  %v2410_v38 = vrot.slane %v2408_v45, 5  ;;  %v6559_v45 = vpop.permute.xlu1 %3070  ;;  %s4751_s12 = scalar_lea.vmem %s4750_s28, 8192 }
 0x1ad   : > { %v4433_v63 = vcombine.low %v2393_v39, %v2403_v48  ;;  %v1808_v23 = vsel %vm5092_vm11, %v1803_v11, %v1807_v16  ;;  %v1994_v14 = vsel %vm5072_vm7, %v1992_v27, %v1993_v0  ;;  %v4315_v26 = vcombine.low %v4699_v7, %v4700_v52  ;;  %v2436_v27 = vld [vmem:[#allocation2 + $0x78] sm:$0xe]  ;;  %v6571_v48 = vpop.permute.xlu0 %2912 }
 0x1ae   : > { %2922 = vrot.lane.b32.xlu1 %v4370_v21, %s4817_s14  ;;  %v1813_v13 = vrot.slane %v1812_v31, 4  ;;  %v4402_v57 = vcombine.low %v1991_v29, %v1994_v14  ;;  %v2411_v33 = vor.u32 %v2410_v38, %v2407_v18  ;;  %v2414_v59 = vshll.u32 %v6494_v19, 16  ;;  %v4701_v31 = vld [vmem:[#allocation2 + $0x88] sm:$0xf] }
 0x1af   : > { %3256 = vrot.lane.b32.xlu0 %v4433_v63, %s4820_s8  ;;  %v3335_v40 = vsel %vm3308_vm14, %v4315_v26, %v6332_v51  ;;  %v7003_v44 = vshrl.u32 %v6494_v19, 16  ;;  %v2424_v62 = vshll.u32 %v6551_v6, 16  ;;  %v4298_v16 = vrot.slane %v2435_v8, 9  ;;  %v6583_v8 = vld [vmem:[%s6944_s3] sm:$0xff]  }
 0x1b0   : > { %v1818_v21 = vsel %vm5092_vm11, %v1813_v13, %v1817_v54  ;;  %v2412_v0 = vrot.slane %v2411_v33, 4  ;;  %v2416_v39 = vrot.slane %v2414_v59, 5  ;;  %v7004_v11 = vrot.slane %v6375_v15, 5  ;;  %v2437_v26 = vld [vmem:[#allocation2 + $0x84] sm:$0xe]  ;;  %4519 = vmatprep.subr.bf16.mxu1 %v6583_v8 }
 0x1b1   : > { %v2420_v56 = vrot.slane %v7003_v44, 4  ;;  %v2557_v18 = vrot.slane %v4701_v31, 5  ;;  %v4386_v51 = vcombine.low %v1808_v23, %v1818_v21  ;;  %v3505_v54 = vsel %vm3489_vm4, %v6528_v43, %v6301_v17  ;;  %v4702_v33 = vld [vmem:[#allocation2 + $0x7c] sm:$0xf]  ;;  %v6614_v31 = vpop.permute.xlu0 %2992 }
 0x1b2   : > { %v2545_v29 = vrot.slane %v7004_v11, 4  ;;  %v7005_v38 = vmov %v7004_v11  ;;  %3082 = vrot.lane.b32.xlu1 %v4402_v57, %s4819_s16  ;;  %v2426_v7 = vrot.slane %v2424_v62, 5  ;;  %v7006_v23 = vrot.slane %v6384_v20, 5  ;;  %v4704_v62 = vld [vmem:[#allocation2 + $0x6c] sm:$0xf] }
 0x1b3   : > { %v2544_v63 = vsel %vm5072_vm7, %v4298_v16, %v7005_v38  ;;  %v2421_v14 = vor.u32 %v2420_v56, %v2416_v39  ;;  %v3545_v52 = vsel %vm3522_vm5, %v3505_v54, %v6403_v30  ;;  %v7007_v17 = vcombine.low %v6488_v2, %v6506_v24  ;;  %v4703_v56 = vld [vmem:[#allocation2 + $0x70] sm:$0xf]  ;;  %v6603_v24 = vpop.permute.xlu1 %3246  ;;  %v4706_v11 = vld [vmem:[#allocation2 + $0x94] sm:$0xf] }
 0x1b4   : > { %v2547_v15 = vsel %vm5072_vm7, %v2545_v29, %v7006_v23  ;;  %v3375_v13 = vsel %vm3357_vm15, %v3335_v40, %v6421_v53  ;;  %v4299_v57 = vrot.slane %v2436_v27, 9  ;;  %v2550_v59 = vrot.slane %v4702_v33, 5  ;;  %v4707_v23 = vld [vmem:[#allocation2 + $0x78] sm:$0xf] }
 0x1b5   : > { %2826 = vrot.lane.b32.xlu0 %v7007_v17, %s4815_s29  ;;  %v4442_v43 = vcombine.low %v2544_v63, %v2547_v15  ;;  %v2417_v20 = vsel %vm5092_vm11, %v2412_v0, %v2416_v39  ;;  %v2422_v44 = vrot.slane %v2421_v14, 4  ;;  %v3408_v30 = vsel %vm3390_vm1, %v3375_v13, %v6357_v41  ;;  %v4705_v0 = vld [vmem:[#allocation2 + $0x8c] sm:$0x1]  ;;  %v2438_v14 = vld [vmem:[#allocation2 + $0x90] sm:$0xe] }
 0x1b6   : > { %v4316_v2 = vcombine.low %v4704_v62, %v4703_v56  ;;  %v3441_v53 = vsel %vm3423_vm2, %v3408_v30, %v6447_v12  ;;  %v2551_v40 = vsel %vm5072_vm7, %v4299_v57, %v2550_v59  ;;  %v2552_v16 = vrot.slane %v2550_v59, 4  ;;  %v4708_v15 = vld [vmem:[#allocation2 + $0x7c] sm:$0xf]  ;;  %v2440_v13 = vld [vmem:[#allocation2 + $0xa8] sm:$0xe]  ;;  %v3073_v30 = vpop.permute.xlu0 %3072 }
 0x1b7   : > { %4468 = vmatprep.mubr.msk.bf16.mxu0 %vm3308_vm14, %v4442_v43  ;;  %v4300_v21 = vrot.slane %v2437_v26, 9  ;;  %v2560_v39 = vrot.slane %v4705_v0, 5  ;;  %v2564_v29 = vrot.slane %v4706_v11, 5  ;;  %v2427_v41 = vsel %vm5092_vm11, %v2422_v44, %v2426_v7  ;;  %v2441_v56 = vld [vmem:[#allocation2 + $0xb4] sm:$0xe] }
 0x1b8   : > { %3787 = vmatmul.mubr.bf16.gmra.mxu0 %v3545_v52  ;;  %v3338_v27 = vsel %vm3308_vm14, %v4316_v2, %v6519_v60  ;;  %v4418_v12 = vcombine.low %v6482_v4, %v6494_v19  ;;  %v4434_v38 = vcombine.low %v2417_v20, %v2427_v41  ;;  %v3474_v63 = vsel %vm3456_vm3, %v3441_v53, %v6405_v50  ;;  %v4709_v52 = vld [vmem:[#allocation2 + $0x98] sm:$0x1]  ;;  %v2442_v0 = vld [vmem:[#allocation2 + $0xc0] sm:$0xe] }
 0x1b9   : > { %3002 = vrot.lane.b32.xlu0 %v4386_v51, %s4821_s7  ;;  %v7008_v54 = vrot.slane %v6387_v49, 5  ;;  %v3507_v60 = vsel %vm3489_vm4, %v3474_v63, %v6471_v28  ;;  %v3377_v51 = vsel %vm3357_vm15, %v3338_v27, %v6436_v22  ;;  %v4317_v4 = vcombine.low %v4707_v23, %v4708_v15  ;;  %v6635_v28 = vpop.permute.xlu1 %2740 }
 0x1ba   : > { %v2567_v26 = vrot.slane %v4709_v52, 5  ;;  %3258 = vrot.lane.b32.xlu1 %v4434_v38, %s4820_s8  ;;  %v3410_v49 = vsel %vm3390_vm1, %v3377_v51, %v6540_v42  ;;  %v2558_v50 = vsel %vm5072_vm7, %v4300_v21, %v2557_v18  ;;  %v2559_v17 = vrot.slane %v2557_v18, 4 }
 0x1bb   : > { %v2554_v36 = vsel %vm5072_vm7, %v2552_v16, %v7008_v54  ;;  %v4301_v43 = vrot.slane %v2438_v14, 9  ;;  %v2566_v22 = vrot.slane %v2564_v29, 4  ;;  %v2571_v57 = vrot.slane %v6263_v10, 5  ;;  %v2443_v54 = vld [vmem:[#allocation2 + $0xcc] sm:$0xe] }
 0x1bc   : > { %v4443_v7 = vcombine.low %v2551_v40, %v2554_v36  ;;  %v2585_v33 = vrot.slane %v6395_v61, 5  ;;  %v3548_v42 = vsel %vm3522_vm5, %v3507_v60, %v6423_v47  ;;  %v2561_v59 = vsel %vm5072_vm7, %v2559_v17, %v2560_v39  ;;  %v2439_v61 = vld [vmem:[#allocation2 + $0x9c] sm:$0xe]  ;;  %v4710_v40 = vld [vmem:[#allocation2 + $0xac] sm:$0xf]  ;;  %v3169_v36 = vpop.permute.xlu0 %3168 }
 0x1bd   : > { %3178 = vrot.lane.b32.xlu0 %v4418_v12, %s4818_s15  ;;  %v3443_v18 = vsel %vm3423_vm2, %v3410_v49, %v6455_v55  ;;  %v3341_v20 = vsel %vm3308_vm14, %v4317_v4, %v6534_v58  ;;  %v4444_v44 = vcombine.low %v2558_v50, %v2561_v59  ;;  %v2565_v10 = vsel %vm5072_vm7, %v4301_v43, %v2564_v29  ;;  %s4258_s15 = sshll.u32 %s4952_s23, 8 }
 0x1be   : > { %4469 = vmatprep.mubr.msk.bf16.mxu0 %vm3308_vm14, %v4443_v7  ;;  %v2574_v62 = vrot.slane %v6292_v35, 5  ;;  %v3476_v47 = vsel %vm3456_vm3, %v3443_v18, %v6559_v45  ;;  %v2568_v2 = vsel %vm5072_vm7, %v2566_v22, %v2567_v26  ;;  %v4303_v53 = vrot.slane %v2440_v13, 9  ;;  %v2821_v35 = vpop.permute.xlu1 %2820  ;;  %s6826_s7 = scalar_lea.vmem [#allocation6], %s4258_s15 }
 0x1bf   : > { %v2588_v55 = vrot.slane %v6397_v3, 5  ;;  %v4445_v58 = vcombine.low %v2565_v10, %v2568_v2  ;;  %v2578_v16 = vrot.slane %v4710_v40, 5  ;;  %v2581_v21 = vrot.slane %v6195_v5, 5  ;;  %v4711_v10 = vld [vmem:[#allocation2 + $0x90] sm:$0xf]  ;;  %s4177_s25 = sshll.u32 %s6826_s7, 4  ;;  %s6895_s25 = int_to_ptr.vmem [resolvable:$true] %s4177_s25 }
 0x1c0   : > { %3795 = vmatmul.mubr.bf16.gmra.mxu0 %v3548_v42  ;;  %v3379_v39 = vsel %vm3357_vm15, %v3341_v20, %v6543_v32  ;;  %v4302_v45 = vrot.slane %v2439_v61, 9  ;;  %v2573_v11 = vrot.slane %v2571_v57, 4  ;;  %v4304_v29 = vrot.slane %v2441_v56, 9  ;;  %v4712_v61 = vld [vmem:[#allocation2 + $0x94] sm:$0xf]  ;;  %s4745_s11 = scalar_lea.vmem %s6895_s25, 4096  ;;  %p4752_p5 = scmp.lt.s32.totalorder %s6895_s25, %s4750_s28 }
 0x1c1   : > { %4470 = vmatprep.mubr.msk.bf16.mxu0 %vm3308_vm14, %v4444_v44  ;;  %v3509_v41 = vsel %vm3489_vm4, %v3476_v47, %v6484_v25  ;;  %v2579_v3 = vsel %vm5072_vm7, %v4303_v53, %v2578_v16  ;;  %v2580_v27 = vrot.slane %v2578_v16, 4  ;;  %v2587_v12 = vrot.slane %v2585_v33, 4  ;;  %p4746_p11 = scmp.ne.s32.totalorder %s6895_s25, %s4745_s11  ;;  %p4753_p7 = scmp.lt.s32.totalorder %s4751_s12, %s4745_s11 }
 0x1c2   : > { %v2572_v5 = vsel %vm5072_vm7, %v4302_v45, %v2571_v57  ;;  %v2575_v32 = vsel %vm5072_vm7, %v2573_v11, %v2574_v62  ;;  %v2586_v38 = vsel %vm5072_vm7, %v4304_v29, %v2585_v33  ;;  %v4305_v63 = vrot.slane %v2442_v0, 9  ;;  %v2917_v17 = vpop.permute.xlu1 %2916 }
 0x1c3   : > { %v2582_v25 = vsel %vm5072_vm7, %v2580_v27, %v2581_v21  ;;  %v4446_v14 = vcombine.low %v2572_v5, %v2575_v32  ;;  %v2589_v60 = vsel %vm5072_vm7, %v2587_v12, %v2588_v55  ;;  %v2592_v7 = vrot.slane %v6521_v34, 5  ;;  %p4747_p13 = pnand %p4746_p11, %p7011_p12  ;;  %p4754_p8 = por %p4753_p7, %p4752_p5 }
 0x1c4   : > { %v3551_v51 = vsel %vm3522_vm5, %v3509_v41, %v6603_v24  ;;  %v4447_v23 = vcombine.low %v2579_v3, %v2582_v25  ;;  %v4448_v15 = vcombine.low %v2586_v38, %v2589_v60  ;;  %v2595_v4 = vrot.slane %v6523_v46, 5 }
 0x1c5   : > { %v6680_v52 = vsel %vm5072_vm7, %v4305_v63, %v2592_v7  ;;  %v2594_v26 = vrot.slane %v2592_v7, 4  ;;  %v4322_v49 = vcombine.low %v6434_v37, %v6440_v9  ;;  %v4306_v50 = vrot.slane %v2443_v54, 9  ;;  %p4748_p4 = pneg %p4747_p13 }
 0x1c6   : > { %4473 = vmatprep.mubr.msk.bf16.mxu1 %vm3308_vm14, %v4447_v23  ;;  %v2599_v34 = vrot.slane %v6494_v19, 5  ;;  %v2602_v24 = vrot.slane %v6551_v6, 5  ;;  %v3412_v43 = vsel %vm3390_vm1, %v3379_v39, %v6571_v48  ;;  %v2997_v18 = vpop.permute.xlu1 %2996  ;;  %v4713_v39 = vld [vmem:[#allocation2 + $0x84] sm:$0xf] }
 0x1c7   : > { %v6689_v46 = vsel %vm5072_vm7, %v2594_v26, %v2595_v4  ;;  %v3445_v6 = vsel %vm3423_vm2, %v3412_v43, %v6614_v31  ;;  %v3249_v57 = vpop.permute.xlu0 %3248  ;;  %v4715_v4 = vld [vmem:[#allocation2 + $0x9c] sm:$0xf]  ;;  %v4716_v26 = vld [vmem:[#allocation2 + $0xa0] sm:$0xf]  ;;  %p4755_p10 = pnand %p4754_p8, %p4748_p4 }
 0x1c8   : > { %3803 = vmatmul.mubr.bf16.gmra.mxu0 %v3551_v51  ;;  %v4449_v22 = vcombine.low %v6680_v52, %v6689_v46  ;;  %v6698_v13 = vsel %vm5072_vm7, %v4306_v50, %v2599_v34  ;;  %v2601_v19 = vrot.slane %v2599_v34, 4  ;;  %v3478_v33 = vsel %vm3456_vm3, %v3445_v6, %v3073_v30 }
 0x1c9   : > { %4471 = vmatprep.mubr.msk.bf16.mxu0 %vm3308_vm14, %v4445_v58  ;;  %v3511_v48 = vsel %vm3489_vm4, %v3478_v33, %v3169_v36  ;;  %v4319_v30 = vcombine.low %v4711_v10, %v4712_v61  ;;  %v4320_v50 = vcombine.low %v4715_v4, %v4716_v26  ;;  %v7009_v61 = vld [vmem:[#allocation9_spill] sm:$0xff] }
 0x1ca   : > { %v6705_v42 = vsel %vm5072_vm7, %v2601_v19, %v2602_v24  ;;  %v3554_v20 = vsel %vm3522_vm5, %v3511_v48, %v3249_v57  ;;  %v3077_v44 = vpop.permute.xlu1 %3076 }
 0x1cb   : > { %v4450_v59 = vcombine.low %v6698_v13, %v6705_v42  ;;  %v3347_v1 = vsel %vm3308_vm14, %v4319_v30, %v6635_v28  ;;  %v7010_v30 = vld [vmem:[#allocation13_spill] sm:$0xff] }
 0x1cc   : > { %v3383_v62 = vsel %vm3357_vm15, %v3347_v1, %v2821_v35  ;;  %v4714_v35 = vld [vmem:[#allocation2 + $0x88] sm:$0xf] }
 0x1cd   : > { %v3416_v2 = vsel %vm3390_vm1, %v3383_v62, %v2917_v17  ;;  %v4318_v45 = vcombine.low %v4713_v39, %v4714_v35 }
 0x1ce   : > { %v3449_v53 = vsel %vm3423_vm2, %v3416_v2, %v2997_v18 }
 0x1cf   : > { %v2739_v31 = vpop.permute.xlu0 %2738  ;;  %v3482_v55 = vsel %vm3456_vm3, %v3449_v53, %v3077_v44 }
 0x1d0   : > { %3811 = vmatmul.mubr.bf16.gmra.mxu0 %v3554_v20  ;;  %v3344_v41 = vsel %vm3308_vm14, %v4318_v45, %v2739_v31 }
 0x1d1   : > { %4472 = vmatprep.mubr.msk.bf16.mxu0 %vm3308_vm14, %v4446_v14 }
 0x1d3   : > { %v3173_v56 = vpop.permute.xlu1 %3172  ;;  %v2819_v47 = vpop.permute.xlu0 %2818 }
 0x1d4   : > { %v3515_v58 = vsel %vm3489_vm4, %v3482_v55, %v3173_v56  ;;  %v3381_v27 = vsel %vm3357_vm15, %v3344_v41, %v2819_v47  ;;  %v4321_v56 = vcombine.low %v7010_v30, %v7009_v61 }
 0x1d8   : > { %v2915_v21 = vpop.permute.xlu0 %2914 }
 0x1d9   : > { %v3414_v38 = vsel %vm3390_vm1, %v3381_v27, %v2915_v21 }
 0x1dd   : > { %v3253_v40 = vpop.permute.xlu1 %3252 }
 0x1de   : > { %v3560_v16 = vsel %vm3522_vm5, %v3515_v58, %v3253_v40 }
 0x1df   : > { %3827 = vmatmul.mubr.bf16.vlgmr.msra.gmra.mxu1 %v3560_v16 }
 0x1e0   : > { %4474 = vmatprep.mubr.msk.bf16.mxu1 %vm3308_vm14, %v4448_v15  ;;  %4520 = vmatpush3.bf16.msra.mxu1 %v6583_v8 }
 0x1e1   : > { %v2743_v28 = vpop.permute.xlu1 %2742 }
 0x1e2   : > { %v3350_v43 = vsel %vm3308_vm14, %v4320_v50, %v2743_v28 }
 0x1e5   : > { %v2995_v0 = vpop.permute.xlu0 %2994  ;;  %v2823_v11 = vpop.permute.xlu1 %2822 }
 0x1e6   : > { %v3447_v63 = vsel %vm3423_vm2, %v3414_v38, %v2995_v0  ;;  %v3385_v19 = vsel %vm3357_vm15, %v3350_v43, %v2823_v11  ;;  %v6758_v11 = vld [vmem:[%s6943_s2] ss:$0 sm:$0xff] }
 0x1e9   : > { %v3075_v29 = vpop.permute.xlu0 %3074  ;;  %v2919_v3 = vpop.permute.xlu1 %2918 }
 0x1ea   : > { %v3480_v54 = vsel %vm3456_vm3, %v3447_v63, %v3075_v29  ;;  %v3418_v6 = vsel %vm3390_vm1, %v3385_v19, %v2919_v3 }
 0x1ed   : > { %v3171_v12 = vpop.permute.xlu0 %3170  ;;  %v2999_v36 = vpop.permute.xlu1 %2998 }
 0x1ee   : > { %v3732_v5 = vpop.f32.mrf.mxu0  ;;  %v3513_v25 = vsel %vm3489_vm4, %v3480_v54, %v3171_v12  ;;  %v3451_v57 = vsel %vm3423_vm2, %v3418_v6, %v2999_v36 }
 0x1ef   : > { %v3733_v9 = vadd.f32 %v6758_v11, %v3732_v5 }
 0x1f0   : > { %v3734_v32 = vpop.f32.mrf.mxu0 }
 0x1f1   : > { %v3079_v23 = vpop.permute.xlu1 %3078  ;;  %v3859_v42 = vmax.f32 %v3733_v9, 0.0 }
 0x1f2   : > { %v3735_v8 = vpop.f32.mrf.mxu0  ;;  %v3484_v33 = vsel %vm3456_vm3, %v3451_v57, %v3079_v23 }
 0x1f3   : > { %v3736_v41 = vadd.f32 %v6758_v11, %v3735_v8 }
 0x1f4   : > { %v3737_v60 = vpop.f32.mrf.mxu0 }
 0x1f5   : > { %v3251_v14 = vpop.permute.xlu0 %3250  ;;  %v3860_v32 = vmax.f32 %v3736_v41, 0.0 }
 0x1f6   : > { %v3557_v7 = vsel %vm3522_vm5, %v3513_v25, %v3251_v14 }
 0x1f7   : > { %3819 = vmatmul.mubr.bf16.gmra.mxu0 %v3557_v7  ;;  %v3891_v25 = vpack.c.bf16 %v3860_v32, %v3859_v42 }
 0x1fb   : > { %v6729_v51 = vpop.f32.mrf.mxu0 }
 0x1fc   : > { %v3741_v7 = vadd.f32 %v6758_v11, %v6729_v51 }
 0x1fd   : > { %v3742_v15 = vpop.f32.mrf.mxu0 }
 0x1fe   : > { %v3861_v50 = vmax.f32 %v3741_v7, 0.0 }
 0x1ff   : > { %v3743_v17 = vpop.f32.mrf.mxu0  ;;  %v3175_v24 = vpop.permute.xlu1 %3174 }
 0x200   : > { %v3517_v48 = vsel %vm3489_vm4, %v3484_v33, %v3175_v24  ;;  %v2745_v10 = vpop.permute.xlu0 %2744  ;;  %v3744_v8 = vadd.f32 %v6758_v11, %v3743_v17 }
 0x201   : > { %v3745_v34 = vpop.f32.mrf.mxu0  ;;  %v3353_v2 = vsel %vm3308_vm14, %v4321_v56, %v2745_v10 }
 0x202   : > { %v3862_v4 = vmax.f32 %v3744_v8, 0.0 }
 0x204   : > { %v2921_v55 = vpop.permute.xlu0 %2920  ;;  %v3892_v34 = vpack.c.bf16 %v3862_v4, %v3861_v50 }
 0x208   : > { %v3255_v18 = vpop.permute.xlu1 %3254 }
 0x209   : > { %v3563_v20 = vsel %vm3522_vm5, %v3517_v48, %v3255_v18 }
 0x20a   : > { %3835 = vmatmul.mubr.bf16.gmra.mxu1 %v3563_v20 }
 0x20b   : > { %4475 = vmatprep.mubr.msk.bf16.mxu1 %vm3308_vm14, %v4449_v22  ;;  %v3081_v22 = vpop.permute.xlu0 %3080 }
 0x20d   : > { %v2825_v44 = vpop.permute.xlu1 %2824 }
 0x20e   : > { %v3748_v31 = vpop.f32.mrf.mxu0  ;;  %v3387_v58 = vsel %vm3357_vm15, %v3353_v2, %v2825_v44 }
 0x20f   : > { %v3420_v52 = vsel %vm3390_vm1, %v3387_v58, %v2921_v55  ;;  %v3749_v15 = vadd.f32 %v6758_v11, %v3748_v31 }
 0x210   : > { %v3750_v1 = vpop.f32.mrf.mxu0 }
 0x211   : > { %v3001_v62 = vpop.permute.xlu1 %3000  ;;  %v3863_v17 = vmax.f32 %v3749_v15, 0.0 }
 0x212   : > { %v3751_v47 = vpop.f32.mrf.mxu0  ;;  %v3453_v46 = vsel %vm3423_vm2, %v3420_v52, %v3001_v62 }
 0x213   : > { %v3486_v21 = vsel %vm3456_vm3, %v3453_v46, %v3081_v22  ;;  %v3752_v14 = vadd.f32 %v6758_v11, %v3751_v47 }
 0x214   : > { %v3753_v53 = vpop.f32.mrf.mxu0 }
 0x215   : > { %v3864_v26 = vmax.f32 %v3752_v14, 0.0 }
 0x217   : > { %v3893_v43 = vpack.c.bf16 %v3864_v26, %v3863_v17 }
 0x218   : > { %v3177_v40 = vpop.permute.xlu1 %3176 }
 0x219   : > { %v3519_v28 = vsel %vm3489_vm4, %v3486_v21, %v3177_v40 }
 0x21c   : > { %v2747_v16 = vpop.permute.xlu1 %2746 }
 0x21d   : > { %v3356_v45 = vsel %vm3308_vm14, %v4322_v49, %v2747_v16 }
 0x220   : > { %v2923_v0 = vpop.permute.xlu1 %2922 }
 0x221   : > { %v3257_v39 = vpop.permute.xlu0 %3256 }
 0x222   : > { %v3566_v35 = vsel %vm3522_vm5, %v3519_v28, %v3257_v39 }
 0x223   : > { %3843 = vmatmul.mubr.bf16.gmra.mxu1 %v3566_v35 }
 0x224   : > { %4476 = vmatprep.mubr.msk.bf16.mxu1 %vm3308_vm14, %v4450_v59  ;;  %v3083_v27 = vpop.permute.xlu1 %3082 }
 0x227   : > { %v2827_v29 = vpop.permute.xlu0 %2826  ;;  %v3756_v49 = vpop.f32.mrf.mxu0 }
 0x228   : > { %v3389_v3 = vsel %vm3357_vm15, %v3356_v45, %v2827_v29  ;;  %v3757_v19 = vadd.f32 %v6758_v11, %v3756_v49 }
 0x229   : > { %v3422_v37 = vsel %vm3390_vm1, %v3389_v3, %v2923_v0  ;;  %v3758_v38 = vpop.f32.mrf.mxu0 }
 0x22a   : > { %v3865_v6 = vmax.f32 %v3757_v19, 0.0 }
 0x22b   : > { %v3003_v12 = vpop.permute.xlu0 %3002  ;;  %v3759_v59 = vpop.f32.mrf.mxu0 }
 0x22c   : > { %v3455_v63 = vsel %vm3423_vm2, %v3422_v37, %v3003_v12  ;;  %v3259_v54 = vpop.permute.xlu1 %3258  ;;  %v3760_v24 = vadd.f32 %v6758_v11, %v3759_v59 }
 0x22d   : > { %v3488_v13 = vsel %vm3456_vm3, %v3455_v63, %v3083_v27  ;;  %v3761_v60 = vpop.f32.mrf.mxu0 }
 0x22e   : > { %v3866_v51 = vmax.f32 %v3760_v24, 0.0 }
 0x22f   : > { %v3179_v36 = vpop.permute.xlu0 %3178 }
 0x230   : > { %v3521_v5 = vsel %vm3489_vm4, %v3488_v13, %v3179_v36  ;;  %v3894_v57 = vpack.c.bf16 %v3866_v51, %v3865_v6 }
 0x231   : > { %v3569_v23 = vsel %vm3522_vm5, %v3521_v5, %v3259_v54 }
 0x232   : > { %3851 = vmatmul.mubr.bf16.gmra.mxu1 %v3569_v23 }
 0x233   : > { %4521 = vmatprep.mubr.msk.bf16.mxu1 %vm3308_vm14, %v3891_v25 }
 0x23a   : > { %4522 = vmatmul.mubr.msk.bf16.vlgmr.msra.gmra.mxu1 %vm3308_vm14, %v3892_v34 }
 0x23b   : > { %4525 = vmatprep.mubr.msk.bf16.mxu1 %vm3308_vm14, %v3893_v43 }
 0x23d   : > { %v3764_v33 = vpop.f32.mrf.mxu0 }
 0x23e   : > { %v3765_v18 = vadd.f32 %v6758_v11, %v3764_v33 }
 0x23f   : > { %v3766_v48 = vpop.f32.mrf.mxu0 }
 0x240   : > { %v3867_v10 = vmax.f32 %v3765_v18, 0.0 }
 0x241   : > { %v3767_v20 = vpop.f32.mrf.mxu0 }
 0x242   : > { %4526 = vmatmul.mubr.msk.bf16.gmra.mxu1 %vm3308_vm14, %v3894_v57  ;;  %v3768_v44 = vadd.f32 %v6758_v11, %v3767_v20 }
 0x243   : > { %v3769_v31 = vpop.f32.mrf.mxu0 }
 0x244   : > { %v3868_v61 = vmax.f32 %v3768_v44, 0.0 }
 0x246   : > { %v3895_v30 = vpack.c.bf16 %v3868_v61, %v3867_v10 }
 0x248   : > { %4529 = vmatprep.mubr.msk.bf16.mxu1 %vm3308_vm14, %v3895_v30 }
 0x24c   : > { %v3772_v56 = vpop.f32.mrf.mxu0 }
 0x24d   : > { %v3773_v62 = vadd.f32 %v6758_v11, %v3772_v56 }
 0x24e   : > { %v3774_v1 = vpop.f32.mrf.mxu0 }
 0x24f   : > { %v3869_v55 = vmax.f32 %v3773_v62, 0.0 }
 0x250   : > { %v3775_v47 = vpop.f32.mrf.mxu0 }
 0x251   : > { %v3776_v2 = vadd.f32 %v6758_v11, %v3775_v47 }
 0x252   : > { %v3777_v53 = vpop.f32.mrf.mxu0 }
 0x253   : > { %v3870_v58 = vmax.f32 %v3776_v2, 0.0 }
 0x255   : > { %v3896_v40 = vpack.c.bf16 %v3870_v58, %v3869_v55 }
 0x257   : > { %4530 = vmatmul.mubr.msk.bf16.gmra.mxu1 %vm3308_vm14, %v3896_v40 }
 0x265   : > { %v3780_v52 = vpop.f32.mrf.mxu0 }
 0x266   : > { %v3781_v22 = vadd.f32 %v6758_v11, %v3780_v52 }
 0x267   : > { %v3782_v46 = vpop.f32.mrf.mxu0 }
 0x268   : > { %v3871_v0 = vmax.f32 %v3781_v22, 0.0 }
 0x269   : > { %v3783_v16 = vpop.f32.mrf.mxu0 }
 0x26a   : > { %v3784_v21 = vadd.f32 %v6758_v11, %v3783_v16 }
 0x26b   : > { %v3785_v28 = vpop.f32.mrf.mxu0 }
 0x26c   : > { %v3872_v39 = vmax.f32 %v3784_v21, 0.0 }
 0x26e   : > { %v3897_v35 = vpack.c.bf16 %v3872_v39, %v3871_v0 }
 0x270   : > { %4533 = vmatprep.mubr.msk.bf16.mxu1 %vm3308_vm14, %v3897_v35 }
 0x278   : > { %v3788_v45 = vpop.f32.mrf.mxu0 }
 0x279   : > { %v3789_v41 = vadd.f32 %v6758_v11, %v3788_v45 }
 0x27a   : > { %v3790_v29 = vpop.f32.mrf.mxu0 }
 0x27b   : > { %v3873_v9 = vmax.f32 %v3789_v41, 0.0 }
 0x27c   : > { %v3791_v3 = vpop.f32.mrf.mxu0 }
 0x27d   : > { %v3792_v27 = vadd.f32 %v6758_v11, %v3791_v3 }
 0x27e   : > { %v3793_v37 = vpop.f32.mrf.mxu0 }
 0x27f   : > { %v3874_v49 = vmax.f32 %v3792_v27, 0.0 }
 0x280   : > { %v3796_v12 = vpop.f32.mrf.mxu0 }
 0x281   : > { %v3898_v32 = vpack.c.bf16 %v3874_v49, %v3873_v9  ;;  %v3797_v63 = vadd.f32 %v6758_v11, %v3796_v12 }
 0x282   : > { %v3798_v38 = vpop.f32.mrf.mxu0 }
 0x283   : > { %4534 = vmatmul.mubr.msk.bf16.gmra.mxu1 %vm3308_vm14, %v3898_v32  ;;  %v3875_v54 = vmax.f32 %v3797_v63, 0.0 }
 0x284   : > { %v3799_v13 = vpop.f32.mrf.mxu0 }
 0x285   : > { %v3800_v42 = vadd.f32 %v6758_v11, %v3799_v13 }
 0x286   : > { %v3801_v59 = vpop.f32.mrf.mxu0 }
 0x287   : > { %v3876_v8 = vmax.f32 %v3800_v42, 0.0 }
 0x288   : > { %v3804_v36 = vpop.f32.mrf.mxu0 }
 0x289   : > { %v3899_v25 = vpack.c.bf16 %v3876_v8, %v3875_v54  ;;  %v3805_v60 = vadd.f32 %v6758_v11, %v3804_v36  ;;  %v6822_v54 = vld [vmem:[%s6945_s4] ss:$0 sm:$0xff] }
 0x28a   : > { %v3806_v14 = vpop.f32.mrf.mxu0 }
 0x28b   : > { %4537 = vmatprep.mubr.msk.bf16.mxu1 %vm3308_vm14, %v3899_v25  ;;  %v3877_v15 = vmax.f32 %v3805_v60, 0.0 }
 0x28c   : > { %v3807_v5 = vpop.f32.mrf.mxu0 }
 0x28d   : > { %v3808_v7 = vadd.f32 %v6758_v11, %v3807_v5 }
 0x28e   : > { %v3809_v23 = vpop.f32.mrf.mxu0 }
 0x28f   : > { %v3878_v4 = vmax.f32 %v3808_v7, 0.0 }
 0x290   : > { %v3812_v26 = vpop.f32.mrf.mxu0 }
 0x291   : > { %v3900_v50 = vpack.c.bf16 %v3878_v4, %v3877_v15  ;;  %v3813_v34 = vadd.f32 %v6758_v11, %v3812_v26 }
 0x292   : > { %v3814_v17 = vpop.f32.mrf.mxu0 }
 0x293   : > { %4538 = vmatmul.mubr.msk.bf16.gmra.mxu1 %vm3308_vm14, %v3900_v50  ;;  %v3879_v51 = vmax.f32 %v3813_v34, 0.0 }
 0x294   : > { %v3815_v24 = vpop.f32.mrf.mxu0 }
 0x295   : > { %v3816_v43 = vadd.f32 %v6758_v11, %v3815_v24 }
 0x296   : > { %v3817_v19 = vpop.f32.mrf.mxu0 }
 0x297   : > { %v3880_v6 = vmax.f32 %v3816_v43, 0.0 }
 0x299   : > { %v3901_v57 = vpack.c.bf16 %v3880_v6, %v3879_v51 }
 0x29b   : > { %4541 = vmatprep.mubr.msk.bf16.mxu1 %vm3308_vm14, %v3901_v57 }
 0x29f   : > { %v3828_v33 = vpop.f32.mrf.mxu1 }
 0x2a0   : > { %v3829_v30 = vadd.f32 %v6758_v11, %v3828_v33 }
 0x2a1   : > { %v3830_v48 = vpop.f32.mrf.mxu1 }
 0x2a2   : > { %v3883_v55 = vmax.f32 %v3829_v30, 0.0 }
 0x2a3   : > { %v3831_v18 = vpop.f32.mrf.mxu1 }
 0x2a4   : > { %v3832_v31 = vadd.f32 %v6758_v11, %v3831_v18 }
 0x2a5   : > { %v3833_v20 = vpop.f32.mrf.mxu1 }
 0x2a6   : > { %v3884_v62 = vmax.f32 %v3832_v31, 0.0 }
 0x2a8   : > { %v3903_v40 = vpack.c.bf16 %v3884_v62, %v3883_v55 }
 0x2b7   : > { %v3820_v44 = vpop.f32.mrf.mxu0 }
 0x2b8   : > { %v3821_v61 = vadd.f32 %v6758_v11, %v3820_v44 }
 0x2b9   : > { %v3822_v10 = vpop.f32.mrf.mxu0 }
 0x2ba   : > { %v3881_v2 = vmax.f32 %v3821_v61, 0.0 }
 0x2bb   : > { %v3823_v56 = vpop.f32.mrf.mxu0 }
 0x2bc   : > { %v3824_v1 = vadd.f32 %v6758_v11, %v3823_v56 }
 0x2bd   : > { %v3825_v47 = vpop.f32.mrf.mxu0 }
 0x2be   : > { %v3882_v53 = vmax.f32 %v3824_v1, 0.0 }
 0x2c0   : > { %v3902_v58 = vpack.c.bf16 %v3882_v53, %v3881_v2 }
 0x2c2   : > { %4542 = vmatmul.mubr.msk.bf16.gmra.mxu1 %vm3308_vm14, %v3902_v58 }
 0x2c3   : > { %4545 = vmatprep.mubr.msk.bf16.mxu1 %vm3308_vm14, %v3903_v40 }
 0x2ca   : > { %v3836_v52 = vpop.f32.mrf.mxu1 }
 0x2cb   : > { %v3837_v22 = vadd.f32 %v6758_v11, %v3836_v52 }
 0x2cc   : > { %v3838_v46 = vpop.f32.mrf.mxu1 }
 0x2cd   : > { %v3885_v0 = vmax.f32 %v3837_v22, 0.0 }
 0x2ce   : > { %v3839_v16 = vpop.f32.mrf.mxu1 }
 0x2cf   : > { %v3840_v21 = vadd.f32 %v6758_v11, %v3839_v16 }
 0x2d0   : > { %v3841_v28 = vpop.f32.mrf.mxu1 }
 0x2d1   : > { %v3886_v39 = vmax.f32 %v3840_v21, 0.0 }
 0x2d3   : > { %v3904_v35 = vpack.c.bf16 %v3886_v39, %v3885_v0 }
 0x2d5   : > { %4546 = vmatmul.mubr.msk.bf16.gmra.mxu1 %vm3308_vm14, %v3904_v35 }
 0x2e3   : > { %v3844_v45 = vpop.f32.mrf.mxu1 }
 0x2e4   : > { %v3845_v41 = vadd.f32 %v6758_v11, %v3844_v45 }
 0x2e5   : > { %v3846_v29 = vpop.f32.mrf.mxu1 }
 0x2e6   : > { %v3887_v9 = vmax.f32 %v3845_v41, 0.0 }
 0x2e7   : > { %v3847_v3 = vpop.f32.mrf.mxu1 }
 0x2e8   : > { %v3848_v27 = vadd.f32 %v6758_v11, %v3847_v3 }
 0x2e9   : > { %v3849_v37 = vpop.f32.mrf.mxu1 }
 0x2ea   : > { %v3888_v49 = vmax.f32 %v3848_v27, 0.0 }
 0x2ec   : > { %v3905_v12 = vpack.c.bf16 %v3888_v49, %v3887_v9 }
 0x2ee   : > { %4549 = vmatprep.mubr.msk.bf16.mxu1 %vm3308_vm14, %v3905_v12 }
 0x2f2   : > { %v3852_v32 = vpop.f32.mrf.mxu1 }
 0x2f3   : > { %v3853_v63 = vadd.f32 %v6758_v11, %v3852_v32 }
 0x2f4   : > { %v3854_v38 = vpop.f32.mrf.mxu1 }
 0x2f5   : > { %v3889_v8 = vmax.f32 %v3853_v63, 0.0 }
 0x2f6   : > { %v3855_v13 = vpop.f32.mrf.mxu1 }
 0x2f7   : > { %v3856_v42 = vadd.f32 %v6758_v11, %v3855_v13 }
 0x2f8   : > { %v3857_v59 = vpop.f32.mrf.mxu1 }
 0x2f9   : > { %v3890_v36 = vmax.f32 %v3856_v42, 0.0 }
 0x2fa   : > { %v4523_v25 = vpop.f32.mrf.mxu1 }
 0x2fb   : > { %v3906_v14 = vpack.c.bf16 %v3890_v36, %v3889_v8  ;;  %v4013_v60 = vadd.f32 %v4523_v25, %v6822_v54 }
 0x2fc   : > { %v4004_v5 = vpop.f32.mrf.mxu1 }
 0x2fd   : > { %4550 = vmatmul.mubr.msk.bf16.gmra.mxu1 %vm3308_vm14, %v3906_v14  ;;  %4133 = vst [vmem:[%s6826_s7 + $0x10] sm:$0xff] %v4013_v60  ;;  %v4005_v11 = vadd.f32 %v6822_v54, %v4004_v5 }
 0x2fe   : > { %v4524_v7 = vpop.f32.mrf.mxu1 }
 0x2ff   : > { %4131 = vst [vmem:[%s6826_s7] sm:$0xff] %v4005_v11  ;;  %v4016_v23 = vadd.f32 %v4524_v7, %v6822_v54 }
 0x300   : > { %v4007_v15 = vpop.f32.mrf.mxu1 }
 0x301   : > { %4134 = vst [vmem:[%s6826_s7 + $0x18] sm:$0xff] %v4016_v23  ;;  %v4008_v4 = vadd.f32 %v6822_v54, %v4007_v15 }
 0x302   : > { %v4527_v26 = vpop.f32.mrf.mxu1 }
 0x303   : > { %4132 = vst [vmem:[%s6826_s7 + $0x8] sm:$0xff] %v4008_v4  ;;  %v4029_v50 = vadd.f32 %v4527_v26, %v6822_v54 }
 0x304   : > { %v4020_v17 = vpop.f32.mrf.mxu1 }
 0x305   : > { %4137 = vst [vmem:[%s6826_s7 + $0x30] sm:$0xff] %v4029_v50  ;;  %v4021_v34 = vadd.f32 %v6822_v54, %v4020_v17 }
 0x306   : > { %v4528_v24 = vpop.f32.mrf.mxu1 }
 0x307   : > { %4135 = vst [vmem:[%s6826_s7 + $0x20] sm:$0xff] %v4021_v34  ;;  %v4032_v43 = vadd.f32 %v4528_v24, %v6822_v54 }
 0x308   : > { %v4023_v19 = vpop.f32.mrf.mxu1 }
 0x309   : > { %4138 = vst [vmem:[%s6826_s7 + $0x38] sm:$0xff] %v4032_v43  ;;  %v4024_v51 = vadd.f32 %v6822_v54, %v4023_v19 }
 0x30b   : > { %4136 = vst [vmem:[%s6826_s7 + $0x28] sm:$0xff] %v4024_v51 }
 0x317   : > { %v4531_v6 = vpop.f32.mrf.mxu1 }
 0x318   : > { %v4045_v57 = vadd.f32 %v4531_v6, %v6822_v54 }
 0x319   : > { %v4036_v33 = vpop.f32.mrf.mxu1 }
 0x31a   : > { %4141 = vst [vmem:[%s6826_s7 + $0x50] sm:$0xff] %v4045_v57  ;;  %v4037_v48 = vadd.f32 %v6822_v54, %v4036_v33 }
 0x31b   : > { %v4532_v18 = vpop.f32.mrf.mxu1 }
 0x31c   : > { %4139 = vst [vmem:[%s6826_s7 + $0x40] sm:$0xff] %v4037_v48  ;;  %v4048_v20 = vadd.f32 %v4532_v18, %v6822_v54 }
 0x31d   : > { %v4039_v44 = vpop.f32.mrf.mxu1 }
 0x31e   : > { %4142 = vst [vmem:[%s6826_s7 + $0x58] sm:$0xff] %v4048_v20  ;;  %v4040_v31 = vadd.f32 %v6822_v54, %v4039_v44 }
 0x320   : > { %4140 = vst [vmem:[%s6826_s7 + $0x48] sm:$0xff] %v4040_v31 }
 0x343   : > { %v4535_v10 = vpop.f32.mrf.mxu1 }
 0x344   : > { %v4061_v61 = vadd.f32 %v4535_v10, %v6822_v54 }
 0x345   : > { %v4052_v30 = vpop.f32.mrf.mxu1 }
 0x346   : > { %4145 = vst [vmem:[%s6826_s7 + $0x70] sm:$0xff] %v4061_v61  ;;  %v4053_v56 = vadd.f32 %v6822_v54, %v4052_v30 }
 0x347   : > { %v4536_v1 = vpop.f32.mrf.mxu1 }
 0x348   : > { %4143 = vst [vmem:[%s6826_s7 + $0x60] sm:$0xff] %v4053_v56  ;;  %v4064_v62 = vadd.f32 %v4536_v1, %v6822_v54 }
 0x349   : > { %v4055_v47 = vpop.f32.mrf.mxu1 }
 0x34a   : > { %4146 = vst [vmem:[%s6826_s7 + $0x78] sm:$0xff] %v4064_v62  ;;  %v4056_v2 = vadd.f32 %v6822_v54, %v4055_v47 }
 0x34c   : > { %4144 = vst [vmem:[%s6826_s7 + $0x68] sm:$0xff] %v4056_v2 }
 0x353   : > { %v4539_v53 = vpop.f32.mrf.mxu1 }
 0x354   : > { %v4077_v55 = vadd.f32 %v4539_v53, %v6822_v54 }
 0x355   : > { %v4068_v58 = vpop.f32.mrf.mxu1 }
 0x356   : > { %4149 = vst [vmem:[%s6826_s7 + $0x90] sm:$0xff] %v4077_v55  ;;  %v4069_v40 = vadd.f32 %v6822_v54, %v4068_v58 }
 0x357   : > { %v4540_v52 = vpop.f32.mrf.mxu1 }
 0x358   : > { %4147 = vst [vmem:[%s6826_s7 + $0x80] sm:$0xff] %v4069_v40  ;;  %v4080_v46 = vadd.f32 %v4540_v52, %v6822_v54 }
 0x359   : > { %v4071_v22 = vpop.f32.mrf.mxu1 }
 0x35a   : > { %4150 = vst [vmem:[%s6826_s7 + $0x98] sm:$0xff] %v4080_v46  ;;  %v4072_v16 = vadd.f32 %v6822_v54, %v4071_v22 }
 0x35c   : > { %4148 = vst [vmem:[%s6826_s7 + $0x88] sm:$0xff] %v4072_v16 }
 0x382   : > { %v4543_v21 = vpop.f32.mrf.mxu1 }
 0x383   : > { %v4093_v28 = vadd.f32 %v4543_v21, %v6822_v54 }
 0x384   : > { %v4084_v0 = vpop.f32.mrf.mxu1 }
 0x385   : > { %4153 = vst [vmem:[%s6826_s7 + $0xb0] sm:$0xff] %v4093_v28  ;;  %v4085_v39 = vadd.f32 %v6822_v54, %v4084_v0 }
 0x386   : > { %v4544_v35 = vpop.f32.mrf.mxu1 }
 0x387   : > { %4151 = vst [vmem:[%s6826_s7 + $0xa0] sm:$0xff] %v4085_v39  ;;  %v4096_v45 = vadd.f32 %v4544_v35, %v6822_v54 }
 0x388   : > { %v4087_v29 = vpop.f32.mrf.mxu1 }
 0x389   : > { %4154 = vst [vmem:[%s6826_s7 + $0xb8] sm:$0xff] %v4096_v45  ;;  %v4088_v41 = vadd.f32 %v6822_v54, %v4087_v29 }
 0x38b   : > { %4152 = vst [vmem:[%s6826_s7 + $0xa8] sm:$0xff] %v4088_v41 }
 0x395   : > { %v4547_v3 = vpop.f32.mrf.mxu1 }
 0x396   : > { %v4109_v27 = vadd.f32 %v4547_v3, %v6822_v54 }
 0x397   : > { %v4100_v37 = vpop.f32.mrf.mxu1 }
 0x398   : > { %4157 = vst [vmem:[%s6826_s7 + $0xd0] sm:$0xff] %v4109_v27  ;;  %v4101_v9 = vadd.f32 %v6822_v54, %v4100_v37 }
 0x399   : > { %v4548_v49 = vpop.f32.mrf.mxu1 }
 0x39a   : > { %4155 = vst [vmem:[%s6826_s7 + $0xc0] sm:$0xff] %v4101_v9  ;;  %v4112_v12 = vadd.f32 %v4548_v49, %v6822_v54 }
 0x39b   : > { %v4103_v32 = vpop.f32.mrf.mxu1 }
 0x39c   : > { %4158 = vst [vmem:[%s6826_s7 + $0xd8] sm:$0xff] %v4112_v12  ;;  %v4104_v38 = vadd.f32 %v6822_v54, %v4103_v32 }
 0x39e   : > { %4156 = vst [vmem:[%s6826_s7 + $0xc8] sm:$0xff] %v4104_v38 }
 0x3bd   : > { %v4551_v63 = vpop.f32.mrf.mxu1 }
 0x3be   : > { %v4125_v13 = vadd.f32 %v4551_v63, %v6822_v54 }
 0x3bf   : > { %v4116_v42 = vpop.f32.mrf.mxu1 }
 0x3c0   : > { %4161 = vst [vmem:[%s6826_s7 + $0xf0] sm:$0xff] %v4125_v13  ;;  %v4117_v59 = vadd.f32 %v6822_v54, %v4116_v42 }
 0x3c1   : > { %v4552_v8 = vpop.f32.mrf.mxu1 }
 0x3c2   : > { %4159 = vst [vmem:[%s6826_s7 + $0xe0] sm:$0xff] %v4117_v59  ;;  %v4128_v36 = vadd.f32 %v4552_v8, %v6822_v54 }
 0x3c3   : > { %v4119_v25 = vpop.f32.mrf.mxu1 }
 0x3c4   : > { %4162 = vst [vmem:[%s6826_s7 + $0xf8] sm:$0xff] %v4128_v36  ;;  %v4120_v14 = vadd.f32 %v6822_v54, %v4119_v25 }
 0x3c6   : > { %4160 = vst [vmem:[%s6826_s7 + $0xe8] sm:$0xff] %v4120_v14 }
 0x3c7   : > { %4758 = shalt.err (!%p4755_p10)
}
 0x3c8   : > { %s4759_s29 = scalar_lea.hbm %s6893_s10, 4096  ;;  %s4763_s16 = scalar_lea.hbm %s6946_s5, 8192 }
 0x3c9   : > { %p4760_p0 = scmp.ne.s32.totalorder %s6893_s10, %s4759_s29  ;;  %p4764_p1 = scmp.lt.s32.totalorder %s6893_s10, %s6946_s5 }
 0x3ca   : > { %p4765_p3 = scmp.lt.s32.totalorder %s4763_s16, %s4759_s29 }
 0x3cb   : > { %p4761_p2 = pnand %p4760_p0, %p7011_p12 }
 0x3cc   : > { %p4766_p6 = por %p4765_p3, %p4764_p1 }
 0x3cd   : > { %p4762_p9 = pneg %p4761_p2 }
 0x3cf   : > { %p4767_p11 = pnand %p4766_p6, %p4762_p9 }
 0x3d1   : > { %4770 = shalt.err (!%p4767_p11)
}
 0x3d2   : > { %s4823_s17 = smov 128   ;;  %s4824_s26 = smov 8  }
 0x3d3   : > { %4573 = dma.vmem_to_hbm [thread:$0]  (%p7011_p12), %s6895_s25, 4096, %s6893_s10, %s4164_s22, %s4823_s17, %s4823_s17, %s4824_s26  }
 0x3d4 PF: > { %s4192_s9 = sand.u32 1, %s4797_s18   ;;  %p7012_p13 = scmp.ne.s32.totalorder %s6960_s6, 0 }
 0x3d5   : > { %p7013_p4 = scmp.ge.s32.totalorder %s4809_s21, 2  ;;  %s4193_s11 = scalar_lea.sflag [#allocation5], %s4192_s9 }
 0x3d7   : > { %p4580_p5 = pnand %p7013_p4, %p7012_p13 }
 0x3d9   : > { %p4581_p7 = pneg %p4580_p5 }
 0x3db   : > { %4792 = dma.done.wait (%p4581_p7), %s4193_s11, 4096  }
 0x3dc   : > { %4794 = vsyncadd (%p4581_p7), %s4193_s11, 4294963200  ;;  %p18_p8 = scmp.ge.s32.totalorder %s4880_s24, 4   ;;  %s7014_s18 = smov %s4801_s19 }
 0x3dd   : > { %s7015_s19 = smov %s4805_s20  ;;  %s7016_s20 = smov %s4892_s27 }
 0x3de   : > { %s7017_s21 = smov %s4880_s24  ;;  %20 = sbr.rel (!%p18_p8) target bundleno = 5 (0x5), region = 87 }
 0x3e3   :  { %4198 = vsyncpa [#allocation4], 1 }
 0x3e4   :  { %4200 = vsyncpa [#allocation4 + $0x1], 1 }
 0x3e5   :  { %4201 = vsyncpa [#allocation5], 1 }
 0x3e6   :  { %4203 = vsyncpa [#allocation5 + $0x1], 1 }

</bundles_post_ra>
